<compile_context>
chip_gen: v6e
topology: v6e:2x2x1
jax: 0.10.0
libtpu: 0.0.40
codegen_flags: <defaults>
</compile_context>

<pallas_src>
import functools

import jax
import jax.numpy as jnp
from jax.experimental import pallas as pl
from jax.experimental.pallas import tpu as pltpu

EPS = 1e-5
LANE = 128


# --------------------------------------------------------------------------
# small helpers
# --------------------------------------------------------------------------
def _round_up(x, m):
    return ((x + m - 1) // m) * m


def _pick_tile(m, target):
    """Largest multiple of 16 that divides m and is <= target (else m)."""
    if m <= target:
        return m
    t = (min(target, m) // 16) * 16
    while t >= 16:
        if m % t == 0:
            return t
        t -= 16
    # TODO(synk): fall back to masked partial tiles (pl.cdiv grid) for awkward M.
    return m


def _pad_to(a, shape):
    return jnp.pad(a, [(0, s - d) for d, s in zip(a.shape, shape)])


def _vmem_limit_bytes():
    """Generation-aware VMEM budget (v7x: 64 MiB/TC, v5e/v6e: 128 MiB)."""
    try:
        cap = pltpu.get_tpu_info().vmem_capacity_bytes
    except Exception:
        cap = 64 * 1024 * 1024  # conservative (v7x-class) fallback
    if cap <= 64 * 1024 * 1024:
        return 40 * 1024 * 1024
    return 64 * 1024 * 1024


def _cparams(vmem_limit):
    return pltpu.CompilerParams(
        dimension_semantics=("parallel",),
        vmem_limit_bytes=vmem_limit,
    )


def _store_stats(s_ref, y):
    """Single store of per-channel [sum, sum-of-squares] of an f32 (rows, C) tile."""
    ssum = jnp.sum(y, axis=0, keepdims=True)           # (1, C)
    ssq = jnp.sum(y * y, axis=0, keepdims=True)        # (1, C)
    s_ref[...] = jnp.concatenate([ssum, ssq], axis=0)[None]   # (1, 2, C)


def _affine_from_stats(stats, count, gamma_p, beta_p):
    """Global batch stats -> per-channel (scale, shift) so BN is one FMA."""
    tot = jnp.sum(stats, axis=0)                        # (2, C)
    mean = tot[0] / count                               # (C,)
    var = jnp.maximum(tot[1] / count - mean * mean, 0.0)
    scale = gamma_p * jax.lax.rsqrt(var + EPS)          # (1, C)
    shift = beta_p - mean[None, :] * scale              # (1, C)
    return scale.astype(jnp.float32), shift.astype(jnp.float32)


# --------------------------------------------------------------------------
# kernels
# --------------------------------------------------------------------------
def _conv1_kernel(x_ref, w1_ref, y1_ref, s1_ref):
    """1x1 conv (row tile, bf16 MXU operands, f32 acc) + partial BN1 stats."""
    y = jnp.dot(x_ref[...].astype(jnp.bfloat16), w1_ref[...],
                preferred_element_type=jnp.float32)
    y1_ref[...] = y.astype(jnp.bfloat16)
    _store_stats(s1_ref, y)


def _conv2_kernel(y1_ref, sc1_ref, sh1_ref, w2_ref, y2_ref, s2_ref, pad_ref,
                  *, H, W, Wpad):
    """BN1+ReLU -> 3x3 conv (stride 1, pad 1) per image + partial BN2 stats."""
    Pp = y1_ref.shape[-1]
    HW = H * W

    # BN1 (precomputed scale/shift) + ReLU in f32, then cast to bf16 once.
    a = jnp.maximum(
        y1_ref[...].astype(jnp.float32) * sc1_ref[...] + sh1_ref[...], 0.0)
    a3 = a.astype(jnp.bfloat16).reshape(H, W, Pp)

    # Stage into the bf16 halo'd scratch using only aligned full-width stores:
    # rows 0 / H+1 are the zero top/bottom halo; interior rows carry the image
    # with one zero column on the left and (Wpad - W - 1) on the right (only
    # columns [0, W+2) are ever read).  Re-zeroed every step on purpose: on
    # megacore each core has its own scratch, so a first-step-only guard would
    # leave the second core's halo uninitialized.
    zrow = jnp.zeros((1, Wpad, Pp), jnp.bfloat16)
    pad_ref[0:1, :, :] = zrow
    pad_ref[H + 1:H + 2, :, :] = zrow
    zl = jnp.zeros((H, 1, Pp), jnp.bfloat16)
    zr = jnp.zeros((H, Wpad - W - 1, Pp), jnp.bfloat16)
    pad_ref[1:H + 1, :, :] = jnp.concatenate([zl, a3, zr], axis=1)

    # 3 row-shifted aligned reads; the 3 column taps are folded into the MXU K
    # dimension (K = 3*Pp) -> 3 deep accumulating dots instead of 9 shallow ones.
    acc = None
    for dh in range(3):
        rows = pad_ref[dh:dh + H, :, :]                       # (H, Wpad, Pp)
        lhs = jnp.concatenate(
            [rows[:, 0:W, :], rows[:, 1:W + 1, :], rows[:, 2:W + 2, :]],
            axis=-1).reshape(HW, 3 * Pp)
        d = jnp.dot(lhs, w2_ref[dh], preferred_element_type=jnp.float32)
        acc = d if acc is None else acc + d

    y2_ref[...] = acc.astype(jnp.bfloat16)
    _store_stats(s2_ref, acc)


def _conv3_kernel(y2_ref, sc2_ref, sh2_ref, w3_ref, y3_ref, s3_ref):
    """BN2+ReLU -> 1x1 conv (row tile) + partial BN3 stats (f32 output)."""
    a = jnp.maximum(
        y2_ref[...].astype(jnp.float32) * sc2_ref[...] + sh2_ref[...], 0.0)
    y = jnp.dot(a.astype(jnp.bfloat16), w3_ref[...],
                preferred_element_type=jnp.float32)
    y3_ref[...] = y
    _store_stats(s3_ref, y)


def _bn3_add_relu_kernel(y3_ref, sc3_ref, sh3_ref, x_ref, out_ref):
    """BN3 + identity residual + ReLU (row tile)."""
    out_ref[...] = jnp.maximum(
        y3_ref[...] * sc3_ref[...] + sh3_ref[...] + x_ref[...], 0.0)


# --------------------------------------------------------------------------
# wrapper
# --------------------------------------------------------------------------
@jax.jit
def bottleneck_forward(x_nchw, params):
    x = jnp.transpose(x_nchw, (0, 2, 3, 1)).astype(jnp.float32)   # NCHW->NHWC
    N, H, W, Cin = x.shape
    planes = params["w1"].shape[1]
    Cout = params["w3"].shape[1]
    assert Cin == Cout, "identity residual requires inplanes == planes*4"
    assert (H * W) % 16 == 0

    Pp = _round_up(planes, LANE)        # lane-dense channel dims
    Cp = _round_up(Cin, LANE)
    M = N * H * W
    HW = H * W
    Wpad = _round_up(W + 2, 16)         # sublane-aligned halo width (bf16)

    vmem_limit = _vmem_limit_bytes()
    # Heaviest 1x1/elementwise stage keeps ~3 f32 (TM, Cp) blocks x 2 pipeline
    # buffers live; size TM so that stays inside half the VMEM budget.
    tm_cap = (vmem_limit // 2) // (24 * Cp)
    TM = _pick_tile(M, max(256, min(4096, int(tm_cap))))
    nt = M // TM

    # zero-pad channels; padded channels stay exactly zero end-to-end
    w1 = _pad_to(params["w1"], (Cp, Pp)).astype(jnp.bfloat16)
    # 3x3 weights pre-folded so the 3 column taps live in the MXU K dim:
    # (dh, dw, cin, cout) -> (dh, dw*Pp + cin, cout)
    w2 = _pad_to(params["w2"], (3, 3, Pp, Pp)).astype(jnp.bfloat16)
    w2 = w2.reshape(3, 3 * Pp, Pp)
    w3 = _pad_to(params["w3"], (Pp, Cp)).astype(jnp.bfloat16)
    g1 = _pad_to(params["g1"], (1, Pp)); b1 = _pad_to(params["b1"], (1, Pp))
    g2 = _pad_to(params["g2"], (1, Pp)); b2 = _pad_to(params["b2"], (1, Pp))
    g3 = _pad_to(params["g3"], (1, Cp)); b3 = _pad_to(params["b3"], (1, Cp))

    x2d = _pad_to(x, (N, H, W, Cp)).reshape(M, Cp)     # f32; conv1 input + residual

    # ---- stage 1: conv1 (1x1) + partial BN1 stats (y1 stored bf16) ----------
    y1, s1 = pl.pallas_call(
        _conv1_kernel,
        grid=(nt,),
        in_specs=[pl.BlockSpec((TM, Cp), lambda i: (i, 0)),
                  pl.BlockSpec((Cp, Pp), lambda i: (0, 0))],
        out_specs=(pl.BlockSpec((TM, Pp), lambda i: (i, 0)),
                   pl.BlockSpec((1, 2, Pp), lambda i: (i, 0, 0))),
        out_shape=(jax.ShapeDtypeStruct((M, Pp), jnp.bfloat16),
                   jax.ShapeDtypeStruct((nt, 2, Pp), jnp.float32)),
        compiler_params=_cparams(vmem_limit),
    )(x2d, w1)
    sc1, sh1 = _affine_from_stats(s1, M, g1, b1)

    # ---- stage 2: BN1+ReLU -> conv2 (3x3) + partial BN2 stats (y2 bf16) -----
    k2 = functools.partial(_conv2_kernel, H=H, W=W, Wpad=Wpad)
    y2, s2 = pl.pallas_call(
        k2,
        grid=(N,),
        in_specs=[pl.BlockSpec((HW, Pp), lambda n: (n, 0)),
                  pl.BlockSpec((1, Pp), lambda n: (0, 0)),
                  pl.BlockSpec((1, Pp), lambda n: (0, 0)),
                  pl.BlockSpec((3, 3 * Pp, Pp), lambda n: (0, 0, 0))],
        out_specs=(pl.BlockSpec((HW, Pp), lambda n: (n, 0)),
                   pl.BlockSpec((1, 2, Pp), lambda n: (n, 0, 0))),
        out_shape=(jax.ShapeDtypeStruct((M, Pp), jnp.bfloat16),
                   jax.ShapeDtypeStruct((N, 2, Pp), jnp.float32)),
        scratch_shapes=[pltpu.VMEM((H + 2, Wpad, Pp), jnp.bfloat16)],
        compiler_params=_cparams(vmem_limit),
    )(y1, sc1, sh1, w2)
    sc2, sh2 = _affine_from_stats(s2, M, g2, b2)

    # ---- stage 3: BN2+ReLU -> conv3 (1x1) + partial BN3 stats (y3 f32) ------
    y3, s3 = pl.pallas_call(
        _conv3_kernel,
        grid=(nt,),
        in_specs=[pl.BlockSpec((TM, Pp), lambda i: (i, 0)),
                  pl.BlockSpec((1, Pp), lambda i: (0, 0)),
                  pl.BlockSpec((1, Pp), lambda i: (0, 0)),
                  pl.BlockSpec((Pp, Cp), lambda i: (0, 0))],
        out_specs=(pl.BlockSpec((TM, Cp), lambda i: (i, 0)),
                   pl.BlockSpec((1, 2, Cp), lambda i: (i, 0, 0))),
        out_shape=(jax.ShapeDtypeStruct((M, Cp), jnp.float32),
                   jax.ShapeDtypeStruct((nt, 2, Cp), jnp.float32)),
        compiler_params=_cparams(vmem_limit),
    )(y2, sc2, sh2, w3)
    sc3, sh3 = _affine_from_stats(s3, M, g3, b3)

    # ---- stage 4: BN3 + identity residual + ReLU ----------------------------
    out2d = pl.pallas_call(
        _bn3_add_relu_kernel,
        grid=(nt,),
        in_specs=[pl.BlockSpec((TM, Cp), lambda i: (i, 0)),
                  pl.BlockSpec((1, Cp), lambda i: (0, 0)),
                  pl.BlockSpec((1, Cp), lambda i: (0, 0)),
                  pl.BlockSpec((TM, Cp), lambda i: (i, 0))],
        out_specs=pl.BlockSpec((TM, Cp), lambda i: (i, 0)),
        out_shape=jax.ShapeDtypeStruct((M, Cp), jnp.float32),
        compiler_params=_cparams(vmem_limit),
    )(y3, sc3, sh3, x2d)

    out = out2d.reshape(N, H, W, Cp)[..., :Cout]
    return jnp.transpose(out, (0, 3, 1, 2))            # NHWC -> NCHW


# --------------------------------------------------------------------------
# pure-JAX reference (same math; bf16 matmul operands, BN on f32 conv outputs)
# --------------------------------------------------------------------------
def bottleneck_ref(x_nchw, p):
    x = jnp.transpose(x_nchw, (0, 2, 3, 1)).astype(jnp.float32)

    def bn(y, g, b):
        m = jnp.mean(y, axis=(0, 1, 2))
        v = jnp.mean(y * y, axis=(0, 1, 2)) - m * m
        return (y - m) * jax.lax.rsqrt(v + EPS) * g + b

    def mm(a, w):
        return jnp.einsum("nhwc,cd->nhwd", a.astype(jnp.bfloat16),
                          w.astype(jnp.bfloat16),
                          preferred_element_type=jnp.float32)

    y = jax.nn.relu(bn(mm(x, p["w1"]), p["g1"][0], p["b1"][0]))
    y = jax.lax.conv_general_dilated(
        y.astype(jnp.bfloat16), p["w2"].astype(jnp.bfloat16),
        window_strides=(1, 1), padding="SAME",
        dimension_numbers=("NHWC", "HWIO", "NHWC"),
        preferred_element_type=jnp.float32)
    y = jax.nn.relu(bn(y, p["g2"][0], p["b2"][0]))
    y = bn(mm(y, p["w3"]), p["g3"][0], p["b3"][0])
    y = jax.nn.relu(y + x)
    return jnp.transpose(y, (0, 3, 1, 2))


def make_params(key, inplanes, planes):
    ks = jax.random.split(key, 9)
    cout = planes * 4
    return {
        # conv weights stored kernel-friendly: 1x1 -> (Cin, Cout), 3x3 -> HWIO
        "w1": 0.1 * jax.random.normal(ks[0], (inplanes, planes), jnp.float32),
        "w2": 0.1 * jax.random.normal(ks[1], (3, 3, planes, planes), jnp.float32),
        "w3": 0.1 * jax.random.normal(ks[2], (planes, cout), jnp.float32),
        # BN affine params, shape (1, C)
        "g1": 1.0 + 0.1 * jax.random.normal(ks[3], (1, planes), jnp.float32),
        "b1": 0.1 * jax.random.normal(ks[4], (1, planes), jnp.float32),
        "g2": 1.0 + 0.1 * jax.random.normal(ks[5], (1, planes), jnp.float32),
        "b2": 0.1 * jax.random.normal(ks[6], (1, planes), jnp.float32),
        "g3": 1.0 + 0.1 * jax.random.normal(ks[7], (1, cout), jnp.float32),
        "b3": 0.1 * jax.random.normal(ks[8], (1, cout), jnp.float32),
    }


if __name__ == "__main__":
    key = jax.random.PRNGKey(0)
    k_x, k_p = jax.random.split(key)

    N, planes, H, W = 2, 4, 16, 16
    inplanes = planes * 4  # identity residual (downsample=None)

    x = jax.random.normal(k_x, (N, inplanes, H, W), jnp.float32)  # NCHW
    params = make_params(k_p, inplanes, planes)

    out = jax.block_until_ready(bottleneck_forward(x, params))
    ref = jax.block_until_ready(bottleneck_ref(x, params))

    assert out.shape == (N, planes * 4, H, W)
    err = float(jnp.max(jnp.abs(out - ref)))
    # bf16 intermediate storage (y1/y2) adds ~bf16-ulp-level divergence vs the
    # f32-intermediate reference; 3e-2 comfortably bounds it at these scales.
    assert jnp.allclose(out, ref, atol=3e-2, rtol=3e-2), f"max abs err = {err}"

    print("KERNEL_OK")
</pallas_src>

<mosaic_0001>
module attributes {stable_mosaic.version = 11 : i64} {
  func.func @_conv1_kernel(%arg0: i32, %arg1: memref<512x128xf32, #tpu.memory_space<vmem>>, %arg2: memref<128x128xbf16, #tpu.memory_space<vmem>>, %arg3: memref<512x128xbf16, #tpu.memory_space<vmem>>, %arg4: memref<1x2x128xf32, #tpu.memory_space<vmem>>) attributes {dimension_semantics = [#tpu.dimension_semantics<parallel>], iteration_bounds = array<i64: 1>, scalar_prefetch = 0 : i64, scratch_operands = 0 : i64, tpu.core_type = #tpu.core_type<tc>, window_params = [{transform_indices = @transform_0, window_bounds = array<i64: 512, 128>}, {pipeline_mode = #tpu.pipeline_mode<synchronous>, transform_indices = @transform_1, window_bounds = array<i64: 128, 128>}, {transform_indices = @transform_2, window_bounds = array<i64: 512, 128>}, {transform_indices = @transform_3, window_bounds = array<i64: 1, 2, 128>}]} {
    %c0 = arith.constant 0 : index
    %c0_0 = arith.constant 0 : index
    %0 = vector.load %arg1[%c0, %c0_0] : memref<512x128xf32, #tpu.memory_space<vmem>>, vector<512x128xf32>
    %1 = arith.truncf %0 : vector<512x128xf32> to vector<512x128xbf16>
    %c0_1 = arith.constant 0 : index
    %c0_2 = arith.constant 0 : index
    %2 = vector.load %arg2[%c0_1, %c0_2] : memref<128x128xbf16, #tpu.memory_space<vmem>>, vector<128x128xbf16>
    %cst = arith.constant dense<0.000000e+00> : vector<512x128xf32>
    %3 = tpu.matmul %1, %2, %cst {dimension_numbers = #tpu.dot_dimension_numbers<[1], [0], [0], [1], [0, 0, 1, 1], [], []>} : vector<512x128xbf16>, vector<128x128xbf16>, vector<512x128xf32> -> vector<512x128xf32>
    %4 = arith.truncf %3 : vector<512x128xf32> to vector<512x128xbf16>
    %c0_3 = arith.constant 0 : index
    %c0_4 = arith.constant 0 : index
    %5 = vector.load %arg3[%c0_3, %c0_4] : memref<512x128xbf16, #tpu.memory_space<vmem>>, vector<512x128xbf16>
    tpu.vector_store %arg3[%c0_3, %c0_4], %4 {strides = array<i32>} : memref<512x128xbf16, #tpu.memory_space<vmem>>, vector<512x128xbf16>,
    %cst_5 = arith.constant dense<0.000000e+00> : vector<128xf32>
    %6 = vector.multi_reduction <add>, %3, %cst_5 [0] : vector<512x128xf32> to vector<128xf32>
    %7 = vector.shape_cast %6 : vector<128xf32> to vector<1x128xf32>
    %8 = arith.mulf %3, %3 : vector<512x128xf32>
    %cst_6 = arith.constant dense<0.000000e+00> : vector<128xf32>
    %9 = vector.multi_reduction <add>, %8, %cst_6 [0] : vector<512x128xf32> to vector<128xf32>
    %10 = vector.shape_cast %9 : vector<128xf32> to vector<1x128xf32>
    %11 = tpu.concatenate %7, %10 in 0 : vector<1x128xf32>, vector<1x128xf32> -> vector<2x128xf32>
    %12 = vector.shape_cast %11 : vector<2x128xf32> to vector<1x2x128xf32>
    %c0_7 = arith.constant 0 : index
    %c0_8 = arith.constant 0 : index
    %c0_9 = arith.constant 0 : index
    %13 = vector.load %arg4[%c0_7, %c0_8, %c0_9] : memref<1x2x128xf32, #tpu.memory_space<vmem>>, vector<1x2x128xf32>
    tpu.vector_store %arg4[%c0_7, %c0_8, %c0_9], %12 {strides = array<i32>} : memref<1x2x128xf32, #tpu.memory_space<vmem>>, vector<1x2x128xf32>,
    return
  }
  func.func @transform_0(%arg0: i32) -> (i32, i32) {
    %c0_i32 = arith.constant 0 : i32
    %c0_i32_0 = arith.constant 0 : i32
    return %arg0, %c0_i32 : i32, i32
  }
  func.func @transform_1(%arg0: i32) -> (i32, i32) {
    %c0_i32 = arith.constant 0 : i32
    %c0_i32_0 = arith.constant 0 : i32
    %c0_i32_1 = arith.constant 0 : i32
    return %c0_i32, %c0_i32_0 : i32, i32
  }
  func.func @transform_2(%arg0: i32) -> (i32, i32) {
    %c0_i32 = arith.constant 0 : i32
    %c0_i32_0 = arith.constant 0 : i32
    return %arg0, %c0_i32 : i32, i32
  }
  func.func @transform_3(%arg0: i32) -> (i32, i32, i32) {
    %c0_i32 = arith.constant 0 : i32
    %c0_i32_0 = arith.constant 0 : i32
    %c0_i32_1 = arith.constant 0 : i32
    return %arg0, %c0_i32, %c0_i32_0 : i32, i32, i32
  }
}

module attributes {stable_mosaic.version = 11 : i64} {
  func.func @_conv2_kernel(%arg0: i32, %arg1: memref<256x128xbf16, #tpu.memory_space<vmem>>, %arg2: memref<1x128xf32, #tpu.memory_space<vmem>>, %arg3: memref<1x128xf32, #tpu.memory_space<vmem>>, %arg4: memref<3x384x128xbf16, #tpu.memory_space<vmem>>, %arg5: memref<256x128xbf16, #tpu.memory_space<vmem>>, %arg6: memref<1x2x128xf32, #tpu.memory_space<vmem>>, %arg7: memref<18x32x128xbf16, #tpu.memory_space<vmem>>) attributes {dimension_semantics = [#tpu.dimension_semantics<parallel>], iteration_bounds = array<i64: 2>, scalar_prefetch = 0 : i64, scratch_operands = 1 : i64, tpu.core_type = #tpu.core_type<tc>, window_params = [{transform_indices = @transform_0, window_bounds = array<i64: 256, 128>}, {pipeline_mode = #tpu.pipeline_mode<synchronous>, transform_indices = @transform_1, window_bounds = array<i64: 1, 128>}, {pipeline_mode = #tpu.pipeline_mode<synchronous>, transform_indices = @transform_2, window_bounds = array<i64: 1, 128>}, {pipeline_mode = #tpu.pipeline_mode<synchronous>, transform_indices = @transform_3, window_bounds = array<i64: 3, 384, 128>}, {transform_indices = @transform_4, window_bounds = array<i64: 256, 128>}, {transform_indices = @transform_5, window_bounds = array<i64: 1, 2, 128>}]} {
    %c0 = arith.constant 0 : index
    %c0_0 = arith.constant 0 : index
    %0 = vector.load %arg1[%c0, %c0_0] : memref<256x128xbf16, #tpu.memory_space<vmem>>, vector<256x128xbf16>
    %1 = arith.extf %0 : vector<256x128xbf16> to vector<256x128xf32>
    %c0_1 = arith.constant 0 : index
    %c0_2 = arith.constant 0 : index
    %2 = vector.load %arg2[%c0_1, %c0_2] : memref<1x128xf32, #tpu.memory_space<vmem>>, vector<1x128xf32>
    %3 = vector.broadcast %2 : vector<1x128xf32> to vector<256x128xf32>
    %4 = arith.mulf %1, %3 : vector<256x128xf32>
    %c0_3 = arith.constant 0 : index
    %c0_4 = arith.constant 0 : index
    %5 = vector.load %arg3[%c0_3, %c0_4] : memref<1x128xf32, #tpu.memory_space<vmem>>, vector<1x128xf32>
    %6 = vector.broadcast %5 : vector<1x128xf32> to vector<256x128xf32>
    %7 = arith.addf %4, %6 : vector<256x128xf32>
    %cst = arith.constant 0.000000e+00 : f32
    %8 = vector.broadcast %cst : f32 to vector<256x128xf32>
    %9 = arith.maximumf %7, %8 : vector<256x128xf32>
    %10 = arith.truncf %9 : vector<256x128xf32> to vector<256x128xbf16>
    %11 = vector.shape_cast %10 : vector<256x128xbf16> to vector<16x16x128xbf16>
    %cst_5 = arith.constant 0.000000e+00 : bf16
    %12 = vector.broadcast %cst_5 : bf16 to vector<1x32x128xbf16>
    %c0_6 = arith.constant 0 : index
    %c0_7 = arith.constant 0 : index
    %c0_8 = arith.constant 0 : index
    %13 = vector.load %arg7[%c0_6, %c0_7, %c0_8] : memref<18x32x128xbf16, #tpu.memory_space<vmem>>, vector<1x32x128xbf16>
    tpu.vector_store %arg7[%c0_6, %c0_7, %c0_8], %12 {strides = array<i32>} : memref<18x32x128xbf16, #tpu.memory_space<vmem>>, vector<1x32x128xbf16>,
    %c17 = arith.constant 17 : index
    %c0_9 = arith.constant 0 : index
    %c0_10 = arith.constant 0 : index
    %14 = vector.load %arg7[%c17, %c0_9, %c0_10] : memref<18x32x128xbf16, #tpu.memory_space<vmem>>, vector<1x32x128xbf16>
    tpu.vector_store %arg7[%c17, %c0_9, %c0_10], %12 {strides = array<i32>} : memref<18x32x128xbf16, #tpu.memory_space<vmem>>, vector<1x32x128xbf16>,
    %cst_11 = arith.constant 0.000000e+00 : bf16
    %15 = vector.broadcast %cst_11 : bf16 to vector<16x1x128xbf16>
    %cst_12 = arith.constant 0.000000e+00 : bf16
    %16 = vector.broadcast %cst_12 : bf16 to vector<16x15x128xbf16>
    %17 = tpu.concatenate %15, %11, %16 in 1 : vector<16x1x128xbf16>, vector<16x16x128xbf16>, vector<16x15x128xbf16> -> vector<16x32x128xbf16>
    %c1 = arith.constant 1 : index
    %c0_13 = arith.constant 0 : index
    %c0_14 = arith.constant 0 : index
    %18 = vector.load %arg7[%c1, %c0_13, %c0_14] : memref<18x32x128xbf16, #tpu.memory_space<vmem>>, vector<16x32x128xbf16>
    tpu.vector_store %arg7[%c1, %c0_13, %c0_14], %17 {strides = array<i32>} : memref<18x32x128xbf16, #tpu.memory_space<vmem>>, vector<16x32x128xbf16>,
    %c0_15 = arith.constant 0 : index
    %c0_16 = arith.constant 0 : index
    %c0_17 = arith.constant 0 : index
    %19 = vector.load %arg7[%c0_15, %c0_16, %c0_17] : memref<18x32x128xbf16, #tpu.memory_space<vmem>>, vector<16x32x128xbf16>
    %20 = vector.extract_strided_slice %19 {offsets = [0, 0, 0], sizes = [16, 16, 128], strides = [1, 1, 1]} : vector<16x32x128xbf16> to vector<16x16x128xbf16>
    %21 = vector.extract_strided_slice %19 {offsets = [0, 1, 0], sizes = [16, 16, 128], strides = [1, 1, 1]} : vector<16x32x128xbf16> to vector<16x16x128xbf16>
    %22 = vector.extract_strided_slice %19 {offsets = [0, 2, 0], sizes = [16, 16, 128], strides = [1, 1, 1]} : vector<16x32x128xbf16> to vector<16x16x128xbf16>
    %23 = tpu.concatenate %20, %21, %22 in 2 : vector<16x16x128xbf16>, vector<16x16x128xbf16>, vector<16x16x128xbf16> -> vector<16x16x384xbf16>
    %24 = vector.shape_cast %23 : vector<16x16x384xbf16> to vector<256x384xbf16>
    %c0_18 = arith.constant 0 : index
    %c0_19 = arith.constant 0 : index
    %c0_20 = arith.constant 0 : index
    %25 = vector.load %arg4[%c0_18, %c0_19, %c0_20] : memref<3x384x128xbf16, #tpu.memory_space<vmem>>, vector<1x384x128xbf16>
    %26 = vector.shape_cast %25 : vector<1x384x128xbf16> to vector<384x128xbf16>
    %cst_21 = arith.constant dense<0.000000e+00> : vector<256x128xf32>
    %27 = tpu.matmul %24, %26, %cst_21 {dimension_numbers = #tpu.dot_dimension_numbers<[1], [0], [0], [1], [0, 0, 1, 1], [], []>} : vector<256x384xbf16>, vector<384x128xbf16>, vector<256x128xf32> -> vector<256x128xf32>
    %c1_22 = arith.constant 1 : index
    %c0_23 = arith.constant 0 : index
    %c0_24 = arith.constant 0 : index
    %28 = vector.load %arg7[%c1_22, %c0_23, %c0_24] : memref<18x32x128xbf16, #tpu.memory_space<vmem>>, vector<16x32x128xbf16>
    %29 = vector.extract_strided_slice %28 {offsets = [0, 0, 0], sizes = [16, 16, 128], strides = [1, 1, 1]} : vector<16x32x128xbf16> to vector<16x16x128xbf16>
    %30 = vector.extract_strided_slice %28 {offsets = [0, 1, 0], sizes = [16, 16, 128], strides = [1, 1, 1]} : vector<16x32x128xbf16> to vector<16x16x128xbf16>
    %31 = vector.extract_strided_slice %28 {offsets = [0, 2, 0], sizes = [16, 16, 128], strides = [1, 1, 1]} : vector<16x32x128xbf16> to vector<16x16x128xbf16>
    %32 = tpu.concatenate %29, %30, %31 in 2 : vector<16x16x128xbf16>, vector<16x16x128xbf16>, vector<16x16x128xbf16> -> vector<16x16x384xbf16>
    %33 = vector.shape_cast %32 : vector<16x16x384xbf16> to vector<256x384xbf16>
    %c1_25 = arith.constant 1 : index
    %c0_26 = arith.constant 0 : index
    %c0_27 = arith.constant 0 : index
    %34 = vector.load %arg4[%c1_25, %c0_26, %c0_27] : memref<3x384x128xbf16, #tpu.memory_space<vmem>>, vector<1x384x128xbf16>
    %35 = vector.shape_cast %34 : vector<1x384x128xbf16> to vector<384x128xbf16>
    %cst_28 = arith.constant dense<0.000000e+00> : vector<256x128xf32>
    %36 = tpu.matmul %33, %35, %cst_28 {dimension_numbers = #tpu.dot_dimension_numbers<[1], [0], [0], [1], [0, 0, 1, 1], [], []>} : vector<256x384xbf16>, vector<384x128xbf16>, vector<256x128xf32> -> vector<256x128xf32>
    %37 = arith.addf %27, %36 : vector<256x128xf32>
    %c2 = arith.constant 2 : index
    %c0_29 = arith.constant 0 : index
    %c0_30 = arith.constant 0 : index
    %38 = vector.load %arg7[%c2, %c0_29, %c0_30] : memref<18x32x128xbf16, #tpu.memory_space<vmem>>, vector<16x32x128xbf16>
    %39 = vector.extract_strided_slice %38 {offsets = [0, 0, 0], sizes = [16, 16, 128], strides = [1, 1, 1]} : vector<16x32x128xbf16> to vector<16x16x128xbf16>
    %40 = vector.extract_strided_slice %38 {offsets = [0, 1, 0], sizes = [16, 16, 128], strides = [1, 1, 1]} : vector<16x32x128xbf16> to vector<16x16x128xbf16>
    %41 = vector.extract_strided_slice %38 {offsets = [0, 2, 0], sizes = [16, 16, 128], strides = [1, 1, 1]} : vector<16x32x128xbf16> to vector<16x16x128xbf16>
    %42 = tpu.concatenate %39, %40, %41 in 2 : vector<16x16x128xbf16>, vector<16x16x128xbf16>, vector<16x16x128xbf16> -> vector<16x16x384xbf16>
    %43 = vector.shape_cast %42 : vector<16x16x384xbf16> to vector<256x384xbf16>
    %c2_31 = arith.constant 2 : index
    %c0_32 = arith.constant 0 : index
    %c0_33 = arith.constant 0 : index
    %44 = vector.load %arg4[%c2_31, %c0_32, %c0_33] : memref<3x384x128xbf16, #tpu.memory_space<vmem>>, vector<1x384x128xbf16>
    %45 = vector.shape_cast %44 : vector<1x384x128xbf16> to vector<384x128xbf16>
    %cst_34 = arith.constant dense<0.000000e+00> : vector<256x128xf32>
    %46 = tpu.matmul %43, %45, %cst_34 {dimension_numbers = #tpu.dot_dimension_numbers<[1], [0], [0], [1], [0, 0, 1, 1], [], []>} : vector<256x384xbf16>, vector<384x128xbf16>, vector<256x128xf32> -> vector<256x128xf32>
    %47 = arith.addf %37, %46 : vector<256x128xf32>
    %48 = arith.truncf %47 : vector<256x128xf32> to vector<256x128xbf16>
    %c0_35 = arith.constant 0 : index
    %c0_36 = arith.constant 0 : index
    %49 = vector.load %arg5[%c0_35, %c0_36] : memref<256x128xbf16, #tpu.memory_space<vmem>>, vector<256x128xbf16>
    tpu.vector_store %arg5[%c0_35, %c0_36], %48 {strides = array<i32>} : memref<256x128xbf16, #tpu.memory_space<vmem>>, vector<256x128xbf16>,
    %cst_37 = arith.constant dense<0.000000e+00> : vector<128xf32>
    %50 = vector.multi_reduction <add>, %47, %cst_37 [0] : vector<256x128xf32> to vector<128xf32>
    %51 = vector.shape_cast %50 : vector<128xf32> to vector<1x128xf32>
    %52 = arith.mulf %47, %47 : vector<256x128xf32>
    %cst_38 = arith.constant dense<0.000000e+00> : vector<128xf32>
    %53 = vector.multi_reduction <add>, %52, %cst_38 [0] : vector<256x128xf32> to vector<128xf32>
    %54 = vector.shape_cast %53 : vector<128xf32> to vector<1x128xf32>
    %55 = tpu.concatenate %51, %54 in 0 : vector<1x128xf32>, vector<1x128xf32> -> vector<2x128xf32>
    %56 = vector.shape_cast %55 : vector<2x128xf32> to vector<1x2x128xf32>
    %c0_39 = arith.constant 0 : index
    %c0_40 = arith.constant 0 : index
    %c0_41 = arith.constant 0 : index
    %57 = vector.load %arg6[%c0_39, %c0_40, %c0_41] : memref<1x2x128xf32, #tpu.memory_space<vmem>>, vector<1x2x128xf32>
    tpu.vector_store %arg6[%c0_39, %c0_40, %c0_41], %56 {strides = array<i32>} : memref<1x2x128xf32, #tpu.memory_space<vmem>>, vector<1x2x128xf32>,
    return
  }
  func.func @transform_0(%arg0: i32) -> (i32, i32) {
    %c0_i32 = arith.constant 0 : i32
    %c0_i32_0 = arith.constant 0 : i32
    return %arg0, %c0_i32 : i32, i32
  }
  func.func @transform_1(%arg0: i32) -> (i32, i32) {
    %c0_i32 = arith.constant 0 : i32
    %c0_i32_0 = arith.constant 0 : i32
    %c0_i32_1 = arith.constant 0 : i32
    return %c0_i32, %c0_i32_0 : i32, i32
  }
  func.func @transform_2(%arg0: i32) -> (i32, i32) {
    %c0_i32 = arith.constant 0 : i32
    %c0_i32_0 = arith.constant 0 : i32
    %c0_i32_1 = arith.constant 0 : i32
    return %c0_i32, %c0_i32_0 : i32, i32
  }
  func.func @transform_3(%arg0: i32) -> (i32, i32, i32) {
    %c0_i32 = arith.constant 0 : i32
    %c0_i32_0 = arith.constant 0 : i32
    %c0_i32_1 = arith.constant 0 : i32
    %c0_i32_2 = arith.constant 0 : i32
    return %c0_i32, %c0_i32_0, %c0_i32_1 : i32, i32, i32
  }
  func.func @transform_4(%arg0: i32) -> (i32, i32) {
    %c0_i32 = arith.constant 0 : i32
    %c0_i32_0 = arith.constant 0 : i32
    return %arg0, %c0_i32 : i32, i32
  }
  func.func @transform_5(%arg0: i32) -> (i32, i32, i32) {
    %c0_i32 = arith.constant 0 : i32
    %c0_i32_0 = arith.constant 0 : i32
    %c0_i32_1 = arith.constant 0 : i32
    return %arg0, %c0_i32, %c0_i32_0 : i32, i32, i32
  }
}

module attributes {stable_mosaic.version = 11 : i64} {
  func.func @_conv3_kernel(%arg0: i32, %arg1: memref<512x128xbf16, #tpu.memory_space<vmem>>, %arg2: memref<1x128xf32, #tpu.memory_space<vmem>>, %arg3: memref<1x128xf32, #tpu.memory_space<vmem>>, %arg4: memref<128x128xbf16, #tpu.memory_space<vmem>>, %arg5: memref<512x128xf32, #tpu.memory_space<vmem>>, %arg6: memref<1x2x128xf32, #tpu.memory_space<vmem>>) attributes {dimension_semantics = [#tpu.dimension_semantics<parallel>], iteration_bounds = array<i64: 1>, scalar_prefetch = 0 : i64, scratch_operands = 0 : i64, tpu.core_type = #tpu.core_type<tc>, window_params = [{transform_indices = @transform_0, window_bounds = array<i64: 512, 128>}, {pipeline_mode = #tpu.pipeline_mode<synchronous>, transform_indices = @transform_1, window_bounds = array<i64: 1, 128>}, {pipeline_mode = #tpu.pipeline_mode<synchronous>, transform_indices = @transform_2, window_bounds = array<i64: 1, 128>}, {pipeline_mode = #tpu.pipeline_mode<synchronous>, transform_indices = @transform_3, window_bounds = array<i64: 128, 128>}, {transform_indices = @transform_4, window_bounds = array<i64: 512, 128>}, {transform_indices = @transform_5, window_bounds = array<i64: 1, 2, 128>}]} {
    %c0 = arith.constant 0 : index
    %c0_0 = arith.constant 0 : index
    %0 = vector.load %arg1[%c0, %c0_0] : memref<512x128xbf16, #tpu.memory_space<vmem>>, vector<512x128xbf16>
    %1 = arith.extf %0 : vector<512x128xbf16> to vector<512x128xf32>
    %c0_1 = arith.constant 0 : index
    %c0_2 = arith.constant 0 : index
    %2 = vector.load %arg2[%c0_1, %c0_2] : memref<1x128xf32, #tpu.memory_space<vmem>>, vector<1x128xf32>
    %3 = vector.broadcast %2 : vector<1x128xf32> to vector<512x128xf32>
    %4 = arith.mulf %1, %3 : vector<512x128xf32>
    %c0_3 = arith.constant 0 : index
    %c0_4 = arith.constant 0 : index
    %5 = vector.load %arg3[%c0_3, %c0_4] : memref<1x128xf32, #tpu.memory_space<vmem>>, vector<1x128xf32>
    %6 = vector.broadcast %5 : vector<1x128xf32> to vector<512x128xf32>
    %7 = arith.addf %4, %6 : vector<512x128xf32>
    %cst = arith.constant 0.000000e+00 : f32
    %8 = vector.broadcast %cst : f32 to vector<512x128xf32>
    %9 = arith.maximumf %7, %8 : vector<512x128xf32>
    %10 = arith.truncf %9 : vector<512x128xf32> to vector<512x128xbf16>
    %c0_5 = arith.constant 0 : index
    %c0_6 = arith.constant 0 : index
    %11 = vector.load %arg4[%c0_5, %c0_6] : memref<128x128xbf16, #tpu.memory_space<vmem>>, vector<128x128xbf16>
    %cst_7 = arith.constant dense<0.000000e+00> : vector<512x128xf32>
    %12 = tpu.matmul %10, %11, %cst_7 {dimension_numbers = #tpu.dot_dimension_numbers<[1], [0], [0], [1], [0, 0, 1, 1], [], []>} : vector<512x128xbf16>, vector<128x128xbf16>, vector<512x128xf32> -> vector<512x128xf32>
    %c0_8 = arith.constant 0 : index
    %c0_9 = arith.constant 0 : index
    %13 = vector.load %arg5[%c0_8, %c0_9] : memref<512x128xf32, #tpu.memory_space<vmem>>, vector<512x128xf32>
    tpu.vector_store %arg5[%c0_8, %c0_9], %12 {strides = array<i32>} : memref<512x128xf32, #tpu.memory_space<vmem>>, vector<512x128xf32>,
    %cst_10 = arith.constant dense<0.000000e+00> : vector<128xf32>
    %14 = vector.multi_reduction <add>, %12, %cst_10 [0] : vector<512x128xf32> to vector<128xf32>
    %15 = vector.shape_cast %14 : vector<128xf32> to vector<1x128xf32>
    %16 = arith.mulf %12, %12 : vector<512x128xf32>
    %cst_11 = arith.constant dense<0.000000e+00> : vector<128xf32>
    %17 = vector.multi_reduction <add>, %16, %cst_11 [0] : vector<512x128xf32> to vector<128xf32>
    %18 = vector.shape_cast %17 : vector<128xf32> to vector<1x128xf32>
    %19 = tpu.concatenate %15, %18 in 0 : vector<1x128xf32>, vector<1x128xf32> -> vector<2x128xf32>
    %20 = vector.shape_cast %19 : vector<2x128xf32> to vector<1x2x128xf32>
    %c0_12 = arith.constant 0 : index
    %c0_13 = arith.constant 0 : index
    %c0_14 = arith.constant 0 : index
    %21 = vector.load %arg6[%c0_12, %c0_13, %c0_14] : memref<1x2x128xf32, #tpu.memory_space<vmem>>, vector<1x2x128xf32>
    tpu.vector_store %arg6[%c0_12, %c0_13, %c0_14], %20 {strides = array<i32>} : memref<1x2x128xf32, #tpu.memory_space<vmem>>, vector<1x2x128xf32>,
    return
  }
  func.func @transform_0(%arg0: i32) -> (i32, i32) {
    %c0_i32 = arith.constant 0 : i32
    %c0_i32_0 = arith.constant 0 : i32
    return %arg0, %c0_i32 : i32, i32
  }
  func.func @transform_1(%arg0: i32) -> (i32, i32) {
    %c0_i32 = arith.constant 0 : i32
    %c0_i32_0 = arith.constant 0 : i32
    %c0_i32_1 = arith.constant 0 : i32
    return %c0_i32, %c0_i32_0 : i32, i32
  }
  func.func @transform_2(%arg0: i32) -> (i32, i32) {
    %c0_i32 = arith.constant 0 : i32
    %c0_i32_0 = arith.constant 0 : i32
    %c0_i32_1 = arith.constant 0 : i32
    return %c0_i32, %c0_i32_0 : i32, i32
  }
  func.func @transform_3(%arg0: i32) -> (i32, i32) {
    %c0_i32 = arith.constant 0 : i32
    %c0_i32_0 = arith.constant 0 : i32
    %c0_i32_1 = arith.constant 0 : i32
    return %c0_i32, %c0_i32_0 : i32, i32
  }
  func.func @transform_4(%arg0: i32) -> (i32, i32) {
    %c0_i32 = arith.constant 0 : i32
    %c0_i32_0 = arith.constant 0 : i32
    return %arg0, %c0_i32 : i32, i32
  }
  func.func @transform_5(%arg0: i32) -> (i32, i32, i32) {
    %c0_i32 = arith.constant 0 : i32
    %c0_i32_0 = arith.constant 0 : i32
    %c0_i32_1 = arith.constant 0 : i32
    return %arg0, %c0_i32, %c0_i32_0 : i32, i32, i32
  }
}

module attributes {stable_mosaic.version = 11 : i64} {
  func.func @_bn3_add_relu_kernel(%arg0: i32, %arg1: memref<512x128xf32, #tpu.memory_space<vmem>>, %arg2: memref<1x128xf32, #tpu.memory_space<vmem>>, %arg3: memref<1x128xf32, #tpu.memory_space<vmem>>, %arg4: memref<512x128xf32, #tpu.memory_space<vmem>>, %arg5: memref<512x128xf32, #tpu.memory_space<vmem>>) attributes {dimension_semantics = [#tpu.dimension_semantics<parallel>], iteration_bounds = array<i64: 1>, scalar_prefetch = 0 : i64, scratch_operands = 0 : i64, tpu.core_type = #tpu.core_type<tc>, window_params = [{transform_indices = @transform_0, window_bounds = array<i64: 512, 128>}, {pipeline_mode = #tpu.pipeline_mode<synchronous>, transform_indices = @transform_1, window_bounds = array<i64: 1, 128>}, {pipeline_mode = #tpu.pipeline_mode<synchronous>, transform_indices = @transform_2, window_bounds = array<i64: 1, 128>}, {transform_indices = @transform_3, window_bounds = array<i64: 512, 128>}, {transform_indices = @transform_4, window_bounds = array<i64: 512, 128>}]} {
    %c0 = arith.constant 0 : index
    %c0_0 = arith.constant 0 : index
    %0 = vector.load %arg1[%c0, %c0_0] : memref<512x128xf32, #tpu.memory_space<vmem>>, vector<512x128xf32>
    %c0_1 = arith.constant 0 : index
    %c0_2 = arith.constant 0 : index
    %1 = vector.load %arg2[%c0_1, %c0_2] : memref<1x128xf32, #tpu.memory_space<vmem>>, vector<1x128xf32>
    %2 = vector.broadcast %1 : vector<1x128xf32> to vector<512x128xf32>
    %3 = arith.mulf %0, %2 : vector<512x128xf32>
    %c0_3 = arith.constant 0 : index
    %c0_4 = arith.constant 0 : index
    %4 = vector.load %arg3[%c0_3, %c0_4] : memref<1x128xf32, #tpu.memory_space<vmem>>, vector<1x128xf32>
    %5 = vector.broadcast %4 : vector<1x128xf32> to vector<512x128xf32>
    %6 = arith.addf %3, %5 : vector<512x128xf32>
    %c0_5 = arith.constant 0 : index
    %c0_6 = arith.constant 0 : index
    %7 = vector.load %arg4[%c0_5, %c0_6] : memref<512x128xf32, #tpu.memory_space<vmem>>, vector<512x128xf32>
    %8 = arith.addf %6, %7 : vector<512x128xf32>
    %cst = arith.constant 0.000000e+00 : f32
    %9 = vector.broadcast %cst : f32 to vector<512x128xf32>
    %10 = arith.maximumf %8, %9 : vector<512x128xf32>
    %c0_7 = arith.constant 0 : index
    %c0_8 = arith.constant 0 : index
    %11 = vector.load %arg5[%c0_7, %c0_8] : memref<512x128xf32, #tpu.memory_space<vmem>>, vector<512x128xf32>
    tpu.vector_store %arg5[%c0_7, %c0_8], %10 {strides = array<i32>} : memref<512x128xf32, #tpu.memory_space<vmem>>, vector<512x128xf32>,
    return
  }
  func.func @transform_0(%arg0: i32) -> (i32, i32) {
    %c0_i32 = arith.constant 0 : i32
    %c0_i32_0 = arith.constant 0 : i32
    return %arg0, %c0_i32 : i32, i32
  }
  func.func @transform_1(%arg0: i32) -> (i32, i32) {
    %c0_i32 = arith.constant 0 : i32
    %c0_i32_0 = arith.constant 0 : i32
    %c0_i32_1 = arith.constant 0 : i32
    return %c0_i32, %c0_i32_0 : i32, i32
  }
  func.func @transform_2(%arg0: i32) -> (i32, i32) {
    %c0_i32 = arith.constant 0 : i32
    %c0_i32_0 = arith.constant 0 : i32
    %c0_i32_1 = arith.constant 0 : i32
    return %c0_i32, %c0_i32_0 : i32, i32
  }
  func.func @transform_3(%arg0: i32) -> (i32, i32) {
    %c0_i32 = arith.constant 0 : i32
    %c0_i32_0 = arith.constant 0 : i32
    return %arg0, %c0_i32 : i32, i32
  }
  func.func @transform_4(%arg0: i32) -> (i32, i32) {
    %c0_i32 = arith.constant 0 : i32
    %c0_i32_0 = arith.constant 0 : i32
    return %arg0, %c0_i32 : i32, i32
  }
}

</mosaic_0001>

<bundles_post_ra>
// kernel: bottleneck_forward.4
= control target key start
LH: loop header
LB: loop body
LE: loop exit
PB: predicated region body
PF: predicated region fallthrough
CT: control target
= control target key end

     0   :  { %vm985_vm0 = vcmask 1040384   ;;  %s1994_s1 = inlined_call_operand.vmem [shape: bf16[128,128], index: 1, kind: input, shape index: {}]   ;;  %s1995_s0 = inlined_call_operand.vmem [shape: f32[512,128], index: 0, kind: input, shape index: {}]   ;;  %s1996_s2 = inlined_call_operand.vmem [shape: bf16[512,128], index: 2, kind: output, shape index: {0}]   ;;  %s1997_s3 = inlined_call_operand.vmem [shape: f32[1,2,128], index: 3, kind: output, shape index: {1}]  }
   0x1   :  { %v1459_v0 = vld [vmem:[%s1994_s1 + $0x38] sm:$0xff]   ;;  %v1460_v1 = vld [vmem:[%s1994_s1 + $0x30] sm:$0xff]   ;;  %v1461_v2 = vld [vmem:[%s1994_s1 + $0x28] sm:$0xff]  }
   0x2   :  { %1363 = vmatprep.subr.bf16.mxu0 %v1459_v0  ;;  %1443 = vmatprep.subr.bf16.mxu1 %v1459_v0  ;;  %v1462_v3 = vld [vmem:[%s1994_s1 + $0x20] sm:$0xff]   ;;  %v15_v5 = vld [vmem:[%s1995_s0 + $0x8] sm:$0xff]  ;;  %v1463_v7 = vld [vmem:[%s1994_s1 + $0x18] sm:$0xff]  }
   0x3   :  { %1364 = vmatpush3.bf16.msra.mxu0 %v1459_v0  ;;  %1451 = vmatpush3.bf16.msra.mxu1 %v1459_v0  ;;  %v14_v4 = vld [vmem:[%s1995_s0] sm:$0xff]  ;;  %v1464_v8 = vld [vmem:[%s1994_s1 + $0x10] sm:$0xff]   ;;  %v47_v10 = vld [vmem:[%s1995_s0 + $0x108] sm:$0xff] }
   0x4   :  { %1365 = vmatprep.subr.bf16.mxu0 %v1460_v1  ;;  %1444 = vmatprep.subr.bf16.mxu1 %v1460_v1  ;;  %v78_v6 = vpack.c.bf16 %v15_v5, %v14_v4  ;;  %v46_v9 = vld [vmem:[%s1995_s0 + $0x100] sm:$0xff]  ;;  %v1465_v11 = vld [vmem:[%s1994_s1 + $0x8] sm:$0xff]   ;;  %v16_v14 = vld [vmem:[%s1995_s0 + $0x10] sm:$0xff] }
   0x5   :  { %v94_v12 = vpack.c.bf16 %v47_v10, %v46_v9  ;;  %v1466_v13 = vld [vmem:[%s1994_s1] sm:$0xff]   ;;  %v17_v15 = vld [vmem:[%s1995_s0 + $0x18] sm:$0xff]  ;;  %v19_v17 = vld [vmem:[%s1995_s0 + $0x28] sm:$0xff] }
   0x6   :  { %1379 = vmatprep.mubr.bf16.mxu0 %v78_v6  ;;  %v18_v16 = vld [vmem:[%s1995_s0 + $0x20] sm:$0xff]  ;;  %v48_v18 = vld [vmem:[%s1995_s0 + $0x110] sm:$0xff]  ;;  %v49_v19 = vld [vmem:[%s1995_s0 + $0x118] sm:$0xff]  ;;  %v79_v22 = vpack.c.bf16 %v17_v15, %v16_v14 }
   0x7   :  { %1366 = vmatpush3.bf16.msra.mxu0 %v1460_v1  ;;  %1452 = vmatpush3.bf16.msra.mxu1 %v1460_v1  ;;  %v50_v20 = vld [vmem:[%s1995_s0 + $0x120] sm:$0xff]  ;;  %v51_v21 = vld [vmem:[%s1995_s0 + $0x128] sm:$0xff]  ;;  %v80_v23 = vpack.c.bf16 %v19_v17, %v18_v16  ;;  %v95_v24 = vpack.c.bf16 %v49_v19, %v48_v18  ;;  %v20_v26 = vld [vmem:[%s1995_s0 + $0x30] sm:$0xff] }
   0x8   :  { %1367 = vmatprep.subr.bf16.mxu0 %v1461_v2  ;;  %1445 = vmatprep.subr.bf16.mxu1 %v1461_v2  ;;  %v96_v25 = vpack.c.bf16 %v51_v21, %v50_v20  ;;  %v21_v27 = vld [vmem:[%s1995_s0 + $0x38] sm:$0xff]  ;;  %v22_v28 = vld [vmem:[%s1995_s0 + $0x40] sm:$0xff]  ;;  %v23_v29 = vld [vmem:[%s1995_s0 + $0x48] sm:$0xff] }
   0x9   :  { %1411 = vmatprep.mubr.bf16.mxu1 %v94_v12  ;;  %v52_v30 = vld [vmem:[%s1995_s0 + $0x130] sm:$0xff]  ;;  %v53_v31 = vld [vmem:[%s1995_s0 + $0x138] sm:$0xff]  ;;  %v54_v32 = vld [vmem:[%s1995_s0 + $0x140] sm:$0xff]  ;;  %v81_v34 = vpack.c.bf16 %v21_v27, %v20_v26  ;;  %v82_v35 = vpack.c.bf16 %v23_v29, %v22_v28 }
   0xa   :  { %v55_v33 = vld [vmem:[%s1995_s0 + $0x148] sm:$0xff]  ;;  %v97_v36 = vpack.c.bf16 %v53_v31, %v52_v30  ;;  %v24_v38 = vld [vmem:[%s1995_s0 + $0x50] sm:$0xff]  ;;  %v25_v39 = vld [vmem:[%s1995_s0 + $0x58] sm:$0xff] }
   0xb   :  { %1368 = vmatpush3.bf16.msra.mxu0 %v1461_v2  ;;  %1453 = vmatpush3.bf16.msra.mxu1 %v1461_v2  ;;  %v98_v37 = vpack.c.bf16 %v55_v33, %v54_v32  ;;  %v26_v40 = vld [vmem:[%s1995_s0 + $0x60] sm:$0xff]  ;;  %v27_v41 = vld [vmem:[%s1995_s0 + $0x68] sm:$0xff]  ;;  %v56_v42 = vld [vmem:[%s1995_s0 + $0x150] sm:$0xff]  ;;  %v83_v46 = vpack.c.bf16 %v25_v39, %v24_v38 }
   0xc   :  { %1369 = vmatprep.subr.bf16.mxu0 %v1462_v3  ;;  %1446 = vmatprep.subr.bf16.mxu1 %v1462_v3  ;;  %v57_v43 = vld [vmem:[%s1995_s0 + $0x158] sm:$0xff]  ;;  %v58_v44 = vld [vmem:[%s1995_s0 + $0x160] sm:$0xff]  ;;  %v59_v45 = vld [vmem:[%s1995_s0 + $0x168] sm:$0xff]  ;;  %v84_v47 = vpack.c.bf16 %v27_v41, %v26_v40 }
   0xd   :  { %v99_v48 = vpack.c.bf16 %v57_v43, %v56_v42  ;;  %v100_v49 = vpack.c.bf16 %v59_v45, %v58_v44  ;;  %v28_v50 = vld [vmem:[%s1995_s0 + $0x70] sm:$0xff]  ;;  %v29_v51 = vld [vmem:[%s1995_s0 + $0x78] sm:$0xff]  ;;  %v30_v52 = vld [vmem:[%s1995_s0 + $0x80] sm:$0xff] }
   0xe   :  { %v31_v53 = vld [vmem:[%s1995_s0 + $0x88] sm:$0xff]  ;;  %v60_v54 = vld [vmem:[%s1995_s0 + $0x170] sm:$0xff]  ;;  %v61_v55 = vld [vmem:[%s1995_s0 + $0x178] sm:$0xff]  ;;  %v85_v58 = vpack.c.bf16 %v29_v51, %v28_v50 }
   0xf   :  { %1370 = vmatpush3.bf16.msra.mxu0 %v1462_v3  ;;  %1454 = vmatpush3.bf16.msra.mxu1 %v1462_v3  ;;  %v62_v56 = vld [vmem:[%s1995_s0 + $0x180] sm:$0xff]  ;;  %v63_v57 = vld [vmem:[%s1995_s0 + $0x188] sm:$0xff]  ;;  %v86_v59 = vpack.c.bf16 %v31_v53, %v30_v52  ;;  %v101_v60 = vpack.c.bf16 %v61_v55, %v60_v54  ;;  %v32_v62 = vld [vmem:[%s1995_s0 + $0x90] sm:$0xff] }
  0x10   :  { %1371 = vmatprep.subr.bf16.mxu0 %v1463_v7  ;;  %1447 = vmatprep.subr.bf16.mxu1 %v1463_v7  ;;  %v102_v61 = vpack.c.bf16 %v63_v57, %v62_v56  ;;  %v33_v63 = vld [vmem:[%s1995_s0 + $0x98] sm:$0xff]  ;;  %v34_v0 = vld [vmem:[%s1995_s0 + $0xa0] sm:$0xff]  ;;  %v35_v1 = vld [vmem:[%s1995_s0 + $0xa8] sm:$0xff] }
  0x11   :  { %v64_v2 = vld [vmem:[%s1995_s0 + $0x190] sm:$0xff]  ;;  %v65_v3 = vld [vmem:[%s1995_s0 + $0x198] sm:$0xff]  ;;  %v66_v4 = vld [vmem:[%s1995_s0 + $0x1a0] sm:$0xff]  ;;  %v87_v6 = vpack.c.bf16 %v33_v63, %v32_v62 }
  0x12   :  { %v67_v5 = vld [vmem:[%s1995_s0 + $0x1a8] sm:$0xff]  ;;  %v36_v10 = vld [vmem:[%s1995_s0 + $0xb0] sm:$0xff]  ;;  %v38_v12 = vld [vmem:[%s1995_s0 + $0xc0] sm:$0xff] }
  0x13   :  { %1372 = vmatpush3.bf16.msra.mxu0 %v1463_v7  ;;  %1455 = vmatpush3.bf16.msra.mxu1 %v1463_v7  ;;  %v88_v7 = vpack.c.bf16 %v35_v1, %v34_v0  ;;  %v104_v9 = vpack.c.bf16 %v67_v5, %v66_v4  ;;  %v68_v14 = vld [vmem:[%s1995_s0 + $0x1b0] sm:$0xff]  ;;  %v69_v15 = vld [vmem:[%s1995_s0 + $0x1b8] sm:$0xff]  ;;  %v70_v16 = vld [vmem:[%s1995_s0 + $0x1c0] sm:$0xff] }
  0x14   :  { %1373 = vmatprep.subr.bf16.mxu0 %v1464_v8  ;;  %1448 = vmatprep.subr.bf16.mxu1 %v1464_v8  ;;  %v71_v17 = vld [vmem:[%s1995_s0 + $0x1c8] sm:$0xff]  ;;  %v105_v20 = vpack.c.bf16 %v69_v15, %v68_v14  ;;  %v72_v26 = vld [vmem:[%s1995_s0 + $0x1d0] sm:$0xff]  ;;  %v73_v27 = vld [vmem:[%s1995_s0 + $0x1d8] sm:$0xff] }
  0x15   :  { %v106_v21 = vpack.c.bf16 %v71_v17, %v70_v16  ;;  %v74_v28 = vld [vmem:[%s1995_s0 + $0x1e0] sm:$0xff]  ;;  %v75_v29 = vld [vmem:[%s1995_s0 + $0x1e8] sm:$0xff]  ;;  %v107_v32 = vpack.c.bf16 %v73_v27, %v72_v26 }
  0x16   :  { %v108_v33 = vpack.c.bf16 %v75_v29, %v74_v28 }
  0x17   :  { %1374 = vmatpush3.bf16.msra.mxu0 %v1464_v8  ;;  %1456 = vmatpush3.bf16.msra.mxu1 %v1464_v8  ;;  %v103_v8 = vpack.c.bf16 %v65_v3, %v64_v2 }
  0x18   :  { %1375 = vmatprep.subr.bf16.mxu0 %v1465_v11  ;;  %1449 = vmatprep.subr.bf16.mxu1 %v1465_v11 }
  0x1b   :  { %1376 = vmatpush3.bf16.msra.mxu0 %v1465_v11  ;;  %1457 = vmatpush3.bf16.msra.mxu1 %v1465_v11  ;;  %v37_v11 = vld [vmem:[%s1995_s0 + $0xb8] sm:$0xff] }
  0x1c   :  { %1377 = vmatprep.subr.bf16.mxu0 %v1466_v13  ;;  %1450 = vmatprep.subr.bf16.mxu1 %v1466_v13  ;;  %v89_v18 = vpack.c.bf16 %v37_v11, %v36_v10 }
  0x1f   :  { %1378 = vmatpush3.bf16.msra.mxu0 %v1466_v13  ;;  %1458 = vmatpush3.bf16.msra.mxu1 %v1466_v13  ;;  %v39_v13 = vld [vmem:[%s1995_s0 + $0xc8] sm:$0xff] }
  0x20   :  { %v90_v19 = vpack.c.bf16 %v39_v13, %v38_v12 }
  0x22   :  { %1380 = vmatmul.mubr.bf16.vlgmr.msra.gmra.mxu0 %v79_v22  ;;  %1412 = vmatmul.mubr.bf16.vlgmr.msra.gmra.mxu1 %v95_v24  ;;  %v40_v22 = vld [vmem:[%s1995_s0 + $0xd0] sm:$0xff]  ;;  %v42_v24 = vld [vmem:[%s1995_s0 + $0xe0] sm:$0xff] }
  0x23   :  { %1383 = vmatprep.mubr.bf16.mxu0 %v80_v23  ;;  %1415 = vmatprep.mubr.bf16.mxu1 %v96_v25  ;;  %v41_v23 = vld [vmem:[%s1995_s0 + $0xd8] sm:$0xff]  ;;  %v43_v25 = vld [vmem:[%s1995_s0 + $0xe8] sm:$0xff] }
  0x24   :  { %v91_v30 = vpack.c.bf16 %v41_v23, %v40_v22  ;;  %v92_v31 = vpack.c.bf16 %v43_v25, %v42_v24 }
  0x2a   :  { %1384 = vmatmul.mubr.bf16.gmra.mxu0 %v81_v34  ;;  %1416 = vmatmul.mubr.bf16.gmra.mxu1 %v97_v36  ;;  %v44_v34 = vld [vmem:[%s1995_s0 + $0xf0] sm:$0xff] }
  0x2b   :  { %1387 = vmatprep.mubr.bf16.mxu0 %v82_v35  ;;  %1419 = vmatprep.mubr.bf16.mxu1 %v98_v37  ;;  %v45_v35 = vld [vmem:[%s1995_s0 + $0xf8] sm:$0xff]  ;;  %v76_v36 = vld [vmem:[%s1995_s0 + $0x1f0] sm:$0xff] }
  0x2c   :  { %v77_v37 = vld [vmem:[%s1995_s0 + $0x1f8] sm:$0xff]  ;;  %v93_v38 = vpack.c.bf16 %v45_v35, %v44_v34 }
  0x2d   :  { %v109_v39 = vpack.c.bf16 %v77_v37, %v76_v36 }
  0x32   :  { %1388 = vmatmul.mubr.bf16.gmra.mxu0 %v83_v46  ;;  %1420 = vmatmul.mubr.bf16.gmra.mxu1 %v99_v48 }
  0x33   :  { %1391 = vmatprep.mubr.bf16.mxu0 %v84_v47  ;;  %1423 = vmatprep.mubr.bf16.mxu1 %v100_v49 }
  0x3a   :  { %1392 = vmatmul.mubr.bf16.gmra.mxu0 %v85_v58  ;;  %1424 = vmatmul.mubr.bf16.gmra.mxu1 %v101_v60 }
  0x3b   :  { %1395 = vmatprep.mubr.bf16.mxu0 %v86_v59  ;;  %1427 = vmatprep.mubr.bf16.mxu1 %v102_v61 }
  0x42   :  { %1396 = vmatmul.mubr.bf16.gmra.mxu0 %v87_v6  ;;  %1428 = vmatmul.mubr.bf16.gmra.mxu1 %v103_v8 }
  0x43   :  { %1399 = vmatprep.mubr.bf16.mxu0 %v88_v7  ;;  %1431 = vmatprep.mubr.bf16.mxu1 %v104_v9 }
  0x4a   :  { %1400 = vmatmul.mubr.bf16.gmra.mxu0 %v89_v18  ;;  %1432 = vmatmul.mubr.bf16.gmra.mxu1 %v105_v20 }
  0x4b   :  { %1403 = vmatprep.mubr.bf16.mxu0 %v90_v19  ;;  %1435 = vmatprep.mubr.bf16.mxu1 %v106_v21 }
  0x52   :  { %1404 = vmatmul.mubr.bf16.gmra.mxu0 %v91_v30  ;;  %1436 = vmatmul.mubr.bf16.gmra.mxu1 %v107_v32 }
  0x53   :  { %1407 = vmatprep.mubr.bf16.mxu0 %v92_v31  ;;  %1439 = vmatprep.mubr.bf16.mxu1 %v108_v33 }
  0x5a   :  { %1408 = vmatmul.mubr.bf16.gmra.mxu0 %v93_v38  ;;  %1440 = vmatmul.mubr.bf16.gmra.mxu1 %v109_v39 }
  0xe2   :  { %v1381_v40 = vpop.f32.mrf.mxu0  ;;  %v1703_v41 = vpop.f32.mrf.mxu1 }
  0xe3   :  { %v854_v56 = vmul.f32 %v1381_v40, %v1381_v40 }
  0xe4   :  { %v208_v42 = vpop.f32.mrf.mxu0  ;;  %v1705_v43 = vpop.f32.mrf.mxu1 }
  0xe5   :  { %v852_v49 = vmul.f32 %v208_v42, %v208_v42 }
  0xe6   :  { %v1382_v44 = vpop.f32.mrf.mxu0  ;;  %v1707_v46 = vpop.f32.mrf.mxu1 }
  0xe7   :  { %v1140_v45 = vpack.c.bf16 %v1382_v44, %v1381_v40  ;;  %v1220_v48 = vpack.c.bf16 %v1707_v46, %v1703_v41  ;;  %v855_v61 = vmul.f32 %v1382_v44, %v1382_v44 }
  0xe8   :  { %v211_v47 = vpop.f32.mrf.mxu0  ;;  %v1714_v53 = vpop.f32.mrf.mxu1 }
  0xe9   :  { %1292 = vst [vmem:[%s1996_s2 + $0x8] sm:$0xff] %v1140_v45   ;;  %v1135_v50 = vpack.c.bf16 %v211_v47, %v208_v42  ;;  %v783_v51 = vadd.f32 %v211_v47, %v208_v42  ;;  %v853_v52 = vmul.f32 %v211_v47, %v211_v47  ;;  %1308 = vst [vmem:[%s1996_s2 + $0x88] sm:$0xff] %v1220_v48  }
  0xea   :  { %v1385_v54 = vpop.f32.mrf.mxu0  ;;  %v1215_v55 = vpack.c.bf16 %v1714_v53, %v1705_v43  ;;  %v1724_v59 = vpop.f32.mrf.mxu1 }
  0xeb   :  { %1136 = vst [vmem:[%s1996_s2] sm:$0xff] %v1135_v50   ;;  %v784_v57 = vadd.f32 %v1381_v40, %v783_v51  ;;  %v916_v58 = vadd.f32 %v853_v52, %v852_v49  ;;  %v858_v16 = vmul.f32 %v1385_v54, %v1385_v54 }
  0xec   :  { %v224_v60 = vpop.f32.mrf.mxu0  ;;  %1307 = vst [vmem:[%s1996_s2 + $0x80] sm:$0xff] %v1215_v55   ;;  %v1729_v0 = vpop.f32.mrf.mxu1 }
  0xed   :  { %v917_v62 = vadd.f32 %v916_v58, %v854_v56  ;;  %v785_v63 = vadd.f32 %v1382_v44, %v784_v57  ;;  %v856_v3 = vmul.f32 %v224_v60, %v224_v60 }
  0xee   :  { %v1386_v1 = vpop.f32.mrf.mxu0  ;;  %v1731_v6 = vpop.f32.mrf.mxu1 }
  0xef   :  { %v786_v2 = vadd.f32 %v785_v63, %v224_v60  ;;  %v918_v4 = vadd.f32 %v917_v62, %v855_v61  ;;  %v1150_v5 = vpack.c.bf16 %v1386_v1, %v1385_v54  ;;  %v1230_v8 = vpack.c.bf16 %v1731_v6, %v1724_v59 }
  0xf0   :  { %v227_v7 = vpop.f32.mrf.mxu0  ;;  %v1738_v13 = vpop.f32.mrf.mxu1  ;;  %v859_v21 = vmul.f32 %v1386_v1, %v1386_v1 }
  0xf1   :  { %v919_v9 = vadd.f32 %v918_v4, %v856_v3  ;;  %1294 = vst [vmem:[%s1996_s2 + $0x18] sm:$0xff] %v1150_v5   ;;  %v1145_v10 = vpack.c.bf16 %v227_v7, %v224_v60  ;;  %v787_v11 = vadd.f32 %v786_v2, %v227_v7  ;;  %v857_v12 = vmul.f32 %v227_v7, %v227_v7 }
  0xf2   :  { %v1389_v14 = vpop.f32.mrf.mxu0  ;;  %1310 = vst [vmem:[%s1996_s2 + $0x98] sm:$0xff] %v1230_v8   ;;  %v1225_v15 = vpack.c.bf16 %v1738_v13, %v1729_v0  ;;  %v1748_v19 = vpop.f32.mrf.mxu1 }
  0xf3   :  { %1293 = vst [vmem:[%s1996_s2 + $0x10] sm:$0xff] %v1145_v10   ;;  %v788_v17 = vadd.f32 %v1385_v54, %v787_v11  ;;  %v920_v18 = vadd.f32 %v919_v9, %v857_v12  ;;  %v862_v40 = vmul.f32 %v1389_v14, %v1389_v14 }
  0xf4   :  { %v240_v20 = vpop.f32.mrf.mxu0  ;;  %1309 = vst [vmem:[%s1996_s2 + $0x90] sm:$0xff] %v1225_v15   ;;  %v1753_v24 = vpop.f32.mrf.mxu1 }
  0xf5   :  { %v921_v22 = vadd.f32 %v920_v18, %v858_v16  ;;  %v789_v23 = vadd.f32 %v1386_v1, %v788_v17  ;;  %v860_v27 = vmul.f32 %v240_v20, %v240_v20 }
  0xf6   :  { %v1390_v25 = vpop.f32.mrf.mxu0  ;;  %v1755_v30 = vpop.f32.mrf.mxu1 }
  0xf7   :  { %v790_v26 = vadd.f32 %v789_v23, %v240_v20  ;;  %v922_v28 = vadd.f32 %v921_v22, %v859_v21  ;;  %v1160_v29 = vpack.c.bf16 %v1390_v25, %v1389_v14  ;;  %v1240_v32 = vpack.c.bf16 %v1755_v30, %v1748_v19 }
  0xf8   :  { %v243_v31 = vpop.f32.mrf.mxu0  ;;  %v1762_v37 = vpop.f32.mrf.mxu1  ;;  %v863_v48 = vmul.f32 %v1390_v25, %v1390_v25 }
  0xf9   :  { %v923_v33 = vadd.f32 %v922_v28, %v860_v27  ;;  %1296 = vst [vmem:[%s1996_s2 + $0x28] sm:$0xff] %v1160_v29   ;;  %v1155_v34 = vpack.c.bf16 %v243_v31, %v240_v20  ;;  %v791_v35 = vadd.f32 %v790_v26, %v243_v31  ;;  %v861_v36 = vmul.f32 %v243_v31, %v243_v31 }
  0xfa   :  { %v1393_v38 = vpop.f32.mrf.mxu0  ;;  %1312 = vst [vmem:[%s1996_s2 + $0xa8] sm:$0xff] %v1240_v32   ;;  %v1235_v39 = vpack.c.bf16 %v1762_v37, %v1753_v24  ;;  %v1772_v45 = vpop.f32.mrf.mxu1 }
  0xfb   :  { %1295 = vst [vmem:[%s1996_s2 + $0x20] sm:$0xff] %v1155_v34   ;;  %v792_v42 = vadd.f32 %v1389_v14, %v791_v35  ;;  %v924_v44 = vadd.f32 %v923_v33, %v861_v36  ;;  %v866_v7 = vmul.f32 %v1393_v38, %v1393_v38 }
  0xfc   :  { %v256_v47 = vpop.f32.mrf.mxu0  ;;  %1311 = vst [vmem:[%s1996_s2 + $0xa0] sm:$0xff] %v1235_v39   ;;  %v1777_v51 = vpop.f32.mrf.mxu1 }
  0xfd   :  { %v925_v49 = vadd.f32 %v924_v44, %v862_v40  ;;  %v793_v50 = vadd.f32 %v1390_v25, %v792_v42  ;;  %v864_v55 = vmul.f32 %v256_v47, %v256_v47 }
  0xfe   :  { %v1394_v52 = vpop.f32.mrf.mxu0  ;;  %v1779_v58 = vpop.f32.mrf.mxu1 }
  0xff   :  { %v794_v54 = vadd.f32 %v793_v50, %v256_v47  ;;  %v926_v56 = vadd.f32 %v925_v49, %v863_v48  ;;  %v1170_v57 = vpack.c.bf16 %v1394_v52, %v1393_v38  ;;  %v1250_v61 = vpack.c.bf16 %v1779_v58, %v1772_v45 }
 0x100   :  { %v259_v60 = vpop.f32.mrf.mxu0  ;;  %v1786_v3 = vpop.f32.mrf.mxu1  ;;  %v867_v12 = vmul.f32 %v1394_v52, %v1394_v52 }
 0x101   :  { %v927_v62 = vadd.f32 %v926_v56, %v864_v55  ;;  %1298 = vst [vmem:[%s1996_s2 + $0x38] sm:$0xff] %v1170_v57   ;;  %v1165_v63 = vpack.c.bf16 %v259_v60, %v256_v47  ;;  %v795_v1 = vadd.f32 %v794_v54, %v259_v60  ;;  %v865_v2 = vmul.f32 %v259_v60, %v259_v60 }
 0x102   :  { %v1397_v4 = vpop.f32.mrf.mxu0  ;;  %1314 = vst [vmem:[%s1996_s2 + $0xb8] sm:$0xff] %v1250_v61   ;;  %v1245_v5 = vpack.c.bf16 %v1786_v3, %v1777_v51  ;;  %v1796_v10 = vpop.f32.mrf.mxu1 }
 0x103   :  { %1297 = vst [vmem:[%s1996_s2 + $0x30] sm:$0xff] %v1165_v63   ;;  %v796_v8 = vadd.f32 %v1393_v38, %v795_v1  ;;  %v928_v9 = vadd.f32 %v927_v62, %v865_v2  ;;  %v870_v35 = vmul.f32 %v1397_v4, %v1397_v4 }
 0x104   :  { %v272_v11 = vpop.f32.mrf.mxu0  ;;  %1313 = vst [vmem:[%s1996_s2 + $0xb0] sm:$0xff] %v1245_v5   ;;  %v1801_v16 = vpop.f32.mrf.mxu1 }
 0x105   :  { %v929_v14 = vadd.f32 %v928_v9, %v866_v7  ;;  %v797_v15 = vadd.f32 %v1394_v52, %v796_v8  ;;  %v868_v20 = vmul.f32 %v272_v11, %v272_v11 }
 0x106   :  { %v1398_v17 = vpop.f32.mrf.mxu0  ;;  %v1803_v23 = vpop.f32.mrf.mxu1 }
 0x107   :  { %v798_v18 = vadd.f32 %v797_v15, %v272_v11  ;;  %v930_v21 = vadd.f32 %v929_v14, %v867_v12  ;;  %v1180_v22 = vpack.c.bf16 %v1398_v17, %v1397_v4  ;;  %v1260_v26 = vpack.c.bf16 %v1803_v23, %v1796_v10 }
 0x108   :  { %v275_v25 = vpop.f32.mrf.mxu0  ;;  %v1810_v32 = vpop.f32.mrf.mxu1  ;;  %v871_v42 = vmul.f32 %v1398_v17, %v1398_v17 }
 0x109   :  { %v931_v27 = vadd.f32 %v930_v21, %v868_v20  ;;  %1300 = vst [vmem:[%s1996_s2 + $0x48] sm:$0xff] %v1180_v22   ;;  %v1175_v28 = vpack.c.bf16 %v275_v25, %v272_v11  ;;  %v799_v29 = vadd.f32 %v798_v18, %v275_v25  ;;  %v869_v31 = vmul.f32 %v275_v25, %v275_v25 }
 0x10a   :  { %v1401_v33 = vpop.f32.mrf.mxu0  ;;  %1316 = vst [vmem:[%s1996_s2 + $0xc8] sm:$0xff] %v1260_v26   ;;  %v1255_v34 = vpack.c.bf16 %v1810_v32, %v1801_v16  ;;  %v1820_v39 = vpop.f32.mrf.mxu1 }
 0x10b   :  { %1299 = vst [vmem:[%s1996_s2 + $0x40] sm:$0xff] %v1175_v28   ;;  %v800_v36 = vadd.f32 %v1397_v4, %v799_v29  ;;  %v932_v38 = vadd.f32 %v931_v27, %v869_v31  ;;  %v874_v7 = vmul.f32 %v1401_v33, %v1401_v33 }
 0x10c   :  { %v288_v40 = vpop.f32.mrf.mxu0  ;;  %1315 = vst [vmem:[%s1996_s2 + $0xc0] sm:$0xff] %v1255_v34   ;;  %v1825_v48 = vpop.f32.mrf.mxu1 }
 0x10d   :  { %v933_v44 = vadd.f32 %v932_v38, %v870_v35  ;;  %v801_v47 = vadd.f32 %v1398_v17, %v800_v36  ;;  %v872_v52 = vmul.f32 %v288_v40, %v288_v40 }
 0x10e   :  { %v1402_v49 = vpop.f32.mrf.mxu0  ;;  %v1827_v56 = vpop.f32.mrf.mxu1 }
 0x10f   :  { %v802_v50 = vadd.f32 %v801_v47, %v288_v40  ;;  %v934_v54 = vadd.f32 %v933_v44, %v871_v42  ;;  %v1190_v55 = vpack.c.bf16 %v1402_v49, %v1401_v33  ;;  %v1270_v60 = vpack.c.bf16 %v1827_v56, %v1820_v39 }
 0x110   :  { %v291_v57 = vpop.f32.mrf.mxu0  ;;  %v1834_v2 = vpop.f32.mrf.mxu1  ;;  %v875_v14 = vmul.f32 %v1402_v49, %v1402_v49 }
 0x111   :  { %v935_v61 = vadd.f32 %v934_v54, %v872_v52  ;;  %1302 = vst [vmem:[%s1996_s2 + $0x58] sm:$0xff] %v1190_v55   ;;  %v1185_v62 = vpack.c.bf16 %v291_v57, %v288_v40  ;;  %v803_v63 = vadd.f32 %v802_v50, %v291_v57  ;;  %v873_v1 = vmul.f32 %v291_v57, %v291_v57 }
 0x112   :  { %v1405_v4 = vpop.f32.mrf.mxu0  ;;  %1318 = vst [vmem:[%s1996_s2 + $0xd8] sm:$0xff] %v1270_v60   ;;  %v1265_v5 = vpack.c.bf16 %v1834_v2, %v1825_v48  ;;  %v1844_v11 = vpop.f32.mrf.mxu1 }
 0x113   :  { %1301 = vst [vmem:[%s1996_s2 + $0x50] sm:$0xff] %v1185_v62   ;;  %v804_v8 = vadd.f32 %v1401_v33, %v803_v63  ;;  %v936_v9 = vadd.f32 %v935_v61, %v873_v1  ;;  %v878_v42 = vmul.f32 %v1405_v4, %v1405_v4 }
 0x114   :  { %v304_v12 = vpop.f32.mrf.mxu0  ;;  %1317 = vst [vmem:[%s1996_s2 + $0xd0] sm:$0xff] %v1265_v5   ;;  %v1849_v18 = vpop.f32.mrf.mxu1 }
 0x115   :  { %v937_v15 = vadd.f32 %v936_v9, %v874_v7  ;;  %v805_v17 = vadd.f32 %v1402_v49, %v804_v8  ;;  %v876_v22 = vmul.f32 %v304_v12, %v304_v12 }
 0x116   :  { %v1406_v20 = vpop.f32.mrf.mxu0  ;;  %v1851_v27 = vpop.f32.mrf.mxu1 }
 0x117   :  { %v806_v21 = vadd.f32 %v805_v17, %v304_v12  ;;  %v938_v25 = vadd.f32 %v937_v15, %v875_v14  ;;  %v1200_v26 = vpack.c.bf16 %v1406_v20, %v1405_v4  ;;  %v1280_v29 = vpack.c.bf16 %v1851_v27, %v1844_v11 }
 0x118   :  { %v307_v28 = vpop.f32.mrf.mxu0  ;;  %v1858_v36 = vpop.f32.mrf.mxu1  ;;  %v879_v52 = vmul.f32 %v1406_v20, %v1406_v20 }
 0x119   :  { %v939_v31 = vadd.f32 %v938_v25, %v876_v22  ;;  %1304 = vst [vmem:[%s1996_s2 + $0x68] sm:$0xff] %v1200_v26   ;;  %v1195_v33 = vpack.c.bf16 %v307_v28, %v304_v12  ;;  %v807_v34 = vadd.f32 %v806_v21, %v307_v28  ;;  %v877_v35 = vmul.f32 %v307_v28, %v307_v28 }
 0x11a   :  { %v1409_v38 = vpop.f32.mrf.mxu0  ;;  %1320 = vst [vmem:[%s1996_s2 + $0xe8] sm:$0xff] %v1280_v29   ;;  %v1275_v40 = vpack.c.bf16 %v1858_v36, %v1849_v18  ;;  %v1868_v49 = vpop.f32.mrf.mxu1  ;;  %v884_v29 = vmul.f32 %v1705_v43, %v1705_v43 }
 0x11b   :  { %1303 = vst [vmem:[%s1996_s2 + $0x60] sm:$0xff] %v1195_v33   ;;  %v808_v44 = vadd.f32 %v1405_v4, %v807_v34  ;;  %v940_v47 = vadd.f32 %v939_v31, %v877_v35  ;;  %v885_v35 = vmul.f32 %v1714_v53, %v1714_v53 }
 0x11c   :  { %v320_v50 = vpop.f32.mrf.mxu0  ;;  %1319 = vst [vmem:[%s1996_s2 + $0xe0] sm:$0xff] %v1275_v40   ;;  %v1873_v57 = vpop.f32.mrf.mxu1  ;;  %v886_v40 = vmul.f32 %v1703_v41, %v1703_v41 }
 0x11d   :  { %v941_v54 = vadd.f32 %v940_v47, %v878_v42  ;;  %v809_v55 = vadd.f32 %v1406_v20, %v808_v44  ;;  %v880_v62 = vmul.f32 %v320_v50, %v320_v50  ;;  %v882_v20 = vmul.f32 %v1409_v38, %v1409_v38 }
 0x11e   :  { %v1410_v60 = vpop.f32.mrf.mxu0  ;;  %v1875_v5 = vpop.f32.mrf.mxu1  ;;  %v887_v47 = vmul.f32 %v1707_v46, %v1707_v46 }
 0x11f   :  { %v810_v61 = vadd.f32 %v809_v55, %v320_v50  ;;  %v942_v63 = vadd.f32 %v941_v54, %v879_v52  ;;  %v1210_v1 = vpack.c.bf16 %v1410_v60, %v1409_v38  ;;  %v1290_v7 = vpack.c.bf16 %v1875_v5, %v1868_v49 }
 0x120   :  { %v323_v4 = vpop.f32.mrf.mxu0  ;;  %v1882_v15 = vpop.f32.mrf.mxu1  ;;  %v883_v25 = vmul.f32 %v1410_v60, %v1410_v60  ;;  %v888_v54 = vmul.f32 %v1729_v0, %v1729_v0 }
 0x121   :  { %v943_v8 = vadd.f32 %v942_v63, %v880_v62  ;;  %1306 = vst [vmem:[%s1996_s2 + $0x78] sm:$0xff] %v1210_v1   ;;  %v1205_v9 = vpack.c.bf16 %v323_v4, %v320_v50  ;;  %v811_v12 = vadd.f32 %v810_v61, %v323_v4  ;;  %v881_v14 = vmul.f32 %v323_v4, %v323_v4 }
 0x122   :  { %1322 = vst [vmem:[%s1996_s2 + $0xf8] sm:$0xff] %v1290_v7   ;;  %v1285_v17 = vpack.c.bf16 %v1882_v15, %v1873_v57  ;;  %v889_v61 = vmul.f32 %v1738_v13, %v1738_v13  ;;  %v892_v7 = vmul.f32 %v1753_v24, %v1753_v24 }
 0x123   :  { %1305 = vst [vmem:[%s1996_s2 + $0x70] sm:$0xff] %v1205_v9   ;;  %v812_v21 = vadd.f32 %v1409_v38, %v811_v12  ;;  %v944_v22 = vadd.f32 %v943_v8, %v881_v14  ;;  %v893_v12 = vmul.f32 %v1762_v37, %v1762_v37 }
 0x124   :  { %1321 = vst [vmem:[%s1996_s2 + $0xf0] sm:$0xff] %v1285_v17  }
 0x125   :  { %v813_v26 = vadd.f32 %v1410_v60, %v812_v21  ;;  %v945_v28 = vadd.f32 %v944_v22, %v882_v20  ;;  %v896_v22 = vmul.f32 %v1777_v51, %v1777_v51 }
 0x127   :  { %v946_v31 = vadd.f32 %v945_v28, %v883_v25  ;;  %v814_v33 = vadd.f32 %v813_v26, %v1705_v43  ;;  %v897_v28 = vmul.f32 %v1786_v3, %v1786_v3 }
 0x129   :  { %v815_v34 = vadd.f32 %v814_v33, %v1714_v53  ;;  %v947_v38 = vadd.f32 %v946_v31, %v884_v29 }
 0x12b   :  { %v816_v42 = vadd.f32 %v1703_v41, %v815_v34  ;;  %v948_v44 = vadd.f32 %v947_v38, %v885_v35  ;;  %v890_v41 = vmul.f32 %v1724_v59, %v1724_v59  ;;  %v900_v35 = vmul.f32 %v1801_v16, %v1801_v16 }
 0x12d   :  { %v949_v50 = vadd.f32 %v948_v44, %v886_v40  ;;  %v817_v52 = vadd.f32 %v1707_v46, %v816_v42  ;;  %v891_v46 = vmul.f32 %v1731_v6, %v1731_v6  ;;  %v901_v42 = vmul.f32 %v1810_v32, %v1810_v32 }
 0x12f   :  { %v818_v43 = vadd.f32 %v817_v52, %v1729_v0  ;;  %v950_v55 = vadd.f32 %v949_v50, %v887_v47 }
 0x131   :  { %v951_v53 = vadd.f32 %v950_v55, %v888_v54  ;;  %v819_v60 = vadd.f32 %v818_v43, %v1738_v13  ;;  %v904_v43 = vmul.f32 %v1825_v48, %v1825_v48 }
 0x133   :  { %v820_v62 = vadd.f32 %v1724_v59, %v819_v60  ;;  %v952_v63 = vadd.f32 %v951_v53, %v889_v61  ;;  %v894_v59 = vmul.f32 %v1748_v19, %v1748_v19  ;;  %v905_v53 = vmul.f32 %v1834_v2, %v1834_v2 }
 0x135   :  { %v953_v1 = vadd.f32 %v952_v63, %v890_v41  ;;  %v821_v4 = vadd.f32 %v1731_v6, %v820_v62  ;;  %v895_v6 = vmul.f32 %v1755_v30, %v1755_v30  ;;  %v908_v63 = vmul.f32 %v1849_v18, %v1849_v18 }
 0x137   :  { %v822_v0 = vadd.f32 %v821_v4, %v1753_v24  ;;  %v954_v8 = vadd.f32 %v953_v1, %v891_v46  ;;  %v909_v4 = vmul.f32 %v1858_v36, %v1858_v36 }
 0x139   :  { %v955_v9 = vadd.f32 %v954_v8, %v892_v7  ;;  %v823_v13 = vadd.f32 %v822_v0, %v1762_v37 }
 0x13b   :  { %v824_v14 = vadd.f32 %v1748_v19, %v823_v13  ;;  %v956_v17 = vadd.f32 %v955_v9, %v893_v12  ;;  %v898_v19 = vmul.f32 %v1772_v45, %v1772_v45  ;;  %v912_v13 = vmul.f32 %v1873_v57, %v1873_v57 }
 0x13d   :  { %v957_v20 = vadd.f32 %v956_v17, %v894_v59  ;;  %v825_v21 = vadd.f32 %v1755_v30, %v824_v14  ;;  %v899_v30 = vmul.f32 %v1779_v58, %v1779_v58  ;;  %v913_v14 = vmul.f32 %v1882_v15, %v1882_v15 }
 0x13f   :  { %v826_v24 = vadd.f32 %v825_v21, %v1777_v51  ;;  %v958_v25 = vadd.f32 %v957_v20, %v895_v6 }
 0x141   :  { %v959_v26 = vadd.f32 %v958_v25, %v896_v22  ;;  %v827_v37 = vadd.f32 %v826_v24, %v1786_v3 }
 0x143   :  { %v828_v29 = vadd.f32 %v1772_v45, %v827_v37  ;;  %v960_v31 = vadd.f32 %v959_v26, %v897_v28  ;;  %v902_v45 = vmul.f32 %v1796_v10, %v1796_v10 }
 0x145   :  { %v961_v33 = vadd.f32 %v960_v31, %v898_v19  ;;  %v829_v34 = vadd.f32 %v1779_v58, %v828_v29  ;;  %v903_v58 = vmul.f32 %v1803_v23, %v1803_v23 }
 0x147   :  { %v830_v51 = vadd.f32 %v829_v34, %v1801_v16  ;;  %v962_v38 = vadd.f32 %v961_v33, %v899_v30 }
 0x149   :  { %v963_v40 = vadd.f32 %v962_v38, %v900_v35  ;;  %v831_v3 = vadd.f32 %v830_v51, %v1810_v32 }
 0x14b   :  { %v832_v44 = vadd.f32 %v1796_v10, %v831_v3  ;;  %v964_v47 = vadd.f32 %v963_v40, %v901_v42  ;;  %v906_v10 = vmul.f32 %v1820_v39, %v1820_v39 }
 0x14d   :  { %v965_v50 = vadd.f32 %v964_v47, %v902_v45  ;;  %v833_v52 = vadd.f32 %v1803_v23, %v832_v44  ;;  %v907_v23 = vmul.f32 %v1827_v56, %v1827_v56 }
 0x14f   :  { %v834_v16 = vadd.f32 %v833_v52, %v1825_v48  ;;  %v966_v54 = vadd.f32 %v965_v50, %v903_v58 }
 0x151   :  { %v967_v55 = vadd.f32 %v966_v54, %v904_v43  ;;  %v835_v32 = vadd.f32 %v834_v16, %v1834_v2 }
 0x153   :  { %v836_v60 = vadd.f32 %v1820_v39, %v835_v32  ;;  %v968_v61 = vadd.f32 %v967_v55, %v905_v53  ;;  %v910_v39 = vmul.f32 %v1844_v11, %v1844_v11 }
 0x155   :  { %v969_v41 = vadd.f32 %v968_v61, %v906_v10  ;;  %v837_v62 = vadd.f32 %v1827_v56, %v836_v60  ;;  %v911_v56 = vmul.f32 %v1851_v27, %v1851_v27 }
 0x157   :  { %v838_v48 = vadd.f32 %v837_v62, %v1849_v18  ;;  %v970_v46 = vadd.f32 %v969_v41, %v907_v23 }
 0x159   :  { %v971_v1 = vadd.f32 %v970_v46, %v908_v63  ;;  %v839_v2 = vadd.f32 %v838_v48, %v1858_v36 }
 0x15b   :  { %v840_v0 = vadd.f32 %v1844_v11, %v839_v2  ;;  %v972_v7 = vadd.f32 %v971_v1, %v909_v4  ;;  %v914_v11 = vmul.f32 %v1868_v49, %v1868_v49 }
 0x15d   :  { %v973_v8 = vadd.f32 %v972_v7, %v910_v39  ;;  %v841_v9 = vadd.f32 %v1851_v27, %v840_v0  ;;  %v915_v27 = vmul.f32 %v1875_v5, %v1875_v5 }
 0x15f   :  { %v842_v18 = vadd.f32 %v841_v9, %v1873_v57  ;;  %v974_v12 = vadd.f32 %v973_v8, %v911_v56 }
 0x161   :  { %v975_v59 = vadd.f32 %v974_v12, %v912_v13  ;;  %v843_v36 = vadd.f32 %v842_v18, %v1882_v15 }
 0x163   :  { %v844_v17 = vadd.f32 %v1868_v49, %v843_v36  ;;  %v976_v6 = vadd.f32 %v975_v59, %v913_v14 }
 0x165   :  { %v845_v20 = vadd.f32 %v1875_v5, %v844_v17  ;;  %v977_v21 = vadd.f32 %v976_v6, %v914_v11 }
 0x167   :  { %v846_v57 = vrot.slane %v845_v20, 4  ;;  %v978_v24 = vadd.f32 %v977_v21, %v915_v27 }
 0x169   :  { %v847_v22 = vadd.f32 %v846_v57, %v845_v20  ;;  %v979_v25 = vrot.slane %v978_v24, 4 }
 0x16b   :  { %v848_v26 = vrot.slane %v847_v22, 2  ;;  %v980_v37 = vadd.f32 %v979_v25, %v978_v24 }
 0x16d   :  { %v849_v28 = vadd.f32 %v848_v26, %v847_v22  ;;  %v981_v15 = vrot.slane %v980_v37, 2 }
 0x16f   :  { %v850_v19 = vrot.slane %v849_v28, 1  ;;  %v982_v29 = vadd.f32 %v981_v15, %v980_v37 }
 0x171   :  { %v983_v31 = vrot.slane %v982_v29, 1  ;;  %v851_v49 = vadd.f32 %v850_v19, %v849_v28 }
 0x173   :  { %v984_v30 = vadd.f32 %v983_v31, %v982_v29 }
 0x175   :  { %v986_v33 = vsel %vm985_vm0, %v851_v49, %v984_v30 }
 0x176   :  { %987 = vst [vmem:[%s1997_s3] sm:$0x3] %v986_v33 }

// kernel: bottleneck_forward.6
= control target key start
LH: loop header
LB: loop body
LE: loop exit
PB: predicated region body
PF: predicated region fallthrough
CT: control target
= control target key end

     0   :  { %vm1005_vm0 = vcmask 1040384   ;;  %s2038_s3 = inlined_call_operand.vmem [shape: bf16[128,128], index: 3, kind: input, shape index: {}]   ;;  %s2039_s0 = inlined_call_operand.vmem [shape: bf16[512,128], index: 0, kind: input, shape index: {}]   ;;  %s2040_s1 = inlined_call_operand.vmem [shape: f32[1,128], index: 1, kind: input, shape index: {}]   ;;  %s2041_s2 = inlined_call_operand.vmem [shape: f32[1,128], index: 2, kind: input, shape index: {}]   ;;  %s2042_s4 = inlined_call_operand.vmem [shape: f32[512,128], index: 4, kind: output, shape index: {0}]   ;;  %s2043_s5 = inlined_call_operand.vmem [shape: f32[1,2,128], index: 5, kind: output, shape index: {1}]  }
   0x1   :  { %v1321_v0 = vld [vmem:[%s2038_s3 + $0x38] sm:$0xff]   ;;  %v1322_v1 = vld [vmem:[%s2038_s3 + $0x30] sm:$0xff]   ;;  %v1323_v2 = vld [vmem:[%s2038_s3 + $0x28] sm:$0xff]  }
   0x2   :  { %1225 = vmatprep.subr.bf16.mxu0 %v1321_v0  ;;  %1305 = vmatprep.subr.bf16.mxu1 %v1321_v0  ;;  %v1324_v3 = vld [vmem:[%s2038_s3 + $0x20] sm:$0xff]   ;;  %v1154_v8 = vld [vmem:[%s2039_s0 + $0x8] sm:$0xff]   ;;  %v1155_v9 = vld [vmem:[%s2039_s0 + $0x10] sm:$0xff]  }
   0x3   :  { %1226 = vmatpush3.bf16.msra.mxu0 %v1321_v0  ;;  %1313 = vmatpush3.bf16.msra.mxu1 %v1321_v0  ;;  %v1027_v4 = vld [vmem:[%s2039_s0] sm:$0xff]   ;;  %v1325_v13 = vld [vmem:[%s2038_s3 + $0x18] sm:$0xff]   ;;  %v1032_v14 = vunpack.c.l.bf16 %v1154_v8  ;;  %v1033_v15 = vunpack.c.h.bf16 %v1154_v8  ;;  %v1036_v16 = vunpack.c.l.bf16 %v1155_v9  ;;  %v1037_v19 = vunpack.c.h.bf16 %v1155_v9  ;;  %v1326_v22 = vld [vmem:[%s2038_s3 + $0x10] sm:$0xff]  }
   0x4   :  { %1227 = vmatprep.subr.bf16.mxu0 %v1322_v1  ;;  %1306 = vmatprep.subr.bf16.mxu1 %v1322_v1  ;;  %v1377_v5 = vld [vmem:[%s2040_s1] ss:$0 sm:$0xff]  ;;  %v1028_v6 = vunpack.c.l.bf16 %v1027_v4  ;;  %v1029_v7 = vunpack.c.h.bf16 %v1027_v4  ;;  %v1156_v26 = vld [vmem:[%s2039_s0 + $0x18] sm:$0xff]   ;;  %v1327_v31 = vld [vmem:[%s2038_s3 + $0x8] sm:$0xff]  }
   0x5   :  { %v1388_v10 = vld [vmem:[%s2041_s2] ss:$0 sm:$0xff]  ;;  %v157_v23 = vmul.f32 %v1032_v14, %v1377_v5  ;;  %v158_v24 = vmul.f32 %v1033_v15, %v1377_v5  ;;  %v159_v25 = vmul.f32 %v1036_v16, %v1377_v5  ;;  %v160_v28 = vmul.f32 %v1037_v19, %v1377_v5  ;;  %v1158_v38 = vld [vmem:[%s2039_s0 + $0x28] sm:$0xff]   ;;  %v1159_v41 = vld [vmem:[%s2039_s0 + $0x30] sm:$0xff]  }
   0x6   :  { %v155_v11 = vmul.f32 %v1028_v6, %v1377_v5  ;;  %v156_v12 = vmul.f32 %v1029_v7, %v1377_v5  ;;  %v1157_v29 = vld [vmem:[%s2039_s0 + $0x20] sm:$0xff]   ;;  %v1040_v30 = vunpack.c.l.bf16 %v1156_v26  ;;  %v1041_v35 = vunpack.c.h.bf16 %v1156_v26  ;;  %v1160_v42 = vld [vmem:[%s2039_s0 + $0x38] sm:$0xff]   ;;  %v1162_v63 = vld [vmem:[%s2039_s0 + $0x48] sm:$0xff]  }
   0x7   :  { %1228 = vmatpush3.bf16.msra.mxu0 %v1322_v1  ;;  %1314 = vmatpush3.bf16.msra.mxu1 %v1322_v1  ;;  %v228_v32 = vadd.f32 %v1388_v10, %v157_v23  ;;  %v229_v33 = vadd.f32 %v1388_v10, %v158_v24  ;;  %v230_v34 = vadd.f32 %v1388_v10, %v159_v25  ;;  %v1044_v37 = vunpack.c.l.bf16 %v1157_v29  ;;  %v1328_v43 = vld [vmem:[%s2038_s3] sm:$0xff]   ;;  %v1163_v4 = vld [vmem:[%s2039_s0 + $0x50] sm:$0xff]   ;;  %v1164_v23 = vld [vmem:[%s2039_s0 + $0x58] sm:$0xff]  }
   0x8   :  { %1229 = vmatprep.subr.bf16.mxu0 %v1323_v2  ;;  %1307 = vmatprep.subr.bf16.mxu1 %v1323_v2  ;;  %v226_v17 = vadd.f32 %v1388_v10, %v155_v11  ;;  %v227_v18 = vadd.f32 %v1388_v10, %v156_v12  ;;  %v231_v36 = vadd.f32 %v1388_v10, %v160_v28  ;;  %v1045_v40 = vunpack.c.h.bf16 %v1157_v29  ;;  %v1161_v48 = vld [vmem:[%s2039_s0 + $0x40] sm:$0xff]  }
   0x9   :  { %v161_v39 = vmul.f32 %v1040_v30, %v1377_v5  ;;  %v292_v44 = vmax.f32 %v228_v32, 0.0  ;;  %v293_v45 = vmax.f32 %v229_v33, 0.0  ;;  %v294_v46 = vmax.f32 %v230_v34, 0.0 }
   0xa   :  { %v290_v20 = vmax.f32 %v226_v17, 0.0  ;;  %v291_v21 = vmax.f32 %v227_v18, 0.0  ;;  %v162_v47 = vmul.f32 %v1041_v35, %v1377_v5  ;;  %v295_v49 = vmax.f32 %v231_v36, 0.0 }
   0xb   :  { %1230 = vmatpush3.bf16.msra.mxu0 %v1323_v2  ;;  %1315 = vmatpush3.bf16.msra.mxu1 %v1323_v2  ;;  %v163_v50 = vmul.f32 %v1044_v37, %v1377_v5  ;;  %v1048_v51 = vunpack.c.l.bf16 %v1158_v38  ;;  %v1049_v52 = vunpack.c.h.bf16 %v1158_v38  ;;  %v1052_v53 = vunpack.c.l.bf16 %v1159_v41 }
   0xc   :  { %1231 = vmatprep.subr.bf16.mxu0 %v1324_v3  ;;  %1308 = vmatprep.subr.bf16.mxu1 %v1324_v3  ;;  %v354_v27 = vpack.c.bf16 %v291_v21, %v290_v20  ;;  %v1053_v54 = vunpack.c.h.bf16 %v1159_v41  ;;  %v1056_v55 = vunpack.c.l.bf16 %v1160_v42  ;;  %v1057_v56 = vunpack.c.h.bf16 %v1160_v42 }
   0xd   :  { %v164_v57 = vmul.f32 %v1045_v40, %v1377_v5  ;;  %v1060_v58 = vunpack.c.l.bf16 %v1161_v48  ;;  %v1061_v59 = vunpack.c.h.bf16 %v1161_v48  ;;  %v355_v60 = vpack.c.bf16 %v293_v45, %v292_v44  ;;  %v1169_v44 = vld [vmem:[%s2039_s0 + $0x80] sm:$0xff]  }
   0xe   :  { %1241 = vmatprep.mubr.bf16.mxu0 %v354_v27  ;;  %v232_v61 = vadd.f32 %v1388_v10, %v161_v39  ;;  %v233_v62 = vadd.f32 %v1388_v10, %v162_v47  ;;  %v356_v0 = vpack.c.bf16 %v295_v49, %v294_v46  ;;  %v234_v1 = vadd.f32 %v1388_v10, %v163_v50 }
   0xf   :  { %1232 = vmatpush3.bf16.msra.mxu0 %v1324_v3  ;;  %1316 = vmatpush3.bf16.msra.mxu1 %v1324_v3  ;;  %v165_v2 = vmul.f32 %v1048_v51, %v1377_v5  ;;  %v166_v3 = vmul.f32 %v1049_v52, %v1377_v5  ;;  %v167_v6 = vmul.f32 %v1052_v53, %v1377_v5  ;;  %v1064_v14 = vunpack.c.l.bf16 %v1162_v63  ;;  %v1481_v52 = vld [vmem:[%s2039_s0 + $0x60] sm:$0xff]  }
  0x10   :  { %1233 = vmatprep.subr.bf16.mxu0 %v1325_v13  ;;  %1309 = vmatprep.subr.bf16.mxu1 %v1325_v13  ;;  %v168_v7 = vmul.f32 %v1053_v54, %v1377_v5  ;;  %v169_v8 = vmul.f32 %v1056_v55, %v1377_v5  ;;  %v170_v9 = vmul.f32 %v1057_v56, %v1377_v5  ;;  %v296_v15 = vmax.f32 %v232_v61, 0.0 }
  0x11   :  { %v235_v11 = vadd.f32 %v1388_v10, %v164_v57  ;;  %v171_v12 = vmul.f32 %v1060_v58, %v1377_v5  ;;  %v297_v16 = vmax.f32 %v233_v62, 0.0  ;;  %v1065_v17 = vunpack.c.h.bf16 %v1162_v63 }
  0x12   :  { %v1068_v18 = vunpack.c.l.bf16 %v1163_v4  ;;  %v298_v19 = vmax.f32 %v234_v1, 0.0  ;;  %v236_v20 = vadd.f32 %v1388_v10, %v165_v2  ;;  %v237_v21 = vadd.f32 %v1388_v10, %v166_v3 }
  0x13   :  { %1234 = vmatpush3.bf16.msra.mxu0 %v1325_v13  ;;  %1317 = vmatpush3.bf16.msra.mxu1 %v1325_v13  ;;  %v172_v13 = vmul.f32 %v1061_v59, %v1377_v5  ;;  %v238_v24 = vadd.f32 %v1388_v10, %v167_v6  ;;  %v239_v25 = vadd.f32 %v1388_v10, %v168_v7  ;;  %v299_v28 = vmax.f32 %v235_v11, 0.0  ;;  %v1170_v59 = vld [vmem:[%s2039_s0 + $0x88] sm:$0xff]   ;;  %v1172_v11 = vld [vmem:[%s2039_s0 + $0x98] sm:$0xff]  }
  0x14   :  { %1235 = vmatprep.subr.bf16.mxu0 %v1326_v22  ;;  %1310 = vmatprep.subr.bf16.mxu1 %v1326_v22  ;;  %v240_v26 = vadd.f32 %v1388_v10, %v169_v8  ;;  %v241_v27 = vadd.f32 %v1388_v10, %v170_v9  ;;  %v242_v29 = vadd.f32 %v1388_v10, %v171_v12  ;;  %v1072_v35 = vunpack.c.l.bf16 %v1164_v23 }
  0x15   :  { %v243_v30 = vadd.f32 %v1388_v10, %v172_v13  ;;  %v357_v32 = vpack.c.bf16 %v297_v16, %v296_v15  ;;  %v174_v33 = vmul.f32 %v1065_v17, %v1377_v5  ;;  %v175_v34 = vmul.f32 %v1068_v18, %v1377_v5 }
  0x16   :  { %v300_v36 = vmax.f32 %v236_v20, 0.0  ;;  %v301_v37 = vmax.f32 %v237_v21, 0.0  ;;  %v1073_v39 = vunpack.c.h.bf16 %v1164_v23  ;;  %v302_v40 = vmax.f32 %v238_v24, 0.0  ;;  %v1173_v24 = vld [vmem:[%s2039_s0 + $0xa0] sm:$0xff]  }
  0x17   :  { %1236 = vmatpush3.bf16.msra.mxu0 %v1326_v22  ;;  %1318 = vmatpush3.bf16.msra.mxu1 %v1326_v22  ;;  %v1069_v22 = vunpack.c.h.bf16 %v1163_v4  ;;  %v303_v41 = vmax.f32 %v239_v25, 0.0  ;;  %v304_v42 = vmax.f32 %v240_v26, 0.0  ;;  %v358_v45 = vpack.c.bf16 %v299_v28, %v298_v19 }
  0x18   :  { %1237 = vmatprep.subr.bf16.mxu0 %v1327_v31  ;;  %1311 = vmatprep.subr.bf16.mxu1 %v1327_v31  ;;  %v306_v46 = vmax.f32 %v242_v29, 0.0  ;;  %v307_v47 = vmax.f32 %v243_v30, 0.0  ;;  %v245_v49 = vadd.f32 %v1388_v10, %v174_v33  ;;  %v1475_v50 = vadd.f32 %v1388_v10, %v175_v34  ;;  %v1174_v33 = vld [vmem:[%s2039_s0 + $0xa8] sm:$0xff]  }
  0x19   :  { %v176_v38 = vmul.f32 %v1069_v22, %v1377_v5  ;;  %v177_v51 = vmul.f32 %v1072_v35, %v1377_v5  ;;  %v178_v54 = vmul.f32 %v1073_v39, %v1377_v5  ;;  %v1092_v55 = vunpack.c.l.bf16 %v1169_v44 }
  0x1a   :  { %v359_v56 = vpack.c.bf16 %v301_v37, %v300_v36  ;;  %v360_v57 = vpack.c.bf16 %v303_v41, %v302_v40  ;;  %v1076_v62 = vunpack.c.l.bf16 %v1481_v52  ;;  %v1093_v63 = vunpack.c.h.bf16 %v1169_v44 }
  0x1b   :  { %1238 = vmatpush3.bf16.msra.mxu0 %v1327_v31  ;;  %1319 = vmatpush3.bf16.msra.mxu1 %v1327_v31  ;;  %v173_v31 = vmul.f32 %v1064_v14, %v1377_v5  ;;  %v1484_v53 = vadd.f32 %v1388_v10, %v176_v38  ;;  %v309_v1 = vmax.f32 %v245_v49, 0.0  ;;  %v310_v2 = vmax.f32 %v1475_v50, 0.0 }
  0x1c   :  { %1239 = vmatprep.subr.bf16.mxu0 %v1328_v43  ;;  %1312 = vmatprep.subr.bf16.mxu1 %v1328_v43  ;;  %v1500_v3 = vadd.f32 %v1388_v10, %v177_v51  ;;  %v187_v4 = vmul.f32 %v1092_v55, %v1377_v5  ;;  %v1505_v7 = vadd.f32 %v1388_v10, %v178_v54  ;;  %v1096_v9 = vunpack.c.l.bf16 %v1170_v59 }
  0x1d   :  { %v244_v48 = vadd.f32 %v1388_v10, %v173_v31  ;;  %v311_v6 = vmax.f32 %v1484_v53, 0.0  ;;  %v188_v8 = vmul.f32 %v1093_v63, %v1377_v5  ;;  %v1077_v12 = vunpack.c.h.bf16 %v1481_v52 }
  0x1e   :  { %v258_v13 = vadd.f32 %v1388_v10, %v187_v4  ;;  %v1097_v14 = vunpack.c.h.bf16 %v1170_v59  ;;  %v1514_v16 = vmul.f32 %v1076_v62, %v1377_v5  ;;  %v189_v18 = vmul.f32 %v1096_v9, %v1377_v5 }
  0x1f   :  { %1240 = vmatpush3.bf16.msra.mxu0 %v1328_v43  ;;  %1320 = vmatpush3.bf16.msra.mxu1 %v1328_v43  ;;  %v305_v43 = vmax.f32 %v241_v27, 0.0  ;;  %v308_v61 = vmax.f32 %v244_v48, 0.0  ;;  %v259_v17 = vadd.f32 %v1388_v10, %v188_v8  ;;  %v1104_v23 = vunpack.c.l.bf16 %v1172_v11 }
  0x20   :  { %v322_v20 = vmax.f32 %v258_v13, 0.0  ;;  %v190_v21 = vmul.f32 %v1097_v14, %v1377_v5  ;;  %v260_v27 = vadd.f32 %v1388_v10, %v189_v18  ;;  %v1105_v31 = vunpack.c.h.bf16 %v1172_v11  ;;  %v1177_v18 = vld [vmem:[%s2039_s0 + $0xc0] sm:$0xff]  }
  0x21   :  { %v1487_v58 = vpack.c.bf16 %v305_v43, %v304_v42  ;;  %v1523_v25 = vpack.c.bf16 %v309_v1, %v308_v61  ;;  %v323_v26 = vmax.f32 %v259_v17, 0.0  ;;  %v1108_v37 = vunpack.c.l.bf16 %v1173_v24  ;;  %v1176_v1 = vld [vmem:[%s2039_s0 + $0xb8] sm:$0xff]  }
  0x22   :  { %1242 = vmatmul.mubr.bf16.vlgmr.msra.gmra.mxu0 %v355_v60  ;;  %v1492_v60 = vpack.c.bf16 %v307_v47, %v306_v46  ;;  %v261_v29 = vadd.f32 %v1388_v10, %v190_v21  ;;  %v324_v35 = vmax.f32 %v260_v27, 0.0  ;;  %v194_v40 = vmul.f32 %v1105_v31, %v1377_v5  ;;  %v1175_v46 = vld [vmem:[%s2039_s0 + $0xb0] sm:$0xff]   ;;  %v1166_v47 = vld [vmem:[%s2039_s0 + $0x68] sm:$0xff]  }
  0x23   :  { %1245 = vmatprep.mubr.bf16.mxu0 %v356_v0  ;;  %v1171_v0 = vld [vmem:[%s2039_s0 + $0x90] sm:$0xff]   ;;  %v370_v34 = vpack.c.bf16 %v323_v26, %v322_v20  ;;  %v1109_v43 = vunpack.c.h.bf16 %v1173_v24  ;;  %v195_v44 = vmul.f32 %v1108_v37, %v1377_v5  ;;  %v1113_v54 = vunpack.c.h.bf16 %v1174_v33 }
  0x24   :  { %v1100_v15 = vunpack.c.l.bf16 %v1171_v0  ;;  %v1101_v19 = vunpack.c.h.bf16 %v1171_v0  ;;  %v325_v38 = vmax.f32 %v261_v29, 0.0  ;;  %v265_v49 = vadd.f32 %v1388_v10, %v194_v40  ;;  %v1179_v40 = vld [vmem:[%s2039_s0 + $0xd0] sm:$0xff]  }
  0x25   :  { %1273 = vmatprep.mubr.bf16.mxu1 %v370_v34  ;;  %v198_v62 = vmul.f32 %v1113_v54, %v1377_v5  ;;  %v1116_v63 = vunpack.c.l.bf16 %v1175_v46  ;;  %v1117_v0 = vunpack.c.h.bf16 %v1175_v46  ;;  %v312_v4 = vmax.f32 %v1500_v3, 0.0 }
  0x26   :  { %v191_v22 = vmul.f32 %v1100_v15, %v1377_v5  ;;  %v192_v28 = vmul.f32 %v1101_v19, %v1377_v5  ;;  %v371_v48 = vpack.c.bf16 %v325_v38, %v324_v35  ;;  %v329_v61 = vmax.f32 %v265_v49, 0.0 }
  0x27   :  { %v1080_v8 = vunpack.c.l.bf16 %v1166_v47  ;;  %v313_v13 = vmax.f32 %v1505_v7, 0.0  ;;  %v1081_v14 = vunpack.c.h.bf16 %v1166_v47  ;;  %v199_v15 = vmul.f32 %v1116_v63, %v1377_v5 }
  0x28   :  { %v262_v30 = vadd.f32 %v1388_v10, %v191_v22  ;;  %v263_v36 = vadd.f32 %v1388_v10, %v192_v28  ;;  %1274 = vmatmul.mubr.bf16.vlgmr.msra.gmra.mxu1 %v371_v48  ;;  %v200_v17 = vmul.f32 %v1117_v0, %v1377_v5  ;;  %v180_v3 = vmul.f32 %v1077_v12, %v1377_v5 }
  0x29   :  { %v1120_v19 = vunpack.c.l.bf16 %v1176_v1  ;;  %v1121_v20 = vunpack.c.h.bf16 %v1176_v1  ;;  %v270_v24 = vadd.f32 %v1388_v10, %v199_v15  ;;  %v1124_v27 = vunpack.c.l.bf16 %v1177_v18  ;;  %v1180_v15 = vld [vmem:[%s2039_s0 + $0xd8] sm:$0xff]  }
  0x2a   :  { %1246 = vmatmul.mubr.bf16.gmra.mxu0 %v357_v32  ;;  %v193_v32 = vmul.f32 %v1104_v23, %v1377_v5  ;;  %v326_v39 = vmax.f32 %v262_v30, 0.0  ;;  %v327_v42 = vmax.f32 %v263_v36, 0.0  ;;  %v269_v23 = vadd.f32 %v1388_v10, %v198_v62 }
  0x2b   :  { %1249 = vmatprep.mubr.bf16.mxu0 %v358_v45  ;;  %v1112_v45 = vunpack.c.l.bf16 %v1174_v33  ;;  %v1125_v52 = vunpack.c.h.bf16 %v1177_v18  ;;  %v364_v12 = vpack.c.bf16 %v311_v6, %v310_v2  ;;  %v250_v28 = vadd.f32 %v1388_v10, %v1514_v16  ;;  %v1168_v33 = vld [vmem:[%s2039_s0 + $0x78] sm:$0xff]   ;;  %v1178_v16 = vld [vmem:[%s2039_s0 + $0xc8] sm:$0xff]  }
  0x2c   :  { %v264_v41 = vadd.f32 %v1388_v10, %v193_v32  ;;  %v372_v55 = vpack.c.bf16 %v327_v42, %v326_v39  ;;  %v251_v31 = vadd.f32 %v1388_v10, %v180_v3  ;;  %v181_v32 = vmul.f32 %v1080_v8, %v1377_v5 }
  0x2d   :  { %v197_v59 = vmul.f32 %v1112_v45, %v1377_v5  ;;  %v201_v34 = vmul.f32 %v1120_v19, %v1377_v5  ;;  %v202_v50 = vmul.f32 %v1121_v20, %v1377_v5  ;;  %v365_v35 = vpack.c.bf16 %v313_v13, %v312_v4 }
  0x2e   :  { %v328_v51 = vmax.f32 %v264_v41, 0.0  ;;  %1277 = vmatprep.mubr.bf16.mxu1 %v372_v55  ;;  %v182_v53 = vmul.f32 %v1081_v14, %v1377_v5  ;;  %v333_v6 = vmax.f32 %v269_v23, 0.0  ;;  %v334_v36 = vmax.f32 %v270_v24, 0.0 }
  0x2f   :  { %v268_v22 = vadd.f32 %v1388_v10, %v197_v59  ;;  %v203_v38 = vmul.f32 %v1124_v27, %v1377_v5  ;;  %v204_v39 = vmul.f32 %v1125_v52, %v1377_v5  ;;  %v314_v41 = vmax.f32 %v250_v28, 0.0 }
  0x30   :  { %v373_v21 = vpack.c.bf16 %v329_v61, %v328_v51  ;;  %v315_v45 = vmax.f32 %v251_v31, 0.0  ;;  %v272_v46 = vadd.f32 %v1388_v10, %v201_v34  ;;  %v273_v47 = vadd.f32 %v1388_v10, %v202_v50 }
  0x31   :  { %v332_v2 = vmax.f32 %v268_v22, 0.0  ;;  %v1128_v48 = vunpack.c.l.bf16 %v1178_v16  ;;  %v1129_v51 = vunpack.c.h.bf16 %v1178_v16  ;;  %v1132_v54 = vunpack.c.l.bf16 %v1179_v40 }
  0x32   :  { %1250 = vmatmul.mubr.bf16.gmra.mxu0 %v359_v56  ;;  %v196_v56 = vmul.f32 %v1109_v43, %v1377_v5  ;;  %1278 = vmatmul.mubr.bf16.gmra.mxu1 %v373_v21  ;;  %v1133_v55 = vunpack.c.h.bf16 %v1179_v40  ;;  %v275_v59 = vadd.f32 %v1388_v10, %v204_v39  ;;  %v253_v61 = vadd.f32 %v1388_v10, %v182_v53  ;;  %v1181_v21 = vld [vmem:[%s2039_s0 + $0xe0] sm:$0xff]  }
  0x33   :  { %1253 = vmatprep.mubr.bf16.mxu0 %v360_v57  ;;  %v266_v57 = vadd.f32 %v1388_v10, %v195_v44  ;;  %v1088_v44 = vunpack.c.l.bf16 %v1168_v33  ;;  %v375_v49 = vpack.c.bf16 %v333_v6, %v332_v2  ;;  %v1089_v0 = vunpack.c.h.bf16 %v1168_v33 }
  0x34   :  { %v267_v9 = vadd.f32 %v1388_v10, %v196_v56  ;;  %v252_v56 = vadd.f32 %v1388_v10, %v181_v32  ;;  %v366_v1 = vpack.c.bf16 %v315_v45, %v314_v41  ;;  %v336_v4 = vmax.f32 %v272_v46, 0.0  ;;  %v1183_v41 = vld [vmem:[%s2039_s0 + $0xf0] sm:$0xff]  }
  0x35   :  { %v330_v11 = vmax.f32 %v266_v57, 0.0  ;;  %v274_v57 = vadd.f32 %v1388_v10, %v203_v38  ;;  %v337_v8 = vmax.f32 %v273_v47, 0.0  ;;  %v207_v13 = vmul.f32 %v1132_v54, %v1377_v5 }
  0x36   :  { %v331_v7 = vmax.f32 %v267_v9, 0.0  ;;  %v205_v9 = vmul.f32 %v1128_v48, %v1377_v5  ;;  %v208_v14 = vmul.f32 %v1133_v55, %v1377_v5  ;;  %v339_v3 = vmax.f32 %v275_v59, 0.0 }
  0x37   :  { %v338_v18 = vmax.f32 %v274_v57, 0.0  ;;  %v186_v20 = vmul.f32 %v1089_v0, %v1377_v5  ;;  %v377_v23 = vpack.c.bf16 %v337_v8, %v336_v4  ;;  %v278_v27 = vadd.f32 %v1388_v10, %v207_v13 }
  0x38   :  { %v374_v26 = vpack.c.bf16 %v331_v7, %v330_v11  ;;  %v206_v11 = vmul.f32 %v1129_v51, %v1377_v5  ;;  %v317_v7 = vmax.f32 %v253_v61, 0.0  ;;  %v276_v24 = vadd.f32 %v1388_v10, %v205_v9 }
  0x39   :  { %v279_v52 = vadd.f32 %v1388_v10, %v208_v14  ;;  %v378_v28 = vpack.c.bf16 %v339_v3, %v338_v18  ;;  %v257_v33 = vadd.f32 %v1388_v10, %v186_v20  ;;  %v342_v2 = vmax.f32 %v278_v27, 0.0 }
  0x3a   :  { %1254 = vmatmul.mubr.bf16.gmra.mxu0 %v1487_v58  ;;  %v1167_v58 = vld [vmem:[%s2039_s0 + $0x70] sm:$0xff]   ;;  %1281 = vmatprep.mubr.bf16.mxu1 %v374_v26  ;;  %v1136_v26 = vunpack.c.l.bf16 %v1180_v15  ;;  %v340_v50 = vmax.f32 %v276_v24, 0.0  ;;  %v1148_v51 = vunpack.c.l.bf16 %v1183_v41  ;;  %v1149_v54 = vunpack.c.h.bf16 %v1183_v41 }
  0x3b   :  { %1257 = vmatprep.mubr.bf16.mxu0 %v1492_v60  ;;  %v271_v60 = vadd.f32 %v1388_v10, %v200_v17  ;;  %v1084_v29 = vunpack.c.l.bf16 %v1167_v58  ;;  %v1085_v30 = vunpack.c.h.bf16 %v1167_v58  ;;  %1282 = vmatmul.mubr.bf16.gmra.mxu1 %v375_v49  ;;  %v185_v17 = vmul.f32 %v1088_v44, %v1377_v5 }
  0x3c   :  { %v316_v58 = vmax.f32 %v252_v56, 0.0  ;;  %v343_v6 = vmax.f32 %v279_v52, 0.0  ;;  %v321_v40 = vmax.f32 %v257_v33, 0.0  ;;  %v216_v0 = vmul.f32 %v1149_v54, %v1377_v5 }
  0x3d   :  { %v335_v37 = vmax.f32 %v271_v60, 0.0  ;;  %v183_v42 = vmul.f32 %v1084_v29, %v1377_v5  ;;  %v184_v43 = vmul.f32 %v1085_v30, %v1377_v5  ;;  %v277_v60 = vadd.f32 %v1388_v10, %v206_v11 }
  0x3e   :  { %v1140_v29 = vunpack.c.l.bf16 %v1181_v21  ;;  %v1141_v30 = vunpack.c.h.bf16 %v1181_v21  ;;  %v367_v31 = vpack.c.bf16 %v317_v7, %v316_v58  ;;  %v256_v32 = vadd.f32 %v1388_v10, %v185_v17 }
  0x3f   :  { %v254_v62 = vadd.f32 %v1388_v10, %v183_v42  ;;  %v255_v63 = vadd.f32 %v1388_v10, %v184_v43  ;;  %v341_v53 = vmax.f32 %v277_v60, 0.0  ;;  %v380_v45 = vpack.c.bf16 %v343_v6, %v342_v2 }
  0x40   :  { %v212_v38 = vmul.f32 %v1141_v30, %v1377_v5  ;;  %v320_v39 = vmax.f32 %v256_v32, 0.0  ;;  %v287_v17 = vadd.f32 %v1388_v10, %v216_v0 }
  0x41   :  { %v318_v19 = vmax.f32 %v254_v62, 0.0  ;;  %v319_v22 = vmax.f32 %v255_v63, 0.0  ;;  %v379_v44 = vpack.c.bf16 %v341_v53, %v340_v50  ;;  %v215_v63 = vmul.f32 %v1148_v51, %v1377_v5 }
  0x42   :  { %1258 = vmatmul.mubr.bf16.gmra.mxu0 %v1523_v25  ;;  %v376_v25 = vpack.c.bf16 %v335_v37, %v334_v36  ;;  %v1182_v36 = vld [vmem:[%s2039_s0 + $0xe8] sm:$0xff]   ;;  %v211_v37 = vmul.f32 %v1140_v29, %v1377_v5  ;;  %v283_v49 = vadd.f32 %v1388_v10, %v212_v38  ;;  %v369_v55 = vpack.c.bf16 %v321_v40, %v320_v39 }
  0x43   :  { %1261 = vmatprep.mubr.bf16.mxu0 %v364_v12  ;;  %v1137_v12 = vunpack.c.h.bf16 %v1180_v15  ;;  %v368_v34 = vpack.c.bf16 %v319_v22, %v318_v19  ;;  %v1144_v43 = vunpack.c.l.bf16 %v1182_v36  ;;  %v1145_v47 = vunpack.c.h.bf16 %v1182_v36 }
  0x44   :  { %1285 = vmatprep.mubr.bf16.mxu1 %v376_v25  ;;  %v282_v48 = vadd.f32 %v1388_v10, %v211_v37  ;;  %v347_v62 = vmax.f32 %v283_v49, 0.0  ;;  %v286_v15 = vadd.f32 %v1388_v10, %v215_v63  ;;  %v351_v20 = vmax.f32 %v287_v17, 0.0 }
  0x45   :  { %1286 = vmatmul.mubr.bf16.gmra.mxu1 %v377_v23  ;;  %v210_v16 = vmul.f32 %v1137_v12, %v1377_v5  ;;  %v213_v56 = vmul.f32 %v1144_v43, %v1377_v5  ;;  %v214_v59 = vmul.f32 %v1145_v47, %v1377_v5 }
  0x46   :  { %1289 = vmatprep.mubr.bf16.mxu1 %v378_v28  ;;  %v346_v61 = vmax.f32 %v282_v48, 0.0  ;;  %v350_v19 = vmax.f32 %v286_v15, 0.0 }
  0x47   :  { %v281_v46 = vadd.f32 %v1388_v10, %v210_v16  ;;  %v284_v4 = vadd.f32 %v1388_v10, %v213_v56  ;;  %v285_v9 = vadd.f32 %v1388_v10, %v214_v59 }
  0x48   :  { %v382_v14 = vpack.c.bf16 %v347_v62, %v346_v61  ;;  %v384_v24 = vpack.c.bf16 %v351_v20, %v350_v19 }
  0x49   :  { %v345_v57 = vmax.f32 %v281_v46, 0.0  ;;  %v348_v18 = vmax.f32 %v284_v4, 0.0  ;;  %v349_v3 = vmax.f32 %v285_v9, 0.0 }
  0x4a   :  { %1262 = vmatmul.mubr.bf16.gmra.mxu0 %v365_v35  ;;  %v209_v35 = vmul.f32 %v1136_v26, %v1377_v5 }
  0x4b   :  { %1265 = vmatprep.mubr.bf16.mxu0 %v366_v1  ;;  %v1184_v1 = vld [vmem:[%s2039_s0 + $0xf8] sm:$0xff]   ;;  %v383_v21 = vpack.c.bf16 %v349_v3, %v348_v18 }
  0x4c   :  { %v280_v42 = vadd.f32 %v1388_v10, %v209_v35  ;;  %v1152_v11 = vunpack.c.l.bf16 %v1184_v1  ;;  %v1153_v13 = vunpack.c.h.bf16 %v1184_v1 }
  0x4d   :  { %1290 = vmatmul.mubr.bf16.gmra.mxu1 %v379_v44 }
  0x4e   :  { %v344_v25 = vmax.f32 %v280_v42, 0.0  ;;  %1293 = vmatprep.mubr.bf16.mxu1 %v380_v45  ;;  %v217_v58 = vmul.f32 %v1152_v11, %v1377_v5  ;;  %v218_v7 = vmul.f32 %v1153_v13, %v1377_v5 }
  0x50   :  { %v381_v8 = vpack.c.bf16 %v345_v57, %v344_v25  ;;  %v288_v22 = vadd.f32 %v1388_v10, %v217_v58  ;;  %v289_v23 = vadd.f32 %v1388_v10, %v218_v7 }
  0x52   :  { %1266 = vmatmul.mubr.bf16.gmra.mxu0 %v367_v31  ;;  %v352_v26 = vmax.f32 %v288_v22, 0.0  ;;  %v353_v60 = vmax.f32 %v289_v23, 0.0 }
  0x53   :  { %1269 = vmatprep.mubr.bf16.mxu0 %v368_v34 }
  0x54   :  { %v385_v27 = vpack.c.bf16 %v353_v60, %v352_v26 }
  0x55   :  { %1294 = vmatmul.mubr.bf16.gmra.mxu1 %v381_v8 }
  0x56   :  { %1297 = vmatprep.mubr.bf16.mxu1 %v382_v14 }
  0x5a   :  { %1270 = vmatmul.mubr.bf16.gmra.mxu0 %v369_v55 }
  0x5d   :  { %1298 = vmatmul.mubr.bf16.gmra.mxu1 %v383_v21 }
  0x5e   :  { %1301 = vmatprep.mubr.bf16.mxu1 %v384_v24 }
  0x65   :  { %1302 = vmatmul.mubr.bf16.gmra.mxu1 %v385_v27 }
  0xe2   :  { %v1243_v52 = vpop.f32.mrf.mxu0 }
  0xe3   :  { %741 = vst [vmem:[%s2042_s4 + $0x10] sm:$0xff] %v1243_v52  ;;  %v874_v32 = vmul.f32 %v1243_v52, %v1243_v52 }
  0xe4   :  { %v484_v5 = vpop.f32.mrf.mxu0 }
  0xe5   :  { %739 = vst [vmem:[%s2042_s4] sm:$0xff] %v484_v5  ;;  %v872_v28 = vmul.f32 %v484_v5, %v484_v5 }
  0xe6   :  { %v1244_v12 = vpop.f32.mrf.mxu0 }
  0xe7   :  { %742 = vst [vmem:[%s2042_s4 + $0x18] sm:$0xff] %v1244_v12  ;;  %v875_v35 = vmul.f32 %v1244_v12, %v1244_v12 }
  0xe8   :  { %v487_v10 = vpop.f32.mrf.mxu0  ;;  %v1684_v57 = vpop.f32.mrf.mxu1 }
  0xe9   :  { %740 = vst [vmem:[%s2042_s4 + $0x8] sm:$0xff] %v487_v10  ;;  %v803_v29 = vadd.f32 %v487_v10, %v484_v5  ;;  %v873_v30 = vmul.f32 %v487_v10, %v487_v10  ;;  %773 = vst [vmem:[%s2042_s4 + $0x110] sm:$0xff] %v1684_v57 }
  0xea   :  { %v1247_v31 = vpop.f32.mrf.mxu0  ;;  %v1693_v0 = vpop.f32.mrf.mxu1 }
  0xeb   :  { %v804_v33 = vadd.f32 %v1243_v52, %v803_v29  ;;  %v936_v34 = vadd.f32 %v873_v30, %v872_v28  ;;  %745 = vst [vmem:[%s2042_s4 + $0x30] sm:$0xff] %v1247_v31  ;;  %v878_v43 = vmul.f32 %v1247_v31, %v1247_v31  ;;  %771 = vst [vmem:[%s2042_s4 + $0x100] sm:$0xff] %v1693_v0 }
  0xec   :  { %v500_v50 = vpop.f32.mrf.mxu0  ;;  %v1702_v11 = vpop.f32.mrf.mxu1 }
  0xed   :  { %v937_v53 = vadd.f32 %v936_v34, %v874_v32  ;;  %743 = vst [vmem:[%s2042_s4 + $0x20] sm:$0xff] %v500_v50  ;;  %v805_v2 = vadd.f32 %v1244_v12, %v804_v33  ;;  %v876_v36 = vmul.f32 %v500_v50, %v500_v50  ;;  %774 = vst [vmem:[%s2042_s4 + $0x118] sm:$0xff] %v1702_v11 }
  0xee   :  { %v1248_v6 = vpop.f32.mrf.mxu0  ;;  %v1711_v18 = vpop.f32.mrf.mxu1 }
  0xef   :  { %v806_v16 = vadd.f32 %v805_v2, %v500_v50  ;;  %v938_v37 = vadd.f32 %v937_v53, %v875_v35  ;;  %746 = vst [vmem:[%s2042_s4 + $0x38] sm:$0xff] %v1248_v6  ;;  %v879_v47 = vmul.f32 %v1248_v6, %v1248_v6  ;;  %772 = vst [vmem:[%s2042_s4 + $0x108] sm:$0xff] %v1711_v18 }
  0xf0   :  { %v503_v38 = vpop.f32.mrf.mxu0 }
  0xf1   :  { %v939_v39 = vadd.f32 %v938_v37, %v876_v36  ;;  %744 = vst [vmem:[%s2042_s4 + $0x28] sm:$0xff] %v503_v38  ;;  %v807_v40 = vadd.f32 %v806_v16, %v503_v38  ;;  %v877_v41 = vmul.f32 %v503_v38, %v503_v38 }
  0xf2   :  { %v1251_v42 = vpop.f32.mrf.mxu0  ;;  %v1720_v20 = vpop.f32.mrf.mxu1 }
  0xf3   :  { %v808_v44 = vadd.f32 %v1247_v31, %v807_v40  ;;  %v940_v45 = vadd.f32 %v939_v39, %v877_v41  ;;  %749 = vst [vmem:[%s2042_s4 + $0x50] sm:$0xff] %v1251_v42  ;;  %v882_v1 = vmul.f32 %v1251_v42, %v1251_v42  ;;  %777 = vst [vmem:[%s2042_s4 + $0x130] sm:$0xff] %v1720_v20 }
  0xf4   :  { %v516_v46 = vpop.f32.mrf.mxu0  ;;  %v1729_v26 = vpop.f32.mrf.mxu1 }
  0xf5   :  { %v941_v48 = vadd.f32 %v940_v45, %v878_v43  ;;  %747 = vst [vmem:[%s2042_s4 + $0x40] sm:$0xff] %v516_v46  ;;  %v809_v49 = vadd.f32 %v1248_v6, %v808_v44  ;;  %v880_v55 = vmul.f32 %v516_v46, %v516_v46  ;;  %775 = vst [vmem:[%s2042_s4 + $0x120] sm:$0xff] %v1729_v26 }
  0xf6   :  { %v1252_v51 = vpop.f32.mrf.mxu0  ;;  %v1738_v12 = vpop.f32.mrf.mxu1 }
  0xf7   :  { %v810_v54 = vadd.f32 %v809_v49, %v516_v46  ;;  %v942_v56 = vadd.f32 %v941_v48, %v879_v47  ;;  %750 = vst [vmem:[%s2042_s4 + $0x58] sm:$0xff] %v1252_v51  ;;  %v883_v13 = vmul.f32 %v1252_v51, %v1252_v51  ;;  %778 = vst [vmem:[%s2042_s4 + $0x138] sm:$0xff] %v1738_v12 }
  0xf8   :  { %v519_v25 = vpop.f32.mrf.mxu0  ;;  %v1747_v31 = vpop.f32.mrf.mxu1 }
  0xf9   :  { %v943_v59 = vadd.f32 %v942_v56, %v880_v55  ;;  %748 = vst [vmem:[%s2042_s4 + $0x48] sm:$0xff] %v519_v25  ;;  %v811_v61 = vadd.f32 %v810_v54, %v519_v25  ;;  %v881_v62 = vmul.f32 %v519_v25, %v519_v25  ;;  %776 = vst [vmem:[%s2042_s4 + $0x128] sm:$0xff] %v1747_v31 }
  0xfa   :  { %v1255_v63 = vpop.f32.mrf.mxu0 }
  0xfb   :  { %v812_v4 = vadd.f32 %v1251_v42, %v811_v61  ;;  %v944_v8 = vadd.f32 %v943_v59, %v881_v62  ;;  %753 = vst [vmem:[%s2042_s4 + $0x70] sm:$0xff] %v1255_v63  ;;  %v886_v60 = vmul.f32 %v1255_v63, %v1255_v63  ;;  %v1756_v35 = vpop.f32.mrf.mxu1 }
  0xfc   :  { %v532_v9 = vpop.f32.mrf.mxu0  ;;  %781 = vst [vmem:[%s2042_s4 + $0x150] sm:$0xff] %v1756_v35 }
  0xfd   :  { %v945_v14 = vadd.f32 %v944_v8, %v882_v1  ;;  %751 = vst [vmem:[%s2042_s4 + $0x60] sm:$0xff] %v532_v9  ;;  %v813_v15 = vadd.f32 %v1252_v51, %v812_v4  ;;  %v884_v58 = vmul.f32 %v532_v9, %v532_v9  ;;  %v1765_v36 = vpop.f32.mrf.mxu1 }
  0xfe   :  { %v1256_v17 = vpop.f32.mrf.mxu0  ;;  %779 = vst [vmem:[%s2042_s4 + $0x140] sm:$0xff] %v1765_v36 }
  0xff   :  { %v814_v3 = vadd.f32 %v813_v15, %v532_v9  ;;  %v946_v7 = vadd.f32 %v945_v14, %v883_v13  ;;  %754 = vst [vmem:[%s2042_s4 + $0x78] sm:$0xff] %v1256_v17  ;;  %v887_v10 = vmul.f32 %v1256_v17, %v1256_v17  ;;  %v1774_v41 = vpop.f32.mrf.mxu1 }
 0x100   :  { %v535_v19 = vpop.f32.mrf.mxu0  ;;  %782 = vst [vmem:[%s2042_s4 + $0x158] sm:$0xff] %v1774_v41 }
 0x101   :  { %v947_v21 = vadd.f32 %v946_v7, %v884_v58  ;;  %752 = vst [vmem:[%s2042_s4 + $0x68] sm:$0xff] %v535_v19  ;;  %v815_v22 = vadd.f32 %v814_v3, %v535_v19  ;;  %v885_v23 = vmul.f32 %v535_v19, %v535_v19  ;;  %v1783_v46 = vpop.f32.mrf.mxu1 }
 0x102   :  { %v1259_v24 = vpop.f32.mrf.mxu0  ;;  %780 = vst [vmem:[%s2042_s4 + $0x148] sm:$0xff] %v1783_v46 }
 0x103   :  { %v816_v27 = vadd.f32 %v1255_v63, %v815_v22  ;;  %v948_v52 = vadd.f32 %v947_v21, %v885_v23  ;;  %757 = vst [vmem:[%s2042_s4 + $0x90] sm:$0xff] %v1259_v24  ;;  %v890_v37 = vmul.f32 %v1259_v24, %v1259_v24 }
 0x104   :  { %v548_v5 = vpop.f32.mrf.mxu0 }
 0x105   :  { %v949_v28 = vadd.f32 %v948_v52, %v886_v60  ;;  %755 = vst [vmem:[%s2042_s4 + $0x80] sm:$0xff] %v548_v5  ;;  %v817_v29 = vadd.f32 %v1256_v17, %v816_v27  ;;  %v888_v33 = vmul.f32 %v548_v5, %v548_v5  ;;  %v1792_v54 = vpop.f32.mrf.mxu1 }
 0x106   :  { %v1260_v30 = vpop.f32.mrf.mxu0  ;;  %785 = vst [vmem:[%s2042_s4 + $0x170] sm:$0xff] %v1792_v54 }
 0x107   :  { %v818_v32 = vadd.f32 %v817_v29, %v548_v5  ;;  %v950_v34 = vadd.f32 %v949_v28, %v887_v10  ;;  %758 = vst [vmem:[%s2042_s4 + $0x98] sm:$0xff] %v1260_v30  ;;  %v891_v42 = vmul.f32 %v1260_v30, %v1260_v30  ;;  %v1801_v61 = vpop.f32.mrf.mxu1 }
 0x108   :  { %v551_v50 = vpop.f32.mrf.mxu0  ;;  %783 = vst [vmem:[%s2042_s4 + $0x160] sm:$0xff] %v1801_v61 }
 0x109   :  { %v951_v53 = vadd.f32 %v950_v34, %v888_v33  ;;  %756 = vst [vmem:[%s2042_s4 + $0x88] sm:$0xff] %v551_v50  ;;  %v819_v2 = vadd.f32 %v818_v32, %v551_v50  ;;  %v889_v6 = vmul.f32 %v551_v50, %v551_v50  ;;  %v1810_v8 = vpop.f32.mrf.mxu1 }
 0x10a   :  { %v1263_v16 = vpop.f32.mrf.mxu0  ;;  %786 = vst [vmem:[%s2042_s4 + $0x178] sm:$0xff] %v1810_v8 }
 0x10b   :  { %v820_v38 = vadd.f32 %v1259_v24, %v819_v2  ;;  %v952_v39 = vadd.f32 %v951_v53, %v889_v6  ;;  %761 = vst [vmem:[%s2042_s4 + $0xb0] sm:$0xff] %v1263_v16  ;;  %v894_v62 = vmul.f32 %v1263_v16, %v1263_v16  ;;  %v1819_v17 = vpop.f32.mrf.mxu1 }
 0x10c   :  { %v564_v40 = vpop.f32.mrf.mxu0  ;;  %784 = vst [vmem:[%s2042_s4 + $0x168] sm:$0xff] %v1819_v17 }
 0x10d   :  { %v953_v43 = vadd.f32 %v952_v39, %v890_v37  ;;  %759 = vst [vmem:[%s2042_s4 + $0xa0] sm:$0xff] %v564_v40  ;;  %v821_v44 = vadd.f32 %v1260_v30, %v820_v38  ;;  %v892_v48 = vmul.f32 %v564_v40, %v564_v40  ;;  %v1828_v21 = vpop.f32.mrf.mxu1 }
 0x10e   :  { %v1264_v45 = vpop.f32.mrf.mxu0  ;;  %789 = vst [vmem:[%s2042_s4 + $0x190] sm:$0xff] %v1828_v21 }
 0x10f   :  { %v822_v47 = vadd.f32 %v821_v44, %v564_v40  ;;  %v954_v49 = vadd.f32 %v953_v43, %v891_v42  ;;  %762 = vst [vmem:[%s2042_s4 + $0xb8] sm:$0xff] %v1264_v45  ;;  %v895_v9 = vmul.f32 %v1264_v45, %v1264_v45  ;;  %v1837_v27 = vpop.f32.mrf.mxu1 }
 0x110   :  { %v567_v51 = vpop.f32.mrf.mxu0  ;;  %787 = vst [vmem:[%s2042_s4 + $0x180] sm:$0xff] %v1837_v27 }
 0x111   :  { %v955_v55 = vadd.f32 %v954_v49, %v892_v48  ;;  %760 = vst [vmem:[%s2042_s4 + $0xa8] sm:$0xff] %v567_v51  ;;  %v823_v56 = vadd.f32 %v822_v47, %v567_v51  ;;  %v893_v25 = vmul.f32 %v567_v51, %v567_v51  ;;  %v1846_v29 = vpop.f32.mrf.mxu1 }
 0x112   :  { %v1267_v59 = vpop.f32.mrf.mxu0  ;;  %790 = vst [vmem:[%s2042_s4 + $0x198] sm:$0xff] %v1846_v29 }
 0x113   :  { %v824_v63 = vadd.f32 %v1263_v16, %v823_v56  ;;  %v956_v1 = vadd.f32 %v955_v55, %v893_v25  ;;  %765 = vst [vmem:[%s2042_s4 + $0xd0] sm:$0xff] %v1267_v59  ;;  %v898_v52 = vmul.f32 %v1267_v59, %v1267_v59  ;;  %v1855_v50 = vpop.f32.mrf.mxu1  ;;  %v904_v56 = vmul.f32 %v1693_v0, %v1693_v0 }
 0x114   :  { %v580_v4 = vpop.f32.mrf.mxu0  ;;  %788 = vst [vmem:[%s2042_s4 + $0x188] sm:$0xff] %v1855_v50 }
 0x115   :  { %v957_v13 = vadd.f32 %v956_v1, %v894_v62  ;;  %763 = vst [vmem:[%s2042_s4 + $0xc0] sm:$0xff] %v580_v4  ;;  %v825_v14 = vadd.f32 %v1264_v45, %v824_v63  ;;  %v896_v58 = vmul.f32 %v580_v4, %v580_v4  ;;  %v1864_v37 = vpop.f32.mrf.mxu1  ;;  %v905_v1 = vmul.f32 %v1711_v18, %v1711_v18 }
 0x116   :  { %v1268_v15 = vpop.f32.mrf.mxu0  ;;  %793 = vst [vmem:[%s2042_s4 + $0x1b0] sm:$0xff] %v1864_v37 }
 0x117   :  { %v826_v3 = vadd.f32 %v825_v14, %v580_v4  ;;  %v958_v7 = vadd.f32 %v957_v13, %v895_v9  ;;  %766 = vst [vmem:[%s2042_s4 + $0xd8] sm:$0xff] %v1268_v15  ;;  %v899_v30 = vmul.f32 %v1268_v15, %v1268_v15  ;;  %v1873_v42 = vpop.f32.mrf.mxu1 }
 0x118   :  { %v583_v19 = vpop.f32.mrf.mxu0  ;;  %791 = vst [vmem:[%s2042_s4 + $0x1a0] sm:$0xff] %v1873_v42 }
 0x119   :  { %v959_v22 = vadd.f32 %v958_v7, %v896_v58  ;;  %764 = vst [vmem:[%s2042_s4 + $0xc8] sm:$0xff] %v583_v19  ;;  %v827_v23 = vadd.f32 %v826_v3, %v583_v19  ;;  %v897_v24 = vmul.f32 %v583_v19, %v583_v19  ;;  %v1879_v47 = vpop.f32.mrf.mxu1  ;;  %v908_v19 = vmul.f32 %v1729_v26, %v1729_v26 }
 0x11a   :  { %v1271_v60 = vpop.f32.mrf.mxu0  ;;  %794 = vst [vmem:[%s2042_s4 + $0x1b8] sm:$0xff] %v1879_v47 }
 0x11b   :  { %v828_v5 = vadd.f32 %v1267_v59, %v827_v23  ;;  %v960_v10 = vadd.f32 %v959_v22, %v897_v24  ;;  %769 = vst [vmem:[%s2042_s4 + $0xf0] sm:$0xff] %v1271_v60  ;;  %v902_v43 = vmul.f32 %v1271_v60, %v1271_v60  ;;  %v1885_v55 = vpop.f32.mrf.mxu1 }
 0x11c   :  { %v596_v28 = vpop.f32.mrf.mxu0  ;;  %792 = vst [vmem:[%s2042_s4 + $0x1a8] sm:$0xff] %v1885_v55 }
 0x11d   :  { %v961_v32 = vadd.f32 %v960_v10, %v898_v52  ;;  %767 = vst [vmem:[%s2042_s4 + $0xe0] sm:$0xff] %v596_v28  ;;  %v829_v33 = vadd.f32 %v1268_v15, %v828_v5  ;;  %v900_v2 = vmul.f32 %v596_v28, %v596_v28  ;;  %v1894_v62 = vpop.f32.mrf.mxu1  ;;  %v907_v15 = vmul.f32 %v1702_v11, %v1702_v11 }
 0x11e   :  { %v1272_v34 = vpop.f32.mrf.mxu0  ;;  %797 = vst [vmem:[%s2042_s4 + $0x1d0] sm:$0xff] %v1894_v62  ;;  %v910_v52 = vmul.f32 %v1720_v20, %v1720_v20 }
 0x11f   :  { %v830_v53 = vadd.f32 %v829_v33, %v596_v28  ;;  %v962_v6 = vadd.f32 %v961_v32, %v899_v30  ;;  %770 = vst [vmem:[%s2042_s4 + $0xf8] sm:$0xff] %v1272_v34  ;;  %v903_v48 = vmul.f32 %v1272_v34, %v1272_v34  ;;  %v1903_v9 = vpop.f32.mrf.mxu1 }
 0x120   :  { %v599_v16 = vpop.f32.mrf.mxu0  ;;  %795 = vst [vmem:[%s2042_s4 + $0x1c0] sm:$0xff] %v1903_v9 }
 0x121   :  { %v963_v38 = vadd.f32 %v962_v6, %v900_v2  ;;  %768 = vst [vmem:[%s2042_s4 + $0xe8] sm:$0xff] %v599_v16  ;;  %v831_v39 = vadd.f32 %v830_v53, %v599_v16  ;;  %v901_v40 = vmul.f32 %v599_v16, %v599_v16  ;;  %v913_v6 = vmul.f32 %v1783_v46, %v1783_v46 }
 0x122   :  { %v914_v16 = vmul.f32 %v1756_v35, %v1756_v35 }
 0x123   :  { %v832_v44 = vadd.f32 %v1271_v60, %v831_v39  ;;  %v964_v45 = vadd.f32 %v963_v38, %v901_v40  ;;  %v909_v60 = vmul.f32 %v1747_v31, %v1747_v31 }
 0x125   :  { %v833_v49 = vadd.f32 %v1272_v34, %v832_v44  ;;  %v965_v51 = vadd.f32 %v964_v45, %v902_v43  ;;  %v912_v34 = vmul.f32 %v1765_v36, %v1765_v36  ;;  %v916_v45 = vmul.f32 %v1801_v61, %v1801_v61 }
 0x127   :  { %v966_v25 = vadd.f32 %v965_v51, %v903_v48  ;;  %v834_v59 = vadd.f32 %v833_v49, %v1693_v0  ;;  %v906_v0 = vmul.f32 %v1684_v57, %v1684_v57  ;;  %v917_v51 = vmul.f32 %v1819_v17, %v1819_v17 }
 0x129   :  { %v835_v63 = vadd.f32 %v834_v59, %v1711_v18  ;;  %v967_v4 = vadd.f32 %v966_v25, %v904_v56  ;;  %v1912_v18 = vpop.f32.mrf.mxu1 }
 0x12a   :  { %798 = vst [vmem:[%s2042_s4 + $0x1d8] sm:$0xff] %v1912_v18 }
 0x12b   :  { %v836_v13 = vadd.f32 %v1684_v57, %v835_v63  ;;  %v968_v14 = vadd.f32 %v967_v4, %v905_v1  ;;  %v1921_v57 = vpop.f32.mrf.mxu1  ;;  %v920_v1 = vmul.f32 %v1837_v27, %v1837_v27 }
 0x12c   :  { %796 = vst [vmem:[%s2042_s4 + $0x1c8] sm:$0xff] %v1921_v57 }
 0x12d   :  { %v969_v3 = vadd.f32 %v968_v14, %v906_v0  ;;  %v837_v58 = vadd.f32 %v1702_v11, %v836_v13  ;;  %v1930_v23 = vpop.f32.mrf.mxu1  ;;  %v921_v13 = vmul.f32 %v1855_v50, %v1855_v50 }
 0x12e   :  { %801 = vst [vmem:[%s2042_s4 + $0x1f0] sm:$0xff] %v1930_v23 }
 0x12f   :  { %v838_v7 = vadd.f32 %v837_v58, %v1729_v26  ;;  %v970_v22 = vadd.f32 %v969_v3, %v907_v15  ;;  %v1939_v26 = vpop.f32.mrf.mxu1 }
 0x130   :  { %799 = vst [vmem:[%s2042_s4 + $0x1e0] sm:$0xff] %v1939_v26 }
 0x131   :  { %v971_v11 = vadd.f32 %v970_v22, %v908_v19  ;;  %v839_v24 = vadd.f32 %v838_v7, %v1747_v31  ;;  %v1948_v28 = vpop.f32.mrf.mxu1  ;;  %v911_v31 = vmul.f32 %v1738_v12, %v1738_v12  ;;  %v924_v7 = vmul.f32 %v1873_v42, %v1873_v42 }
 0x132   :  { %802 = vst [vmem:[%s2042_s4 + $0x1f8] sm:$0xff] %v1948_v28 }
 0x133   :  { %v840_v5 = vadd.f32 %v1720_v20, %v839_v24  ;;  %v972_v10 = vadd.f32 %v971_v11, %v909_v60  ;;  %v1957_v20 = vpop.f32.mrf.mxu1  ;;  %v925_v11 = vmul.f32 %v1885_v55, %v1885_v55 }
 0x134   :  { %800 = vst [vmem:[%s2042_s4 + $0x1e8] sm:$0xff] %v1957_v20 }
 0x135   :  { %v973_v30 = vadd.f32 %v972_v10, %v910_v52  ;;  %v841_v32 = vadd.f32 %v1738_v12, %v840_v5  ;;  %v928_v10 = vmul.f32 %v1903_v9, %v1903_v9 }
 0x137   :  { %v842_v33 = vadd.f32 %v841_v32, %v1765_v36  ;;  %v974_v53 = vadd.f32 %v973_v30, %v911_v31  ;;  %v915_v36 = vmul.f32 %v1774_v41, %v1774_v41  ;;  %v929_v32 = vmul.f32 %v1921_v57, %v1921_v57 }
 0x139   :  { %v975_v2 = vadd.f32 %v974_v53, %v912_v34  ;;  %v843_v12 = vadd.f32 %v842_v33, %v1783_v46 }
 0x13b   :  { %v844_v38 = vadd.f32 %v1756_v35, %v843_v12  ;;  %v976_v39 = vadd.f32 %v975_v2, %v913_v6  ;;  %v918_v35 = vmul.f32 %v1792_v54, %v1792_v54  ;;  %v932_v12 = vmul.f32 %v1939_v26, %v1939_v26 }
 0x13d   :  { %v977_v40 = vadd.f32 %v976_v39, %v914_v16  ;;  %v845_v43 = vadd.f32 %v1774_v41, %v844_v38  ;;  %v919_v41 = vmul.f32 %v1810_v8, %v1810_v8  ;;  %v933_v38 = vmul.f32 %v1957_v20, %v1957_v20 }
 0x13f   :  { %v846_v44 = vadd.f32 %v845_v43, %v1801_v61  ;;  %v978_v48 = vadd.f32 %v977_v40, %v915_v36 }
 0x141   :  { %v979_v49 = vadd.f32 %v978_v48, %v916_v45  ;;  %v847_v46 = vadd.f32 %v846_v44, %v1819_v17 }
 0x143   :  { %v848_v56 = vadd.f32 %v1792_v54, %v847_v46  ;;  %v980_v25 = vadd.f32 %v979_v49, %v917_v51  ;;  %v922_v54 = vmul.f32 %v1828_v21, %v1828_v21 }
 0x145   :  { %v981_v59 = vadd.f32 %v980_v25, %v918_v35  ;;  %v849_v63 = vadd.f32 %v1810_v8, %v848_v56  ;;  %v923_v8 = vmul.f32 %v1846_v29, %v1846_v29 }
 0x147   :  { %v850_v61 = vadd.f32 %v849_v63, %v1837_v27  ;;  %v982_v4 = vadd.f32 %v981_v59, %v919_v41 }
 0x149   :  { %v983_v0 = vadd.f32 %v982_v4, %v920_v1  ;;  %v851_v17 = vadd.f32 %v850_v61, %v1855_v50 }
 0x14b   :  { %v852_v14 = vadd.f32 %v1828_v21, %v851_v17  ;;  %v984_v15 = vadd.f32 %v983_v0, %v921_v13  ;;  %v926_v21 = vmul.f32 %v1864_v37, %v1864_v37 }
 0x14d   :  { %v985_v3 = vadd.f32 %v984_v15, %v922_v54  ;;  %v853_v58 = vadd.f32 %v1846_v29, %v852_v14  ;;  %v927_v29 = vmul.f32 %v1879_v47, %v1879_v47 }
 0x14f   :  { %v854_v27 = vadd.f32 %v853_v58, %v1873_v42  ;;  %v986_v19 = vadd.f32 %v985_v3, %v923_v8 }
 0x151   :  { %v987_v22 = vadd.f32 %v986_v19, %v924_v7  ;;  %v855_v50 = vadd.f32 %v854_v27, %v1885_v55 }
 0x153   :  { %v856_v24 = vadd.f32 %v1864_v37, %v855_v50  ;;  %v988_v60 = vadd.f32 %v987_v22, %v925_v11  ;;  %v930_v37 = vmul.f32 %v1894_v62, %v1894_v62 }
 0x155   :  { %v989_v52 = vadd.f32 %v988_v60, %v926_v21  ;;  %v857_v5 = vadd.f32 %v1879_v47, %v856_v24  ;;  %v931_v47 = vmul.f32 %v1912_v18, %v1912_v18 }
 0x157   :  { %v858_v42 = vadd.f32 %v857_v5, %v1903_v9  ;;  %v990_v31 = vadd.f32 %v989_v52, %v927_v29 }
 0x159   :  { %v991_v30 = vadd.f32 %v990_v31, %v928_v10  ;;  %v859_v55 = vadd.f32 %v858_v42, %v1921_v57 }
 0x15b   :  { %v860_v33 = vadd.f32 %v1894_v62, %v859_v55  ;;  %v992_v34 = vadd.f32 %v991_v30, %v929_v32  ;;  %v934_v62 = vmul.f32 %v1930_v23, %v1930_v23 }
 0x15d   :  { %v993_v53 = vadd.f32 %v992_v34, %v930_v37  ;;  %v861_v2 = vadd.f32 %v1912_v18, %v860_v33  ;;  %v935_v18 = vmul.f32 %v1948_v28, %v1948_v28 }
 0x15f   :  { %v862_v9 = vadd.f32 %v861_v2, %v1939_v26  ;;  %v994_v6 = vadd.f32 %v993_v53, %v931_v47 }
 0x161   :  { %v995_v16 = vadd.f32 %v994_v6, %v932_v12  ;;  %v863_v57 = vadd.f32 %v862_v9, %v1957_v20 }
 0x163   :  { %v864_v39 = vadd.f32 %v1930_v23, %v863_v57  ;;  %v996_v36 = vadd.f32 %v995_v16, %v933_v38 }
 0x165   :  { %v865_v40 = vadd.f32 %v1948_v28, %v864_v39  ;;  %v997_v43 = vadd.f32 %v996_v36, %v934_v62 }
 0x167   :  { %v866_v26 = vrot.slane %v865_v40, 4  ;;  %v998_v44 = vadd.f32 %v997_v43, %v935_v18 }
 0x169   :  { %v867_v45 = vadd.f32 %v866_v26, %v865_v40  ;;  %v999_v48 = vrot.slane %v998_v44, 4 }
 0x16b   :  { %v868_v49 = vrot.slane %v867_v45, 2  ;;  %v1000_v46 = vadd.f32 %v999_v48, %v998_v44 }
 0x16d   :  { %v869_v51 = vadd.f32 %v868_v49, %v867_v45  ;;  %v1001_v20 = vrot.slane %v1000_v46, 2 }
 0x16f   :  { %v870_v35 = vrot.slane %v869_v51, 1  ;;  %v1002_v56 = vadd.f32 %v1001_v20, %v1000_v46 }
 0x171   :  { %v1003_v25 = vrot.slane %v1002_v56, 1  ;;  %v871_v23 = vadd.f32 %v870_v35, %v869_v51 }
 0x173   :  { %v1004_v41 = vadd.f32 %v1003_v25, %v1002_v56 }
 0x175   :  { %v1006_v59 = vsel %vm1005_vm0, %v871_v23, %v1004_v41 }
 0x176   :  { %1007 = vst [vmem:[%s2043_s5] sm:$0x3] %v1006_v59 }

// kernel: bottleneck_forward.7
= control target key start
LH: loop header
LB: loop body
LE: loop exit
PB: predicated region body
PF: predicated region fallthrough
CT: control target
= control target key end

     0   :  { %s1224_s0 = inlined_call_operand.vmem [shape: f32[512,128], index: 0, kind: input, shape index: {}]   ;;  %s1225_s1 = inlined_call_operand.vmem [shape: f32[1,128], index: 1, kind: input, shape index: {}]   ;;  %s1226_s2 = inlined_call_operand.vmem [shape: f32[1,128], index: 2, kind: input, shape index: {}]   ;;  %s1227_s3 = inlined_call_operand.vmem [shape: f32[512,128], index: 3, kind: input, shape index: {}]   ;;  %s1228_s4 = inlined_call_operand.vmem [shape: f32[512,128], index: 4, kind: output, shape index: {}]  }
   0x1   :  { %v17_v0 = vld [vmem:[%s1224_s0] sm:$0xff]  ;;  %v18_v4 = vld [vmem:[%s1224_s0 + $0x8] sm:$0xff]  ;;  %v19_v7 = vld [vmem:[%s1224_s0 + $0x10] sm:$0xff] }
   0x2   :  { %v516_v1 = vld [vmem:[%s1225_s1] ss:$0 sm:$0xff]  ;;  %v20_v8 = vld [vmem:[%s1224_s0 + $0x18] sm:$0xff]  ;;  %v224_v10 = vld [vmem:[%s1227_s3 + $0x8] sm:$0xff] }
   0x3   :  { %v521_v2 = vld [vmem:[%s1226_s2] ss:$0 sm:$0xff]  ;;  %v88_v3 = vmul.f32 %v516_v1, %v17_v0  ;;  %v89_v6 = vmul.f32 %v516_v1, %v18_v4  ;;  %v90_v11 = vmul.f32 %v516_v1, %v19_v7  ;;  %v225_v12 = vld [vmem:[%s1227_s3 + $0x10] sm:$0xff]  ;;  %v91_v13 = vmul.f32 %v516_v1, %v20_v8  ;;  %v226_v16 = vld [vmem:[%s1227_s3 + $0x18] sm:$0xff] }
   0x4   :  { %v223_v5 = vld [vmem:[%s1227_s3] sm:$0xff]  ;;  %v22_v18 = vld [vmem:[%s1224_s0 + $0x28] sm:$0xff]  ;;  %v23_v19 = vld [vmem:[%s1224_s0 + $0x30] sm:$0xff] }
   0x5   :  { %v159_v9 = vadd.f32 %v521_v2, %v88_v3  ;;  %v21_v14 = vld [vmem:[%s1224_s0 + $0x20] sm:$0xff]  ;;  %v160_v15 = vadd.f32 %v521_v2, %v89_v6  ;;  %v161_v21 = vadd.f32 %v521_v2, %v90_v11  ;;  %v162_v22 = vadd.f32 %v521_v2, %v91_v13  ;;  %v24_v25 = vld [vmem:[%s1224_s0 + $0x38] sm:$0xff]  ;;  %v228_v28 = vld [vmem:[%s1227_s3 + $0x28] sm:$0xff] }
   0x6   :  { %v92_v17 = vmul.f32 %v516_v1, %v21_v14  ;;  %v227_v23 = vld [vmem:[%s1227_s3 + $0x20] sm:$0xff]  ;;  %v93_v24 = vmul.f32 %v516_v1, %v22_v18  ;;  %v94_v29 = vmul.f32 %v516_v1, %v23_v19  ;;  %v95_v30 = vmul.f32 %v516_v1, %v24_v25  ;;  %v229_v36 = vld [vmem:[%s1227_s3 + $0x30] sm:$0xff]  ;;  %v230_v37 = vld [vmem:[%s1227_s3 + $0x38] sm:$0xff] }
   0x7   :  { %v287_v20 = vadd.f32 %v223_v5, %v159_v9  ;;  %v288_v26 = vadd.f32 %v224_v10, %v160_v15  ;;  %v25_v31 = vld [vmem:[%s1224_s0 + $0x40] sm:$0xff]  ;;  %v289_v33 = vadd.f32 %v225_v12, %v161_v21  ;;  %v290_v34 = vadd.f32 %v226_v16, %v162_v22  ;;  %v26_v38 = vld [vmem:[%s1224_s0 + $0x48] sm:$0xff]  ;;  %v27_v43 = vld [vmem:[%s1224_s0 + $0x50] sm:$0xff] }
   0x8   :  { %v163_v27 = vadd.f32 %v521_v2, %v92_v17  ;;  %v164_v35 = vadd.f32 %v521_v2, %v93_v24  ;;  %v165_v41 = vadd.f32 %v521_v2, %v94_v29  ;;  %v166_v42 = vadd.f32 %v521_v2, %v95_v30  ;;  %v28_v44 = vld [vmem:[%s1224_s0 + $0x58] sm:$0xff]  ;;  %v29_v49 = vld [vmem:[%s1224_s0 + $0x60] sm:$0xff]  ;;  %v30_v55 = vld [vmem:[%s1224_s0 + $0x68] sm:$0xff] }
   0x9   :  { %v351_v32 = vmax.f32 %v287_v20, 0.0  ;;  %v352_v39 = vmax.f32 %v288_v26, 0.0  ;;  %v353_v45 = vmax.f32 %v289_v33, 0.0  ;;  %v354_v46 = vmax.f32 %v290_v34, 0.0  ;;  %v231_v53 = vld [vmem:[%s1227_s3 + $0x40] sm:$0xff]  ;;  %v232_v58 = vld [vmem:[%s1227_s3 + $0x48] sm:$0xff] }
   0xa   :  { %v291_v40 = vadd.f32 %v227_v23, %v163_v27  ;;  %v292_v47 = vadd.f32 %v228_v28, %v164_v35  ;;  %v96_v48 = vmul.f32 %v516_v1, %v25_v31  ;;  %v293_v51 = vadd.f32 %v229_v36, %v165_v41  ;;  %v31_v61 = vld [vmem:[%s1224_s0 + $0x70] sm:$0xff]  ;;  %v32_v62 = vld [vmem:[%s1224_s0 + $0x78] sm:$0xff]  ;;  %v235_v10 = vld [vmem:[%s1227_s3 + $0x60] sm:$0xff] }
   0xb   :  { %415 = vst [vmem:[%s1228_s4] sm:$0xff] %v351_v32  ;;  %416 = vst [vmem:[%s1228_s4 + $0x8] sm:$0xff] %v352_v39  ;;  %v294_v52 = vadd.f32 %v230_v37, %v166_v42  ;;  %v97_v54 = vmul.f32 %v516_v1, %v26_v38  ;;  %v98_v59 = vmul.f32 %v516_v1, %v27_v43  ;;  %v233_v4 = vld [vmem:[%s1227_s3 + $0x50] sm:$0xff]  ;;  %v234_v5 = vld [vmem:[%s1227_s3 + $0x58] sm:$0xff] }
   0xc   :  { %v355_v50 = vmax.f32 %v291_v40, 0.0  ;;  %417 = vst [vmem:[%s1228_s4 + $0x10] sm:$0xff] %v353_v45  ;;  %418 = vst [vmem:[%s1228_s4 + $0x18] sm:$0xff] %v354_v46  ;;  %v356_v56 = vmax.f32 %v292_v47, 0.0  ;;  %v167_v57 = vadd.f32 %v521_v2, %v96_v48  ;;  %v99_v60 = vmul.f32 %v516_v1, %v28_v44  ;;  %v236_v14 = vld [vmem:[%s1227_s3 + $0x68] sm:$0xff]  ;;  %v33_v17 = vld [vmem:[%s1224_s0 + $0x80] sm:$0xff] }
   0xd   :  { %v357_v63 = vmax.f32 %v293_v51, 0.0  ;;  %v358_v0 = vmax.f32 %v294_v52, 0.0  ;;  %v168_v3 = vadd.f32 %v521_v2, %v97_v54  ;;  %v100_v6 = vmul.f32 %v516_v1, %v29_v49  ;;  %v237_v22 = vld [vmem:[%s1227_s3 + $0x70] sm:$0xff]  ;;  %v238_v23 = vld [vmem:[%s1227_s3 + $0x78] sm:$0xff]  ;;  %v34_v24 = vld [vmem:[%s1224_s0 + $0x88] sm:$0xff] }
   0xe   :  { %419 = vst [vmem:[%s1228_s4 + $0x20] sm:$0xff] %v355_v50  ;;  %420 = vst [vmem:[%s1228_s4 + $0x28] sm:$0xff] %v356_v56  ;;  %v295_v7 = vadd.f32 %v231_v53, %v167_v57  ;;  %v169_v8 = vadd.f32 %v521_v2, %v98_v59  ;;  %v170_v9 = vadd.f32 %v521_v2, %v99_v60  ;;  %v35_v29 = vld [vmem:[%s1224_s0 + $0x90] sm:$0xff]  ;;  %v36_v30 = vld [vmem:[%s1224_s0 + $0x98] sm:$0xff] }
   0xf   :  { %v101_v11 = vmul.f32 %v516_v1, %v30_v55  ;;  %421 = vst [vmem:[%s1228_s4 + $0x30] sm:$0xff] %v357_v63  ;;  %422 = vst [vmem:[%s1228_s4 + $0x38] sm:$0xff] %v358_v0  ;;  %v296_v12 = vadd.f32 %v232_v58, %v168_v3  ;;  %v171_v13 = vadd.f32 %v521_v2, %v100_v6  ;;  %v37_v35 = vld [vmem:[%s1224_s0 + $0xa0] sm:$0xff]  ;;  %v38_v41 = vld [vmem:[%s1224_s0 + $0xa8] sm:$0xff] }
  0x10   :  { %v102_v15 = vmul.f32 %v516_v1, %v31_v61  ;;  %v103_v16 = vmul.f32 %v516_v1, %v32_v62  ;;  %v359_v18 = vmax.f32 %v295_v7, 0.0  ;;  %v297_v19 = vadd.f32 %v233_v4, %v169_v8  ;;  %v239_v39 = vld [vmem:[%s1227_s3 + $0x80] sm:$0xff]  ;;  %v240_v44 = vld [vmem:[%s1227_s3 + $0x88] sm:$0xff]  ;;  %v39_v47 = vld [vmem:[%s1224_s0 + $0xb0] sm:$0xff] }
  0x11   :  { %v298_v20 = vadd.f32 %v234_v5, %v170_v9  ;;  %v172_v21 = vadd.f32 %v521_v2, %v101_v11  ;;  %v360_v25 = vmax.f32 %v296_v12, 0.0  ;;  %v299_v26 = vadd.f32 %v235_v10, %v171_v13  ;;  %v40_v48 = vld [vmem:[%s1224_s0 + $0xb8] sm:$0xff]  ;;  %v241_v52 = vld [vmem:[%s1227_s3 + $0x90] sm:$0xff]  ;;  %v243_v58 = vld [vmem:[%s1227_s3 + $0xa0] sm:$0xff] }
  0x12   :  { %v173_v27 = vadd.f32 %v521_v2, %v102_v15  ;;  %v174_v28 = vadd.f32 %v521_v2, %v103_v16  ;;  %423 = vst [vmem:[%s1228_s4 + $0x40] sm:$0xff] %v359_v18  ;;  %v361_v31 = vmax.f32 %v297_v19, 0.0  ;;  %v104_v34 = vmul.f32 %v516_v1, %v33_v17  ;;  %v242_v53 = vld [vmem:[%s1227_s3 + $0x98] sm:$0xff]  ;;  %v244_v62 = vld [vmem:[%s1227_s3 + $0xa8] sm:$0xff]  ;;  %v41_v3 = vld [vmem:[%s1224_s0 + $0xc0] sm:$0xff] }
  0x13   :  { %v362_v32 = vmax.f32 %v298_v20, 0.0  ;;  %v300_v33 = vadd.f32 %v236_v14, %v172_v21  ;;  %424 = vst [vmem:[%s1228_s4 + $0x48] sm:$0xff] %v360_v25  ;;  %v363_v36 = vmax.f32 %v299_v26, 0.0  ;;  %v105_v40 = vmul.f32 %v516_v1, %v34_v24  ;;  %v245_v8 = vld [vmem:[%s1227_s3 + $0xb0] sm:$0xff]  ;;  %v246_v9 = vld [vmem:[%s1227_s3 + $0xb8] sm:$0xff]  ;;  %v42_v10 = vld [vmem:[%s1224_s0 + $0xc8] sm:$0xff] }
  0x14   :  { %v301_v37 = vadd.f32 %v237_v22, %v173_v27  ;;  %v302_v38 = vadd.f32 %v238_v23, %v174_v28  ;;  %425 = vst [vmem:[%s1228_s4 + $0x50] sm:$0xff] %v361_v31  ;;  %v175_v43 = vadd.f32 %v521_v2, %v104_v34  ;;  %v106_v45 = vmul.f32 %v516_v1, %v35_v29  ;;  %v43_v15 = vld [vmem:[%s1224_s0 + $0xd0] sm:$0xff]  ;;  %v44_v16 = vld [vmem:[%s1224_s0 + $0xd8] sm:$0xff]  ;;  %v45_v21 = vld [vmem:[%s1224_s0 + $0xe0] sm:$0xff] }
  0x15   :  { %426 = vst [vmem:[%s1228_s4 + $0x58] sm:$0xff] %v362_v32  ;;  %v364_v42 = vmax.f32 %v300_v33, 0.0  ;;  %v107_v46 = vmul.f32 %v516_v1, %v36_v30  ;;  %427 = vst [vmem:[%s1228_s4 + $0x60] sm:$0xff] %v363_v36  ;;  %v176_v51 = vadd.f32 %v521_v2, %v105_v40  ;;  %v108_v54 = vmul.f32 %v516_v1, %v37_v35  ;;  %v247_v25 = vld [vmem:[%s1227_s3 + $0xc0] sm:$0xff]  ;;  %v46_v27 = vld [vmem:[%s1224_s0 + $0xe8] sm:$0xff] }
  0x16   :  { %v365_v49 = vmax.f32 %v301_v37, 0.0  ;;  %v366_v50 = vmax.f32 %v302_v38, 0.0  ;;  %v303_v55 = vadd.f32 %v239_v39, %v175_v43  ;;  %v177_v56 = vadd.f32 %v521_v2, %v106_v45  ;;  %v248_v30 = vld [vmem:[%s1227_s3 + $0xc8] sm:$0xff]  ;;  %v47_v33 = vld [vmem:[%s1224_s0 + $0xf0] sm:$0xff]  ;;  %v48_v34 = vld [vmem:[%s1224_s0 + $0xf8] sm:$0xff] }
  0x17   :  { %428 = vst [vmem:[%s1228_s4 + $0x68] sm:$0xff] %v364_v42  ;;  %v178_v57 = vadd.f32 %v521_v2, %v107_v46  ;;  %v109_v59 = vmul.f32 %v516_v1, %v38_v41  ;;  %v304_v60 = vadd.f32 %v240_v44, %v176_v51  ;;  %v179_v61 = vadd.f32 %v521_v2, %v108_v54  ;;  %v249_v38 = vld [vmem:[%s1227_s3 + $0xd0] sm:$0xff]  ;;  %v250_v39 = vld [vmem:[%s1227_s3 + $0xd8] sm:$0xff]  ;;  %v251_v44 = vld [vmem:[%s1227_s3 + $0xe0] sm:$0xff] }
  0x18   :  { %429 = vst [vmem:[%s1228_s4 + $0x70] sm:$0xff] %v365_v49  ;;  %430 = vst [vmem:[%s1228_s4 + $0x78] sm:$0xff] %v366_v50  ;;  %v110_v63 = vmul.f32 %v516_v1, %v39_v47  ;;  %v111_v0 = vmul.f32 %v516_v1, %v40_v48  ;;  %v367_v4 = vmax.f32 %v303_v55, 0.0  ;;  %v305_v5 = vadd.f32 %v241_v52, %v177_v56  ;;  %v252_v48 = vld [vmem:[%s1227_s3 + $0xe8] sm:$0xff]  ;;  %v49_v51 = vld [vmem:[%s1224_s0 + $0x100] sm:$0xff] }
  0x19   :  { %v306_v6 = vadd.f32 %v242_v53, %v178_v57  ;;  %v180_v7 = vadd.f32 %v521_v2, %v109_v59  ;;  %v368_v11 = vmax.f32 %v304_v60, 0.0  ;;  %v307_v12 = vadd.f32 %v243_v58, %v179_v61  ;;  %v253_v56 = vld [vmem:[%s1227_s3 + $0xf0] sm:$0xff]  ;;  %v254_v57 = vld [vmem:[%s1227_s3 + $0xf8] sm:$0xff]  ;;  %v50_v58 = vld [vmem:[%s1224_s0 + $0x108] sm:$0xff] }
  0x1a   :  { %v181_v13 = vadd.f32 %v521_v2, %v110_v63  ;;  %v182_v14 = vadd.f32 %v521_v2, %v111_v0  ;;  %431 = vst [vmem:[%s1228_s4 + $0x80] sm:$0xff] %v367_v4  ;;  %v369_v17 = vmax.f32 %v305_v5, 0.0  ;;  %v112_v20 = vmul.f32 %v516_v1, %v41_v3  ;;  %v51_v63 = vld [vmem:[%s1224_s0 + $0x110] sm:$0xff]  ;;  %v52_v0 = vld [vmem:[%s1224_s0 + $0x118] sm:$0xff] }
  0x1b   :  { %v370_v18 = vmax.f32 %v306_v6, 0.0  ;;  %v308_v19 = vadd.f32 %v244_v62, %v180_v7  ;;  %432 = vst [vmem:[%s1228_s4 + $0x88] sm:$0xff] %v368_v11  ;;  %v371_v22 = vmax.f32 %v307_v12, 0.0  ;;  %v113_v26 = vmul.f32 %v516_v1, %v42_v10  ;;  %v53_v7 = vld [vmem:[%s1224_s0 + $0x120] sm:$0xff] }
  0x1c   :  { %v309_v23 = vadd.f32 %v245_v8, %v181_v13  ;;  %v310_v24 = vadd.f32 %v246_v9, %v182_v14  ;;  %433 = vst [vmem:[%s1228_s4 + $0x90] sm:$0xff] %v369_v17  ;;  %v183_v29 = vadd.f32 %v521_v2, %v112_v20  ;;  %v114_v31 = vmul.f32 %v516_v1, %v43_v15  ;;  %v255_v11 = vld [vmem:[%s1227_s3 + $0x100] sm:$0xff]  ;;  %v54_v13 = vld [vmem:[%s1224_s0 + $0x128] sm:$0xff]  ;;  %v56_v20 = vld [vmem:[%s1224_s0 + $0x138] sm:$0xff] }
  0x1d   :  { %434 = vst [vmem:[%s1228_s4 + $0x98] sm:$0xff] %v370_v18  ;;  %v372_v28 = vmax.f32 %v308_v19, 0.0  ;;  %v115_v32 = vmul.f32 %v516_v1, %v44_v16  ;;  %435 = vst [vmem:[%s1228_s4 + $0xa0] sm:$0xff] %v371_v22  ;;  %v184_v37 = vadd.f32 %v521_v2, %v113_v26  ;;  %v116_v40 = vmul.f32 %v516_v1, %v45_v21  ;;  %v256_v16 = vld [vmem:[%s1227_s3 + $0x108] sm:$0xff]  ;;  %v55_v19 = vld [vmem:[%s1224_s0 + $0x130] sm:$0xff] }
  0x1e   :  { %v373_v35 = vmax.f32 %v309_v23, 0.0  ;;  %v374_v36 = vmax.f32 %v310_v24, 0.0  ;;  %v311_v41 = vadd.f32 %v247_v25, %v183_v29  ;;  %v185_v42 = vadd.f32 %v521_v2, %v114_v31  ;;  %v257_v24 = vld [vmem:[%s1227_s3 + $0x110] sm:$0xff]  ;;  %v258_v25 = vld [vmem:[%s1227_s3 + $0x118] sm:$0xff] }
  0x1f   :  { %436 = vst [vmem:[%s1228_s4 + $0xa8] sm:$0xff] %v372_v28  ;;  %v186_v43 = vadd.f32 %v521_v2, %v115_v32  ;;  %v117_v45 = vmul.f32 %v516_v1, %v46_v27  ;;  %v312_v46 = vadd.f32 %v248_v30, %v184_v37  ;;  %v187_v47 = vadd.f32 %v521_v2, %v116_v40  ;;  %v259_v30 = vld [vmem:[%s1227_s3 + $0x120] sm:$0xff] }
  0x20   :  { %437 = vst [vmem:[%s1228_s4 + $0xb0] sm:$0xff] %v373_v35  ;;  %438 = vst [vmem:[%s1228_s4 + $0xb8] sm:$0xff] %v374_v36  ;;  %v118_v49 = vmul.f32 %v516_v1, %v47_v33  ;;  %v119_v50 = vmul.f32 %v516_v1, %v48_v34  ;;  %v375_v52 = vmax.f32 %v311_v41, 0.0  ;;  %v313_v53 = vadd.f32 %v249_v38, %v185_v42  ;;  %v260_v34 = vld [vmem:[%s1227_s3 + $0x128] sm:$0xff]  ;;  %v57_v37 = vld [vmem:[%s1224_s0 + $0x140] sm:$0xff] }
  0x21   :  { %v314_v54 = vadd.f32 %v250_v39, %v186_v43  ;;  %v188_v55 = vadd.f32 %v521_v2, %v117_v45  ;;  %v376_v59 = vmax.f32 %v312_v46, 0.0  ;;  %v315_v60 = vadd.f32 %v251_v44, %v187_v47  ;;  %v261_v42 = vld [vmem:[%s1227_s3 + $0x130] sm:$0xff]  ;;  %v262_v43 = vld [vmem:[%s1227_s3 + $0x138] sm:$0xff]  ;;  %v58_v44 = vld [vmem:[%s1224_s0 + $0x148] sm:$0xff] }
  0x22   :  { %v189_v61 = vadd.f32 %v521_v2, %v118_v49  ;;  %v190_v62 = vadd.f32 %v521_v2, %v119_v50  ;;  %439 = vst [vmem:[%s1228_s4 + $0xc0] sm:$0xff] %v375_v52  ;;  %v377_v3 = vmax.f32 %v313_v53, 0.0  ;;  %v120_v6 = vmul.f32 %v516_v1, %v49_v51  ;;  %v59_v49 = vld [vmem:[%s1224_s0 + $0x150] sm:$0xff]  ;;  %v60_v50 = vld [vmem:[%s1224_s0 + $0x158] sm:$0xff] }
  0x23   :  { %v378_v4 = vmax.f32 %v314_v54, 0.0  ;;  %v316_v5 = vadd.f32 %v252_v48, %v188_v55  ;;  %440 = vst [vmem:[%s1228_s4 + $0xc8] sm:$0xff] %v376_v59  ;;  %v379_v8 = vmax.f32 %v315_v60, 0.0  ;;  %v121_v12 = vmul.f32 %v516_v1, %v50_v58  ;;  %v61_v55 = vld [vmem:[%s1224_s0 + $0x160] sm:$0xff] }
  0x24   :  { %v317_v9 = vadd.f32 %v253_v56, %v189_v61  ;;  %v318_v10 = vadd.f32 %v254_v57, %v190_v62  ;;  %441 = vst [vmem:[%s1228_s4 + $0xd0] sm:$0xff] %v377_v3  ;;  %v191_v15 = vadd.f32 %v521_v2, %v120_v6  ;;  %v122_v17 = vmul.f32 %v516_v1, %v51_v63  ;;  %v263_v59 = vld [vmem:[%s1227_s3 + $0x140] sm:$0xff]  ;;  %v62_v61 = vld [vmem:[%s1224_s0 + $0x168] sm:$0xff]  ;;  %v64_v6 = vld [vmem:[%s1224_s0 + $0x178] sm:$0xff] }
  0x25   :  { %442 = vst [vmem:[%s1228_s4 + $0xd8] sm:$0xff] %v378_v4  ;;  %v380_v14 = vmax.f32 %v316_v5, 0.0  ;;  %v123_v18 = vmul.f32 %v516_v1, %v52_v0  ;;  %443 = vst [vmem:[%s1228_s4 + $0xe0] sm:$0xff] %v379_v8  ;;  %v192_v23 = vadd.f32 %v521_v2, %v121_v12  ;;  %v124_v26 = vmul.f32 %v516_v1, %v53_v7  ;;  %v264_v0 = vld [vmem:[%s1227_s3 + $0x148] sm:$0xff]  ;;  %v63_v5 = vld [vmem:[%s1224_s0 + $0x170] sm:$0xff] }
  0x26   :  { %v381_v21 = vmax.f32 %v317_v9, 0.0  ;;  %v382_v22 = vmax.f32 %v318_v10, 0.0  ;;  %v319_v27 = vadd.f32 %v255_v11, %v191_v15  ;;  %v193_v28 = vadd.f32 %v521_v2, %v122_v17  ;;  %v265_v10 = vld [vmem:[%s1227_s3 + $0x150] sm:$0xff]  ;;  %v266_v11 = vld [vmem:[%s1227_s3 + $0x158] sm:$0xff] }
  0x27   :  { %444 = vst [vmem:[%s1228_s4 + $0xe8] sm:$0xff] %v380_v14  ;;  %v194_v29 = vadd.f32 %v521_v2, %v123_v18  ;;  %v125_v31 = vmul.f32 %v516_v1, %v54_v13  ;;  %v320_v32 = vadd.f32 %v256_v16, %v192_v23  ;;  %v195_v33 = vadd.f32 %v521_v2, %v124_v26  ;;  %v267_v16 = vld [vmem:[%s1227_s3 + $0x160] sm:$0xff] }
  0x28   :  { %445 = vst [vmem:[%s1228_s4 + $0xf0] sm:$0xff] %v381_v21  ;;  %446 = vst [vmem:[%s1228_s4 + $0xf8] sm:$0xff] %v382_v22  ;;  %v126_v35 = vmul.f32 %v516_v1, %v55_v19  ;;  %v127_v36 = vmul.f32 %v516_v1, %v56_v20  ;;  %v383_v38 = vmax.f32 %v319_v27, 0.0  ;;  %v321_v39 = vadd.f32 %v257_v24, %v193_v28  ;;  %v268_v20 = vld [vmem:[%s1227_s3 + $0x168] sm:$0xff]  ;;  %v65_v23 = vld [vmem:[%s1224_s0 + $0x180] sm:$0xff] }
  0x29   :  { %v322_v40 = vadd.f32 %v258_v25, %v194_v29  ;;  %v196_v41 = vadd.f32 %v521_v2, %v125_v31  ;;  %v384_v45 = vmax.f32 %v320_v32, 0.0  ;;  %v323_v46 = vadd.f32 %v259_v30, %v195_v33  ;;  %v269_v28 = vld [vmem:[%s1227_s3 + $0x170] sm:$0xff]  ;;  %v270_v29 = vld [vmem:[%s1227_s3 + $0x178] sm:$0xff]  ;;  %v66_v30 = vld [vmem:[%s1224_s0 + $0x188] sm:$0xff] }
  0x2a   :  { %v197_v47 = vadd.f32 %v521_v2, %v126_v35  ;;  %v198_v48 = vadd.f32 %v521_v2, %v127_v36  ;;  %447 = vst [vmem:[%s1228_s4 + $0x100] sm:$0xff] %v383_v38  ;;  %v385_v51 = vmax.f32 %v321_v39, 0.0  ;;  %v128_v54 = vmul.f32 %v516_v1, %v57_v37  ;;  %v67_v35 = vld [vmem:[%s1224_s0 + $0x190] sm:$0xff]  ;;  %v68_v36 = vld [vmem:[%s1224_s0 + $0x198] sm:$0xff] }
  0x2b   :  { %v386_v52 = vmax.f32 %v322_v40, 0.0  ;;  %v324_v53 = vadd.f32 %v260_v34, %v196_v41  ;;  %448 = vst [vmem:[%s1228_s4 + $0x108] sm:$0xff] %v384_v45  ;;  %v387_v56 = vmax.f32 %v323_v46, 0.0  ;;  %v129_v60 = vmul.f32 %v516_v1, %v58_v44  ;;  %v69_v41 = vld [vmem:[%s1224_s0 + $0x1a0] sm:$0xff] }
  0x2c   :  { %v325_v57 = vadd.f32 %v261_v42, %v197_v47  ;;  %v326_v58 = vadd.f32 %v262_v43, %v198_v48  ;;  %449 = vst [vmem:[%s1228_s4 + $0x110] sm:$0xff] %v385_v51  ;;  %v199_v63 = vadd.f32 %v521_v2, %v128_v54  ;;  %v130_v3 = vmul.f32 %v516_v1, %v59_v49  ;;  %v271_v45 = vld [vmem:[%s1227_s3 + $0x180] sm:$0xff]  ;;  %v70_v47 = vld [vmem:[%s1224_s0 + $0x1a8] sm:$0xff]  ;;  %v72_v54 = vld [vmem:[%s1224_s0 + $0x1b8] sm:$0xff] }
  0x2d   :  { %450 = vst [vmem:[%s1228_s4 + $0x118] sm:$0xff] %v386_v52  ;;  %v388_v62 = vmax.f32 %v324_v53, 0.0  ;;  %v131_v4 = vmul.f32 %v516_v1, %v60_v50  ;;  %451 = vst [vmem:[%s1228_s4 + $0x120] sm:$0xff] %v387_v56  ;;  %v200_v9 = vadd.f32 %v521_v2, %v129_v60  ;;  %v132_v12 = vmul.f32 %v516_v1, %v61_v55  ;;  %v272_v50 = vld [vmem:[%s1227_s3 + $0x188] sm:$0xff]  ;;  %v71_v53 = vld [vmem:[%s1224_s0 + $0x1b0] sm:$0xff] }
  0x2e   :  { %v389_v7 = vmax.f32 %v325_v57, 0.0  ;;  %v390_v8 = vmax.f32 %v326_v58, 0.0  ;;  %v327_v13 = vadd.f32 %v263_v59, %v199_v63  ;;  %v201_v14 = vadd.f32 %v521_v2, %v130_v3  ;;  %v273_v58 = vld [vmem:[%s1227_s3 + $0x190] sm:$0xff]  ;;  %v274_v59 = vld [vmem:[%s1227_s3 + $0x198] sm:$0xff] }
  0x2f   :  { %452 = vst [vmem:[%s1228_s4 + $0x128] sm:$0xff] %v388_v62  ;;  %v202_v15 = vadd.f32 %v521_v2, %v131_v4  ;;  %v133_v17 = vmul.f32 %v516_v1, %v62_v61  ;;  %v328_v18 = vadd.f32 %v264_v0, %v200_v9  ;;  %v203_v19 = vadd.f32 %v521_v2, %v132_v12  ;;  %v275_v0 = vld [vmem:[%s1227_s3 + $0x1a0] sm:$0xff] }
  0x30   :  { %453 = vst [vmem:[%s1228_s4 + $0x130] sm:$0xff] %v389_v7  ;;  %454 = vst [vmem:[%s1228_s4 + $0x138] sm:$0xff] %v390_v8  ;;  %v134_v21 = vmul.f32 %v516_v1, %v63_v5  ;;  %v135_v22 = vmul.f32 %v516_v1, %v64_v6  ;;  %v391_v24 = vmax.f32 %v327_v13, 0.0  ;;  %v329_v25 = vadd.f32 %v265_v10, %v201_v14  ;;  %v276_v6 = vld [vmem:[%s1227_s3 + $0x1a8] sm:$0xff]  ;;  %v73_v9 = vld [vmem:[%s1224_s0 + $0x1c0] sm:$0xff] }
  0x31   :  { %v330_v26 = vadd.f32 %v266_v11, %v202_v15  ;;  %v204_v27 = vadd.f32 %v521_v2, %v133_v17  ;;  %v392_v31 = vmax.f32 %v328_v18, 0.0  ;;  %v331_v32 = vadd.f32 %v267_v16, %v203_v19  ;;  %v277_v14 = vld [vmem:[%s1227_s3 + $0x1b0] sm:$0xff]  ;;  %v278_v15 = vld [vmem:[%s1227_s3 + $0x1b8] sm:$0xff]  ;;  %v74_v16 = vld [vmem:[%s1224_s0 + $0x1c8] sm:$0xff] }
  0x32   :  { %v205_v33 = vadd.f32 %v521_v2, %v134_v21  ;;  %v206_v34 = vadd.f32 %v521_v2, %v135_v22  ;;  %455 = vst [vmem:[%s1228_s4 + $0x140] sm:$0xff] %v391_v24  ;;  %v393_v37 = vmax.f32 %v329_v25, 0.0  ;;  %v136_v40 = vmul.f32 %v516_v1, %v65_v23  ;;  %v75_v21 = vld [vmem:[%s1224_s0 + $0x1d0] sm:$0xff]  ;;  %v76_v22 = vld [vmem:[%s1224_s0 + $0x1d8] sm:$0xff] }
  0x33   :  { %v394_v38 = vmax.f32 %v330_v26, 0.0  ;;  %v332_v39 = vadd.f32 %v268_v20, %v204_v27  ;;  %456 = vst [vmem:[%s1228_s4 + $0x148] sm:$0xff] %v392_v31  ;;  %v395_v42 = vmax.f32 %v331_v32, 0.0  ;;  %v137_v46 = vmul.f32 %v516_v1, %v66_v30  ;;  %v77_v27 = vld [vmem:[%s1224_s0 + $0x1e0] sm:$0xff] }
  0x34   :  { %v333_v43 = vadd.f32 %v269_v28, %v205_v33  ;;  %v334_v44 = vadd.f32 %v270_v29, %v206_v34  ;;  %457 = vst [vmem:[%s1228_s4 + $0x150] sm:$0xff] %v393_v37  ;;  %v207_v49 = vadd.f32 %v521_v2, %v136_v40  ;;  %v138_v51 = vmul.f32 %v516_v1, %v67_v35  ;;  %v279_v31 = vld [vmem:[%s1227_s3 + $0x1c0] sm:$0xff]  ;;  %v78_v33 = vld [vmem:[%s1224_s0 + $0x1e8] sm:$0xff]  ;;  %v80_v40 = vld [vmem:[%s1224_s0 + $0x1f8] sm:$0xff] }
  0x35   :  { %458 = vst [vmem:[%s1228_s4 + $0x158] sm:$0xff] %v394_v38  ;;  %v396_v48 = vmax.f32 %v332_v39, 0.0  ;;  %v139_v52 = vmul.f32 %v516_v1, %v68_v36  ;;  %459 = vst [vmem:[%s1228_s4 + $0x160] sm:$0xff] %v395_v42  ;;  %v208_v57 = vadd.f32 %v521_v2, %v137_v46  ;;  %v140_v60 = vmul.f32 %v516_v1, %v69_v41  ;;  %v280_v36 = vld [vmem:[%s1227_s3 + $0x1c8] sm:$0xff]  ;;  %v79_v39 = vld [vmem:[%s1224_s0 + $0x1f0] sm:$0xff] }
  0x36   :  { %v397_v55 = vmax.f32 %v333_v43, 0.0  ;;  %v398_v56 = vmax.f32 %v334_v44, 0.0  ;;  %v335_v61 = vadd.f32 %v271_v45, %v207_v49  ;;  %v209_v62 = vadd.f32 %v521_v2, %v138_v51  ;;  %v281_v44 = vld [vmem:[%s1227_s3 + $0x1d0] sm:$0xff]  ;;  %v282_v45 = vld [vmem:[%s1227_s3 + $0x1d8] sm:$0xff] }
  0x37   :  { %460 = vst [vmem:[%s1228_s4 + $0x168] sm:$0xff] %v396_v48  ;;  %v210_v63 = vadd.f32 %v521_v2, %v139_v52  ;;  %v141_v3 = vmul.f32 %v516_v1, %v70_v47  ;;  %v336_v4 = vadd.f32 %v272_v50, %v208_v57  ;;  %v211_v5 = vadd.f32 %v521_v2, %v140_v60  ;;  %v283_v50 = vld [vmem:[%s1227_s3 + $0x1e0] sm:$0xff] }
  0x38   :  { %461 = vst [vmem:[%s1228_s4 + $0x170] sm:$0xff] %v397_v55  ;;  %462 = vst [vmem:[%s1228_s4 + $0x178] sm:$0xff] %v398_v56  ;;  %v142_v7 = vmul.f32 %v516_v1, %v71_v53  ;;  %v143_v8 = vmul.f32 %v516_v1, %v72_v54  ;;  %v399_v10 = vmax.f32 %v335_v61, 0.0  ;;  %v337_v11 = vadd.f32 %v273_v58, %v209_v62  ;;  %v284_v54 = vld [vmem:[%s1227_s3 + $0x1e8] sm:$0xff]  ;;  %v285_v61 = vld [vmem:[%s1227_s3 + $0x1f0] sm:$0xff] }
  0x39   :  { %v338_v12 = vadd.f32 %v274_v59, %v210_v63  ;;  %v212_v13 = vadd.f32 %v521_v2, %v141_v3  ;;  %v400_v17 = vmax.f32 %v336_v4, 0.0  ;;  %v339_v18 = vadd.f32 %v275_v0, %v211_v5  ;;  %v286_v62 = vld [vmem:[%s1227_s3 + $0x1f8] sm:$0xff] }
  0x3a   :  { %v213_v19 = vadd.f32 %v521_v2, %v142_v7  ;;  %v214_v20 = vadd.f32 %v521_v2, %v143_v8  ;;  %463 = vst [vmem:[%s1228_s4 + $0x180] sm:$0xff] %v399_v10  ;;  %v401_v23 = vmax.f32 %v337_v11, 0.0  ;;  %v144_v26 = vmul.f32 %v516_v1, %v73_v9 }
  0x3b   :  { %v402_v24 = vmax.f32 %v338_v12, 0.0  ;;  %v340_v25 = vadd.f32 %v276_v6, %v212_v13  ;;  %464 = vst [vmem:[%s1228_s4 + $0x188] sm:$0xff] %v400_v17  ;;  %v403_v28 = vmax.f32 %v339_v18, 0.0  ;;  %v145_v32 = vmul.f32 %v516_v1, %v74_v16 }
  0x3c   :  { %v341_v29 = vadd.f32 %v277_v14, %v213_v19  ;;  %v342_v30 = vadd.f32 %v278_v15, %v214_v20  ;;  %465 = vst [vmem:[%s1228_s4 + $0x190] sm:$0xff] %v401_v23  ;;  %v215_v35 = vadd.f32 %v521_v2, %v144_v26  ;;  %v146_v37 = vmul.f32 %v516_v1, %v75_v21 }
  0x3d   :  { %466 = vst [vmem:[%s1228_s4 + $0x198] sm:$0xff] %v402_v24  ;;  %v404_v34 = vmax.f32 %v340_v25, 0.0  ;;  %v147_v38 = vmul.f32 %v516_v1, %v76_v22  ;;  %467 = vst [vmem:[%s1228_s4 + $0x1a0] sm:$0xff] %v403_v28  ;;  %v216_v43 = vadd.f32 %v521_v2, %v145_v32  ;;  %v148_v46 = vmul.f32 %v516_v1, %v77_v27 }
  0x3e   :  { %v405_v41 = vmax.f32 %v341_v29, 0.0  ;;  %v406_v42 = vmax.f32 %v342_v30, 0.0  ;;  %v343_v47 = vadd.f32 %v279_v31, %v215_v35  ;;  %v217_v48 = vadd.f32 %v521_v2, %v146_v37 }
  0x3f   :  { %468 = vst [vmem:[%s1228_s4 + $0x1a8] sm:$0xff] %v404_v34  ;;  %v218_v49 = vadd.f32 %v521_v2, %v147_v38  ;;  %v149_v51 = vmul.f32 %v516_v1, %v78_v33  ;;  %v344_v52 = vadd.f32 %v280_v36, %v216_v43  ;;  %v219_v53 = vadd.f32 %v521_v2, %v148_v46 }
  0x40   :  { %469 = vst [vmem:[%s1228_s4 + $0x1b0] sm:$0xff] %v405_v41  ;;  %470 = vst [vmem:[%s1228_s4 + $0x1b8] sm:$0xff] %v406_v42  ;;  %v150_v55 = vmul.f32 %v516_v1, %v79_v39  ;;  %v151_v56 = vmul.f32 %v516_v1, %v80_v40  ;;  %v407_v57 = vmax.f32 %v343_v47, 0.0  ;;  %v345_v58 = vadd.f32 %v281_v44, %v217_v48 }
  0x41   :  { %v346_v59 = vadd.f32 %v282_v45, %v218_v49  ;;  %v220_v60 = vadd.f32 %v521_v2, %v149_v51  ;;  %v408_v63 = vmax.f32 %v344_v52, 0.0  ;;  %v347_v0 = vadd.f32 %v283_v50, %v219_v53 }
  0x42   :  { %v221_v3 = vadd.f32 %v521_v2, %v150_v55  ;;  %v222_v4 = vadd.f32 %v521_v2, %v151_v56  ;;  %471 = vst [vmem:[%s1228_s4 + $0x1c0] sm:$0xff] %v407_v57  ;;  %v409_v1 = vmax.f32 %v345_v58, 0.0 }
  0x43   :  { %v410_v5 = vmax.f32 %v346_v59, 0.0  ;;  %v348_v6 = vadd.f32 %v284_v54, %v220_v60  ;;  %472 = vst [vmem:[%s1228_s4 + $0x1c8] sm:$0xff] %v408_v63  ;;  %v411_v7 = vmax.f32 %v347_v0, 0.0 }
  0x44   :  { %v349_v8 = vadd.f32 %v285_v61, %v221_v3  ;;  %v350_v9 = vadd.f32 %v286_v62, %v222_v4  ;;  %473 = vst [vmem:[%s1228_s4 + $0x1d0] sm:$0xff] %v409_v1 }
  0x45   :  { %474 = vst [vmem:[%s1228_s4 + $0x1d8] sm:$0xff] %v410_v5  ;;  %v412_v2 = vmax.f32 %v348_v6, 0.0  ;;  %475 = vst [vmem:[%s1228_s4 + $0x1e0] sm:$0xff] %v411_v7 }
  0x46   :  { %v413_v10 = vmax.f32 %v349_v8, 0.0  ;;  %v414_v11 = vmax.f32 %v350_v9, 0.0 }
  0x47   :  { %476 = vst [vmem:[%s1228_s4 + $0x1e8] sm:$0xff] %v412_v2 }
  0x48   :  { %477 = vst [vmem:[%s1228_s4 + $0x1f0] sm:$0xff] %v413_v10  ;;  %478 = vst [vmem:[%s1228_s4 + $0x1f8] sm:$0xff] %v414_v11 }

// kernel: bottleneck_forward.5
= control target key start
LH: loop header
LB: loop body
LE: loop exit
PB: predicated region body
PF: predicated region fallthrough
CT: control target
= control target key end

     0   :  { %s5604_s18 = smov 0   ;;  %s7071_s0 = inlined_call_operand.vmem [shape: bf16[512,128], index: 0, kind: input, shape index: {}]   ;;  %s7072_s1 = inlined_call_operand.vmem [shape: f32[1,128], index: 1, kind: input, shape index: {}]   ;;  %s7073_s2 = inlined_call_operand.vmem [shape: f32[1,128], index: 2, kind: input, shape index: {}]   ;;  %s7074_s3 = inlined_call_operand.vmem [shape: bf16[3,384,128], index: 3, kind: input, shape index: {}]   ;;  %s7075_s4 = inlined_call_operand.vmem [shape: bf16[512,128], index: 4, kind: output, shape index: {0}]   ;;  %s7076_s5 = inlined_call_operand.vmem [shape: f32[2,2,128], index: 5, kind: output, shape index: {1}]  }
   0x1 LB: > { %s5610_s19 = sadd.s32 4294967295, %s5571_s18   ;;  %p4238_p0 = scmp.ge.s32.totalorder %s5571_s18, 1  ;;  %s5571_s18 = sphi %s5604_s18, %s16_s18  }
   0x2   : > { %p191_p1 = scmp.lt.s32.totalorder %s5571_s18, 3 }
   0x4   : > { %p192_p2 = pnand %p4238_p0, %p191_p1 }
   0x6   : > { %195 = sbr.rel (%p192_p2) target bundleno = 575 (0x23f), region = 36 }
   0xb   : > { %v5391_v0 = vld [vmem:[%s7074_s3 + $0x138] sm:$0xff]   ;;  %s4239_s22 = sshll.u32 %s5610_s19, 5  ;;  %v5393_v2 = vld [vmem:[%s7074_s3 + $0x130] sm:$0xff]   ;;  %v5395_v4 = vld [vmem:[%s7074_s3 + $0x128] sm:$0xff]   ;;  %vm583_vm0 = vcmask 1040384   ;;  %vm1308_vm4 = vcmask 1046528  }
   0xc   : > { %v5392_v1 = vld [vmem:[%s7074_s3 + $0xf8] sm:$0xff]   ;;  %5366 = vmatprep.subr.bf16.mxu1 %v5391_v0  ;;  %4814 = vmatprep.subr.bf16.mxu0 %v5391_v0  ;;  %p224_p3 = scmp.lt.s32.totalorder %s4239_s22, 63  ;;  %v5394_v3 = vld [vmem:[%s7074_s3 + $0xf0] sm:$0xff]   ;;  %v5396_v5 = vld [vmem:[%s7074_s3 + $0xe8] sm:$0xff]   ;;  %vm584_vm1 = vsmask.f32 256 }
   0xd   : > { %5374 = vmatpush3.bf16.msra.mxu1 %v5392_v1  ;;  %4815 = vmatpush3.bf16.msra.mxu0 %v5392_v1  ;;  %v5397_v6 = vld [vmem:[%s7074_s3 + $0x120] sm:$0xff]   ;;  %v5399_v8 = vld [vmem:[%s7074_s3 + $0x118] sm:$0xff]   ;;  %v5401_v10 = vld [vmem:[%s7074_s3 + $0x110] sm:$0xff]   ;;  %vm1099_vm3 = vsmask.f32 7424  ;;  %p235_p4 = scmp.lt.s32.totalorder %s5610_s19, 1 }
   0xe   : > { %5367 = vmatprep.subr.bf16.mxu1 %v5393_v2  ;;  %4816 = vmatprep.subr.bf16.mxu0 %v5393_v2  ;;  %s7130_s22 = smov (!%p224_p3, %s4239_s22), 63  ;;  %v5398_v7 = vld [vmem:[%s7074_s3 + $0xe0] sm:$0xff]   ;;  %v5400_v9 = vld [vmem:[%s7074_s3 + $0xd8] sm:$0xff]   ;;  %v5402_v19 = vld [vmem:[%s7074_s3 + $0xd0] sm:$0xff]  }
   0xf   : > { %s4240_s10 = sshll.u32 %s7130_s22, 2  ;;  %v5662_v12 = vld [vmem:[%s7072_s1] ss:$0 sm:$0xff]  ;;  %v5403_v22 = vld [vmem:[%s7074_s3 + $0x108] sm:$0xff]   ;;  %v5710_v59 = vld [vmem:[%s7074_s3 + $0x178] sm:$0xff]   ;;  %s7132_s19 = smov (!%p235_p4, %s5610_s19), 1 }
  0x10   : > { %s5650_s17 = scalar_lea.vmem %s7071_s0, %s4240_s10  ;;  %v5668_v16 = vld [vmem:[%s7073_s2] ss:$0 sm:$0xff]  ;;  %v5404_v33 = vld [vmem:[%s7074_s3 + $0xc8] sm:$0xff]   ;;  %v5715_v60 = vld [vmem:[%s7074_s3 + $0xb8] sm:$0xff]   ;;  %s6923_s8 = scalar_lea.vmem %s7075_s4, %s4240_s10 }
  0x11   : > { %5375 = vmatpush3.bf16.msra.mxu1 %v5394_v3  ;;  %4817 = vmatpush3.bf16.msra.mxu0 %v5394_v3  ;;  %v4641_v11 = vld [vmem:[%s5650_s17] sm:$0xff]   ;;  %v4784_v27 = vld [vmem:[%s5650_s17 + $0x8] sm:$0xff]   ;;  %v4785_v46 = vld [vmem:[%s5650_s17 + $0x10] sm:$0xff]   ;;  %s4243_s22 = sshll.u32 %s7132_s19, 1 }
  0x12   : > { %5368 = vmatprep.subr.bf16.mxu1 %v5395_v4  ;;  %4818 = vmatprep.subr.bf16.mxu0 %v5395_v4  ;;  %v4642_v13 = vunpack.c.l.bf16 %v4641_v11  ;;  %v4643_v14 = vunpack.c.h.bf16 %v4641_v11  ;;  %v4795_v15 = vld [vmem:[%s5650_s17 + $0x60] sm:$0xff]   ;;  %v4796_v28 = vld [vmem:[%s5650_s17 + $0x68] sm:$0xff]   ;;  %v4646_v31 = vunpack.c.l.bf16 %v4784_v27  ;;  %v4647_v32 = vunpack.c.h.bf16 %v4784_v27  ;;  %v5705_v56 = vld [vmem:[%s5650_s17 + $0x70] sm:$0xff]   ;;  %s238_s11 = scalar_lea.vmem %s7076_s5, %s4243_s22 }
  0x13   : > { %v4690_v17 = vunpack.c.l.bf16 %v4795_v15  ;;  %v4691_v18 = vunpack.c.h.bf16 %v4795_v15  ;;  %v5405_v34 = vld [vmem:[%s7074_s3 + $0x100] sm:$0xff]   ;;  %v4694_v37 = vunpack.c.l.bf16 %v4796_v28  ;;  %v4695_v38 = vunpack.c.h.bf16 %v4796_v28  ;;  %vm5719_vm2 = vmand %vm583_vm0, %vm584_vm1 }
  0x14   : > { %v311_v20 = vmul.f32 %v4642_v13, %v5662_v12  ;;  %v312_v21 = vmul.f32 %v4643_v14, %v5662_v12  ;;  %v313_v41 = vmul.f32 %v4646_v31, %v5662_v12  ;;  %v314_v42 = vmul.f32 %v4647_v32, %v5662_v12  ;;  %v5406_v51 = vld [vmem:[%s7074_s3 + $0xc0] sm:$0xff]  }
  0x15   : > { %5376 = vmatpush3.bf16.msra.mxu1 %v5396_v5  ;;  %4819 = vmatpush3.bf16.msra.mxu0 %v5396_v5  ;;  %v335_v23 = vmul.f32 %v4690_v17, %v5662_v12  ;;  %v336_v24 = vmul.f32 %v4691_v18, %v5662_v12  ;;  %v337_v44 = vmul.f32 %v4694_v37, %v5662_v12  ;;  %v4650_v50 = vunpack.c.l.bf16 %v4785_v46 }
  0x16   : > { %5369 = vmatprep.subr.bf16.mxu1 %v5397_v6  ;;  %4820 = vmatprep.subr.bf16.mxu0 %v5397_v6  ;;  %v350_v25 = vadd.f32 %v5668_v16, %v311_v20  ;;  %v351_v26 = vadd.f32 %v5668_v16, %v312_v21  ;;  %v338_v45 = vmul.f32 %v4695_v38, %v5662_v12  ;;  %v4651_v2 = vunpack.c.h.bf16 %v4785_v46 }
  0x17   : > { %v374_v29 = vadd.f32 %v5668_v16, %v335_v23  ;;  %v375_v30 = vadd.f32 %v5668_v16, %v336_v24  ;;  %v352_v48 = vadd.f32 %v5668_v16, %v313_v41  ;;  %v353_v49 = vadd.f32 %v5668_v16, %v314_v42 }
  0x18   : > { %v382_v35 = vmax.f32 %v350_v25, 0.0  ;;  %v383_v36 = vmax.f32 %v351_v26, 0.0  ;;  %v376_v54 = vadd.f32 %v5668_v16, %v337_v44  ;;  %v377_v55 = vadd.f32 %v5668_v16, %v338_v45 }
  0x19   : > { %5377 = vmatpush3.bf16.msra.mxu1 %v5398_v7  ;;  %4821 = vmatpush3.bf16.msra.mxu0 %v5398_v7  ;;  %v406_v39 = vmax.f32 %v374_v29, 0.0  ;;  %v407_v40 = vmax.f32 %v375_v30, 0.0  ;;  %v384_v61 = vmax.f32 %v352_v48, 0.0  ;;  %v385_v62 = vmax.f32 %v353_v49, 0.0  ;;  %v5750_v48 = vld [vmem:[%s5650_s17 + $0x20] sm:$0xff]  }
  0x1a   : > { %5370 = vmatprep.subr.bf16.mxu1 %v5399_v8  ;;  %4822 = vmatprep.subr.bf16.mxu0 %v5399_v8  ;;  %v414_v43 = vpack.c.bf16 %v383_v36, %v382_v35  ;;  %v408_v0 = vmax.f32 %v376_v54, 0.0  ;;  %v409_v1 = vmax.f32 %v377_v55, 0.0  ;;  %v315_v6 = vmul.f32 %v4650_v50, %v5662_v12 }
  0x1b   : > { %v426_v47 = vpack.c.bf16 %v407_v40, %v406_v39  ;;  %v415_v5 = vpack.c.bf16 %v385_v62, %v384_v61  ;;  %v4698_v7 = vunpack.c.l.bf16 %v5705_v56  ;;  %v316_v11 = vmul.f32 %v4651_v2, %v5662_v12  ;;  %v4786_v39 = vld [vmem:[%s5650_s17 + $0x18] sm:$0xff]  }
  0x1c   : > { %v440_v52 = vshrl.u32 %v414_v43, 16  ;;  %v443_v53 = vshll.u32 %v414_v43, 16  ;;  %v354_v29 = vadd.f32 %v5668_v16, %v315_v6  ;;  %v4699_v31 = vunpack.c.h.bf16 %v5705_v56  ;;  %v4798_v40 = vld [vmem:[%s5650_s17 + $0x78] sm:$0xff]  }
  0x1d   : > { %5378 = vmatpush3.bf16.msra.mxu1 %v5400_v9  ;;  %4823 = vmatpush3.bf16.msra.mxu0 %v5400_v9  ;;  %v524_v57 = vshrl.u32 %v426_v47, 16  ;;  %v527_v58 = vshll.u32 %v426_v47, 16  ;;  %v450_v23 = vshll.u32 %v415_v5, 16  ;;  %v355_v30 = vadd.f32 %v5668_v16, %v316_v11 }
  0x1e   : > { %5371 = vmatprep.subr.bf16.mxu1 %v5401_v10  ;;  %4824 = vmatprep.subr.bf16.mxu0 %v5401_v10  ;;  %v442_v63 = vrot.slane %v440_v52, 7  ;;  %v427_v10 = vpack.c.bf16 %v409_v1, %v408_v0  ;;  %v339_v35 = vmul.f32 %v4698_v7, %v5662_v12  ;;  %v386_v37 = vmax.f32 %v354_v29, 0.0 }
  0x1f   : > { %v526_v4 = vrot.slane %v524_v57, 7  ;;  %v387_v38 = vmax.f32 %v355_v30, 0.0  ;;  %v340_v44 = vmul.f32 %v4699_v31, %v5662_v12  ;;  %v4654_v57 = vunpack.c.l.bf16 %v4786_v39  ;;  %v5420_v30 = vld [vmem:[%s7074_s3 + $0xb0] sm:$0xff]  }
  0x20   : > { %v445_v8 = vor.u32 %v443_v53, %v442_v63  ;;  %v602_v9 = vsel %vm5719_vm2, %v442_v63, 0  ;;  %v531_v27 = vshrl.u32 %v427_v10, 16  ;;  %v534_v28 = vshll.u32 %v427_v10, 16 }
  0x21   : > { %5379 = vmatpush3.bf16.msra.mxu1 %v5402_v19  ;;  %4825 = vmatpush3.bf16.msra.mxu0 %v5402_v19  ;;  %v4248_v13 = vcombine.low %v602_v9, %v602_v9  ;;  %v529_v14 = vor.u32 %v527_v58, %v526_v4  ;;  %v614_v15 = vsel %vm5719_vm2, %v526_v4, 0  ;;  %v447_v19 = vshrl.u32 %v415_v5, 16 }
  0x22   : > { %5372 = vmatprep.subr.bf16.mxu1 %v5403_v22  ;;  %4826 = vmatprep.subr.bf16.mxu0 %v5403_v22  ;;  %v586_v17 = vsel %vm5719_vm2, 0, %v445_v8  ;;  %v4296_v18 = vcombine.low %v614_v15, %v614_v15  ;;  %v378_v52 = vadd.f32 %v5668_v16, %v339_v35  ;;  %v379_v53 = vadd.f32 %v5668_v16, %v340_v44 }
  0x23   : > { %v4246_v20 = vcombine.low %v586_v17, %v586_v17  ;;  %v4247_v21 = vcombine.high %v586_v17, %v586_v17  ;;  %845 = vst [vmem:[#allocation2 + $0x18] sm:$0xf] %v4248_v13  ;;  %v598_v22 = vsel %vm5719_vm2, 0, %v529_v14  ;;  %v449_v26 = vrot.slane %v447_v19, 7 }
  0x24   : > { %v4294_v24 = vcombine.low %v598_v22, %v598_v22  ;;  %v4295_v25 = vcombine.high %v598_v22, %v598_v22  ;;  %893 = vst [vmem:[#allocation2 + $0xd8] sm:$0xf] %v4296_v18  ;;  %v4655_v58 = vunpack.c.h.bf16 %v4786_v39  ;;  %v4702_v63 = vunpack.c.l.bf16 %v4798_v40 }
  0x25   : > { %5380 = vmatpush3.bf16.msra.mxu1 %v5404_v33  ;;  %4827 = vmatpush3.bf16.msra.mxu0 %v5404_v33  ;;  %843 = vst [vmem:[#allocation2 + $0x10] sm:$0xf] %v4246_v20  ;;  %844 = vst [vmem:[#allocation2 + $0x14] sm:$0xf] %v4247_v21  ;;  %v452_v32 = vor.u32 %v450_v23, %v449_v26  ;;  %v603_v33 = vsel %vm5719_vm2, %v449_v26, 0  ;;  %v4703_v0 = vunpack.c.h.bf16 %v4798_v40  ;;  %v4658_v1 = vunpack.c.l.bf16 %v5750_v48 }
  0x26   : > { %5373 = vmatprep.subr.bf16.mxu1 %v5405_v34  ;;  %4828 = vmatprep.subr.bf16.mxu0 %v5405_v34  ;;  %891 = vst [vmem:[#allocation2 + $0xd0] sm:$0xf] %v4294_v24  ;;  %892 = vst [vmem:[#allocation2 + $0xd4] sm:$0xf] %v4295_v25  ;;  %v533_v34 = vrot.slane %v531_v27, 7  ;;  %v4252_v36 = vcombine.low %v603_v33, %v603_v33  ;;  %v317_v5 = vmul.f32 %v4654_v57, %v5662_v12 }
  0x27   : > { %v587_v41 = vsel %vm5719_vm2, 0, %v452_v32  ;;  %v318_v6 = vmul.f32 %v4655_v58, %v5662_v12  ;;  %v4659_v7 = vunpack.c.h.bf16 %v5750_v48  ;;  %v410_v24 = vmax.f32 %v378_v52, 0.0  ;;  %v5438_v48 = vld [vmem:[%s7074_s3 + $0xa0] sm:$0xff]  }
  0x28   : > { %v536_v42 = vor.u32 %v534_v28, %v533_v34  ;;  %v615_v43 = vsel %vm5719_vm2, %v533_v34, 0  ;;  %v4250_v45 = vcombine.low %v587_v41, %v587_v41  ;;  %v4251_v46 = vcombine.high %v587_v41, %v587_v41  ;;  %849 = vst [vmem:[#allocation2 + $0x28] sm:$0xf] %v4252_v36  ;;  %v5413_v34 = vld [vmem:[%s7074_s3 + $0x170] sm:$0xff]  }
  0x29   : > { %5381 = vmatpush3.bf16.msra.mxu1 %v5406_v51  ;;  %4829 = vmatpush3.bf16.msra.mxu0 %v5406_v51  ;;  %v4300_v47 = vcombine.low %v615_v43, %v615_v43  ;;  %v416_v51 = vpack.c.bf16 %v387_v38, %v386_v37  ;;  %v356_v21 = vadd.f32 %v5668_v16, %v317_v5  ;;  %v411_v25 = vmax.f32 %v379_v53, 0.0 }
  0x2a   : > { %5222 = vmatprep.subr.bf16.mxu1 %v5710_v59  ;;  %5270 = vmatprep.subr.bf16.mxu0 %v5715_v60  ;;  %v5752_v49 = vld [vmem:[#allocation2 + $0x18] ss:$0 sps:$4 sm:$0xff]   ;;  %v599_v50 = vsel %vm5719_vm2, 0, %v536_v42  ;;  %847 = vst [vmem:[#allocation2 + $0x20] sm:$0xf] %v4250_v45  ;;  %v357_v22 = vadd.f32 %v5668_v16, %v318_v6  ;;  %v341_v26 = vmul.f32 %v4702_v63, %v5662_v12 }
  0x2b   : > { %v5410_v54 = vld [vmem:[#allocation2 + $0xd8] ss:$0 sps:$4 sm:$0xff]   ;;  %848 = vst [vmem:[#allocation2 + $0x24] sm:$0xf] %v4251_v46  ;;  %v4298_v55 = vcombine.low %v599_v50, %v599_v50  ;;  %v4299_v56 = vcombine.high %v599_v50, %v599_v50  ;;  %897 = vst [vmem:[#allocation2 + $0xe8] sm:$0xf] %v4300_v47  ;;  %v342_v32 = vmul.f32 %v4703_v0, %v5662_v12 }
  0x2c   : > { %v5758_v61 = vld [vmem:[#allocation2 + $0x10] sm:$0xff]   ;;  %v1621_v62 = vshll.u32 %v5752_v49, 16  ;;  %v1765_v4 = vshll.u32 %v5410_v54, 16  ;;  %v454_v11 = vshrl.u32 %v416_v51, 16  ;;  %v457_v17 = vshll.u32 %v416_v51, 16  ;;  %v5432_v0 = vld [vmem:[%s7074_s3 + $0xa8] sm:$0xff]  }
  0x2d   : > { %v5409_v2 = vld [vmem:[#allocation2 + $0xd0] sm:$0xff]   ;;  %895 = vst [vmem:[#allocation2 + $0xe0] sm:$0xf] %v4298_v55  ;;  %896 = vst [vmem:[#allocation2 + $0xe4] sm:$0xf] %v4299_v56  ;;  %v1614_v8 = vshrl.u32 %v5758_v61, 16  ;;  %v428_v37 = vpack.c.bf16 %v411_v25, %v410_v24  ;;  %v319_v5 = vmul.f32 %v4658_v1, %v5662_v12 }
  0x2e   : > { %v1616_v9 = vshll.u32 %v5758_v61, 16  ;;  %v1623_v10 = vrot.slane %v1621_v62, 1  ;;  %v1758_v13 = vshrl.u32 %v5409_v2, 16  ;;  %v1760_v14 = vshll.u32 %v5409_v2, 16 }
  0x2f   : > { %v1767_v15 = vrot.slane %v1765_v4, 1  ;;  %v5767_v19 = vld [vmem:[#allocation2 + $0x28] ss:$0 sps:$4 sm:$0xff]   ;;  %v456_v20 = vrot.slane %v454_v11, 7  ;;  %v388_v38 = vmax.f32 %v356_v21, 0.0  ;;  %v538_v56 = vshrl.u32 %v428_v37, 16 }
  0x30   : > { %v1618_v18 = vrot.slane %v1616_v9, 1  ;;  %v1762_v23 = vrot.slane %v1760_v14, 1  ;;  %v1633_v29 = vshll.u32 %v5767_v19, 16  ;;  %v541_v62 = vshll.u32 %v428_v37, 16  ;;  %v5419_v11 = vld [vmem:[%s7074_s3 + $0x160] sm:$0xff]  }
  0x31   : > { %v459_v31 = vor.u32 %v457_v17, %v456_v20  ;;  %v604_v36 = vsel %vm5719_vm2, %v456_v20, 0  ;;  %v389_v63 = vmax.f32 %v357_v22, 0.0  ;;  %v380_v4 = vadd.f32 %v5668_v16, %v341_v26 }
  0x32   : > { %v1619_v27 = vor.u32 %v1618_v18, %v1614_v8  ;;  %v5772_v28 = vld [vmem:[#allocation2 + $0x20] sm:$0xff]   ;;  %v1763_v33 = vor.u32 %v1762_v23, %v1758_v13  ;;  %v5417_v35 = vld [vmem:[#allocation2 + $0xe8] ss:$0 sps:$4 sm:$0xff]   ;;  %v1635_v42 = vrot.slane %v1633_v29, 1  ;;  %v4256_v47 = vcombine.low %v604_v36, %v604_v36 }
  0x33   : > { %v1626_v40 = vshrl.u32 %v5772_v28, 16  ;;  %v1628_v41 = vshll.u32 %v5772_v28, 16  ;;  %v1777_v45 = vshll.u32 %v5417_v35, 16  ;;  %v588_v46 = vsel %vm5719_vm2, 0, %v459_v31  ;;  %v5425_v31 = vld [vmem:[%s7074_s3 + $0x158] sm:$0xff]  }
  0x34   : > { %v1624_v39 = vsel %vm1099_vm3, %v1619_v27, %v1623_v10  ;;  %v5787_v43 = vld [vmem:[#allocation2 + $0xe0] sm:$0xff]   ;;  %v1768_v44 = vsel %vm1099_vm3, %v1763_v33, %v1767_v15  ;;  %v4254_v53 = vcombine.low %v588_v46, %v588_v46  ;;  %v4255_v55 = vcombine.high %v588_v46, %v588_v46  ;;  %853 = vst [vmem:[#allocation2 + $0x38] sm:$0xf] %v4256_v47  ;;  %v4788_v47 = vld [vmem:[%s5650_s17 + $0x28] sm:$0xff]  }
  0x35   : > { %2110 = vmatprep.mubr.bf16.mxu0 %v1624_v39  ;;  %2206 = vmatprep.mubr.bf16.mxu1 %v1768_v44  ;;  %v1630_v50 = vrot.slane %v1628_v41, 1  ;;  %v1770_v51 = vshrl.u32 %v5787_v43, 16  ;;  %v1772_v52 = vshll.u32 %v5787_v43, 16  ;;  %v1779_v54 = vrot.slane %v1777_v45, 1 }
  0x36   : > { %2111 = vmatmul.mubr.bf16.vlgmr.msra.gmra.mxu0 %v5758_v61  ;;  %2207 = vmatmul.mubr.bf16.vlgmr.msra.gmra.mxu1 %v5409_v2  ;;  %851 = vst [vmem:[#allocation2 + $0x30] sm:$0xf] %v4254_v53  ;;  %852 = vst [vmem:[#allocation2 + $0x34] sm:$0xf] %v4255_v55  ;;  %v540_v2 = vrot.slane %v538_v56, 7  ;;  %v417_v9 = vpack.c.bf16 %v389_v63, %v388_v38  ;;  %v320_v10 = vmul.f32 %v4659_v7, %v5662_v12 }
  0x37   : > { %5271 = vmatpush3.bf16.msra.mxu0 %v5715_v60  ;;  %5223 = vmatpush3.bf16.msra.mxu1 %v5710_v59  ;;  %v1631_v57 = vor.u32 %v1630_v50, %v1626_v40  ;;  %v1774_v58 = vrot.slane %v1772_v52, 1  ;;  %v5418_v60 = vld [vmem:[%s7074_s3 + $0x168] sm:$0xff]   ;;  %v381_v59 = vadd.f32 %v5668_v16, %v342_v32  ;;  %v412_v1 = vmax.f32 %v380_v4, 0.0  ;;  %v5426_v50 = vld [vmem:[%s7074_s3 + $0x150] sm:$0xff]  }
  0x38   : > { %5272 = vmatprep.subr.bf16.mxu0 %v5420_v30  ;;  %5224 = vmatprep.subr.bf16.mxu1 %v5413_v34  ;;  %v543_v13 = vor.u32 %v541_v62, %v540_v2  ;;  %v616_v14 = vsel %vm5719_vm2, %v540_v2, 0  ;;  %v461_v20 = vshrl.u32 %v417_v9, 16  ;;  %v464_v21 = vshll.u32 %v417_v9, 16 }
  0x39   : > { %v1636_v6 = vsel %vm1099_vm3, %v1631_v57, %v1635_v42  ;;  %v1775_v8 = vor.u32 %v1774_v58, %v1770_v51  ;;  %v413_v15 = vmax.f32 %v381_v59, 0.0  ;;  %v4304_v18 = vcombine.low %v616_v14, %v616_v14  ;;  %v5452_v58 = vld [vmem:[%s7074_s3 + $0x90] sm:$0xff]  }
  0x3a   : > { %2118 = vmatprep.mubr.bf16.mxu0 %v1636_v6  ;;  %v600_v7 = vsel %vm5719_vm2, 0, %v543_v13  ;;  %v358_v23 = vadd.f32 %v5668_v16, %v319_v5  ;;  %v463_v27 = vrot.slane %v461_v20, 7  ;;  %v359_v29 = vadd.f32 %v5668_v16, %v320_v10  ;;  %v5431_v10 = vld [vmem:[%s7074_s3 + $0x148] sm:$0xff]  }
  0x3b   : > { %5273 = vmatpush3.bf16.msra.mxu0 %v5420_v30  ;;  %5225 = vmatpush3.bf16.msra.mxu1 %v5413_v34  ;;  %v1780_v17 = vsel %vm1099_vm3, %v1775_v8, %v1779_v54  ;;  %v429_v22 = vpack.c.bf16 %v413_v15, %v412_v1  ;;  %v5825_v24 = vld [vmem:[#allocation2 + $0x38] ss:$0 sps:$4 sm:$0xff]   ;;  %v4302_v25 = vcombine.low %v600_v7, %v600_v7  ;;  %v1821_v35 = vrot.slane %v5758_v61, 1  ;;  %v5853_v54 = vld [vmem:[%s5650_s17 + $0x30] sm:$0xff]  }
  0x3c   : > { %5274 = vmatprep.subr.bf16.mxu0 %v5432_v0  ;;  %2214 = vmatprep.mubr.bf16.mxu1 %v1780_v17  ;;  %v4303_v26 = vcombine.high %v600_v7, %v600_v7  ;;  %901 = vst [vmem:[#allocation2 + $0xf8] sm:$0xf] %v4304_v18  ;;  %v5447_v30 = vld [vmem:[%s7074_s3 + $0x98] sm:$0xff]   ;;  %v390_v34 = vmax.f32 %v358_v23, 0.0  ;;  %v1645_v37 = vshll.u32 %v5825_v24, 16  ;;  %v466_v38 = vor.u32 %v464_v21, %v463_v27  ;;  %v5465_v18 = vld [vmem:[%s7074_s3 + $0x88] sm:$0xff]  }
  0x3d   : > { %5226 = vmatprep.subr.bf16.mxu1 %v5418_v60  ;;  %v545_v32 = vshrl.u32 %v429_v22, 16  ;;  %v548_v33 = vshll.u32 %v429_v22, 16  ;;  %v5836_v36 = vld [vmem:[#allocation2 + $0x30] sm:$0xff]   ;;  %899 = vst [vmem:[#allocation2 + $0xf0] sm:$0xf] %v4302_v25  ;;  %v605_v39 = vsel %vm5719_vm2, %v463_v27, 0  ;;  %v4662_v2 = vunpack.c.l.bf16 %v4788_v47 }
  0x3e   : > { %2119 = vmatmul.mubr.bf16.gmra.mxu0 %v5772_v28  ;;  %2215 = vmatmul.mubr.bf16.gmra.mxu1 %v5787_v43  ;;  %900 = vst [vmem:[#allocation2 + $0xf4] sm:$0xf] %v4303_v26  ;;  %v391_v40 = vmax.f32 %v359_v29, 0.0  ;;  %v4260_v41 = vcombine.low %v605_v39, %v605_v39  ;;  %v1822_v61 = vrot.slane %v5752_v49, 1  ;;  %v1638_v43 = vshrl.u32 %v5836_v36, 16  ;;  %v5883_v22 = vld [vmem:[%s5650_s17 + $0x38] sm:$0xff]  }
  0x3f   : > { %5275 = vmatpush3.bf16.msra.mxu0 %v5432_v0  ;;  %5227 = vmatpush3.bf16.msra.mxu1 %v5418_v60  ;;  %v547_v42 = vrot.slane %v545_v32, 7  ;;  %v1640_v44 = vshll.u32 %v5836_v36, 16  ;;  %v1647_v45 = vrot.slane %v1645_v37, 1  ;;  %v589_v46 = vsel %vm5719_vm2, 0, %v466_v38  ;;  %v5468_v39 = vld [vmem:[%s7074_s3 + $0x80] sm:$0xff]  }
  0x40   : > { %5276 = vmatprep.subr.bf16.mxu0 %v5438_v48  ;;  %5228 = vmatprep.subr.bf16.mxu1 %v5419_v11  ;;  %v4258_v51 = vcombine.low %v589_v46, %v589_v46  ;;  %v4259_v52 = vcombine.high %v589_v46, %v589_v46  ;;  %857 = vst [vmem:[#allocation2 + $0x48] sm:$0xf] %v4260_v41  ;;  %v1824_v60 = vrot.slane %v5772_v28, 1  ;;  %v4666_v14 = vunpack.c.l.bf16 %v5853_v54 }
  0x41   : > { %v550_v53 = vor.u32 %v548_v33, %v547_v42  ;;  %v617_v49 = vsel %vm5719_vm2, %v547_v42, 0  ;;  %v1642_v55 = vrot.slane %v1640_v44, 1  ;;  %v418_v57 = vpack.c.bf16 %v391_v40, %v390_v34 }
  0x42   : > { %v4308_v56 = vcombine.low %v617_v49, %v617_v49  ;;  %855 = vst [vmem:[#allocation2 + $0x40] sm:$0xf] %v4258_v51  ;;  %856 = vst [vmem:[#allocation2 + $0x44] sm:$0xf] %v4259_v52  ;;  %v5863_v0 = vsel %vm1308_vm4, %v1821_v35, %v1822_v61  ;;  %v321_v13 = vmul.f32 %v4662_v2, %v5662_v12  ;;  %v1825_v17 = vrot.slane %v5767_v19, 1 }
  0x43   : > { %5277 = vmatpush3.bf16.msra.mxu0 %v5438_v48  ;;  %5229 = vmatpush3.bf16.msra.mxu1 %v5419_v11  ;;  %v5858_v62 = vld [vmem:[#allocation2 + $0xf8] ss:$0 sps:$4 sm:$0xff]   ;;  %v601_v63 = vsel %vm5719_vm2, 0, %v550_v53  ;;  %v1643_v4 = vor.u32 %v1642_v55, %v1638_v43  ;;  %v468_v6 = vshrl.u32 %v418_v57, 16  ;;  %v4663_v11 = vunpack.c.h.bf16 %v4788_v47 }
  0x44   : > { %5278 = vmatprep.subr.bf16.mxu0 %v5447_v30  ;;  %5230 = vmatprep.subr.bf16.mxu1 %v5425_v31  ;;  %v4306_v59 = vcombine.low %v601_v63, %v601_v63  ;;  %v4307_v5 = vcombine.high %v601_v63, %v601_v63  ;;  %905 = vst [vmem:[#allocation2 + $0x108] sm:$0xf] %v4308_v56  ;;  %v1789_v9 = vshll.u32 %v5858_v62, 16  ;;  %v471_v15 = vshll.u32 %v418_v57, 16 }
  0x45   : > { %v5866_v8 = vld [vmem:[#allocation2 + $0xf0] sm:$0xff]   ;;  %v1648_v28 = vsel %vm1099_vm3, %v1643_v4, %v1647_v45  ;;  %v470_v1 = vrot.slane %v468_v6, 7  ;;  %v322_v21 = vmul.f32 %v4663_v11, %v5662_v12  ;;  %v5891_v26 = vsel %vm1308_vm4, %v1824_v60, %v1825_v17 }
  0x46   : > { %903 = vst [vmem:[#allocation2 + $0x100] sm:$0xf] %v4306_v59  ;;  %904 = vst [vmem:[#allocation2 + $0x104] sm:$0xf] %v4307_v5  ;;  %2126 = vmatprep.mubr.bf16.mxu0 %v1648_v28  ;;  %v1782_v20 = vshrl.u32 %v5866_v8, 16  ;;  %v1784_v48 = vshll.u32 %v5866_v8, 16  ;;  %v360_v27 = vadd.f32 %v5668_v16, %v321_v13  ;;  %v4667_v35 = vunpack.c.h.bf16 %v5853_v54 }
  0x47   : > { %5279 = vmatpush3.bf16.msra.mxu0 %v5447_v30  ;;  %5231 = vmatpush3.bf16.msra.mxu1 %v5425_v31  ;;  %v1791_v7 = vrot.slane %v1789_v9, 1  ;;  %v5886_v23 = vld [vmem:[#allocation2 + $0x48] ss:$0 sps:$4 sm:$0xff]   ;;  %v473_v19 = vor.u32 %v471_v15, %v470_v1  ;;  %v606_v25 = vsel %vm5719_vm2, %v470_v1, 0  ;;  %v5433_v30 = vld [vmem:[%s7074_s3 + $0x140] sm:$0xff]   ;;  %v361_v32 = vadd.f32 %v5668_v16, %v322_v21  ;;  %v5436_v54 = vld [vmem:[%s7074_s3 + $0x78] sm:$0xff]  }
  0x48   : > { %5280 = vmatprep.subr.bf16.mxu0 %v5452_v58  ;;  %5232 = vmatprep.subr.bf16.mxu1 %v5426_v50  ;;  %v1786_v29 = vrot.slane %v1784_v48, 1  ;;  %v4264_v31 = vcombine.low %v606_v25, %v606_v25  ;;  %v1657_v34 = vshll.u32 %v5886_v23, 16  ;;  %v323_v37 = vmul.f32 %v4666_v14, %v5662_v12  ;;  %v5939_v14 = vld [vmem:[%s5650_s17 + $0x40] sm:$0xff]  }
  0x49   : > { %2127 = vmatmul.mubr.bf16.gmra.mxu0 %v5836_v36  ;;  %v5898_v33 = vld [vmem:[#allocation2 + $0x40] sm:$0xff]   ;;  %v4670_v38 = vunpack.c.l.bf16 %v5883_v22  ;;  %v590_v42 = vsel %vm5719_vm2, 0, %v473_v19  ;;  %v392_v61 = vmax.f32 %v360_v27, 0.0  ;;  %v4671_v43 = vunpack.c.h.bf16 %v5883_v22 }
  0x4a   : > { %v1787_v40 = vor.u32 %v1786_v29, %v1782_v20  ;;  %861 = vst [vmem:[#allocation2 + $0x58] sm:$0xf] %v4264_v31  ;;  %v1650_v44 = vshrl.u32 %v5898_v33, 16  ;;  %v1652_v45 = vshll.u32 %v5898_v33, 16  ;;  %v1659_v46 = vrot.slane %v1657_v34, 1 }
  0x4b   : > { %5281 = vmatpush3.bf16.msra.mxu0 %v5452_v58  ;;  %5233 = vmatpush3.bf16.msra.mxu1 %v5426_v50  ;;  %v5907_v41 = vld [vmem:[#allocation2 + $0x108] ss:$0 sps:$4 sm:$0xff]   ;;  %v4262_v47 = vcombine.low %v590_v42, %v590_v42  ;;  %v5476_v50 = vld [vmem:[%s7074_s3 + $0x1f8] sm:$0xff]   ;;  %v4263_v49 = vcombine.high %v590_v42, %v590_v42  ;;  %v324_v55 = vmul.f32 %v4667_v35, %v5662_v12  ;;  %v393_v57 = vmax.f32 %v361_v32, 0.0  ;;  %v5950_v19 = vld [vmem:[%s7073_s2] ss:$0 sm:$0xff] }
  0x4c   : > { %5282 = vmatprep.subr.bf16.mxu0 %v5465_v18  ;;  %5234 = vmatprep.subr.bf16.mxu1 %v5431_v10  ;;  %v1792_v51 = vsel %vm1099_vm3, %v1787_v40, %v1791_v7  ;;  %v1801_v53 = vshll.u32 %v5907_v41, 16  ;;  %v1654_v56 = vrot.slane %v1652_v45, 1  ;;  %v1827_v58 = vrot.slane %v5836_v36, 1  ;;  %v4792_v40 = vld [vmem:[%s5650_s17 + $0x48] sm:$0xff]  }
  0x4d   : > { %v5918_v52 = vld [vmem:[#allocation2 + $0x100] sm:$0xff]   ;;  %2222 = vmatprep.mubr.bf16.mxu1 %v1792_v51  ;;  %859 = vst [vmem:[#allocation2 + $0x50] sm:$0xf] %v4262_v47  ;;  %v1828_v63 = vrot.slane %v5825_v24, 1  ;;  %860 = vst [vmem:[#allocation2 + $0x54] sm:$0xf] %v4263_v49  ;;  %v419_v6 = vpack.c.bf16 %v393_v57, %v392_v61  ;;  %v363_v11 = vadd.f32 %v5668_v16, %v324_v55 }
  0x4e   : > { %2223 = vmatmul.mubr.bf16.gmra.mxu1 %v5866_v8  ;;  %v1794_v60 = vshrl.u32 %v5918_v52, 16  ;;  %v1796_v2 = vshll.u32 %v5918_v52, 16  ;;  %v1803_v4 = vrot.slane %v1801_v53, 1  ;;  %v1830_v59 = vrot.slane %v5898_v33, 1  ;;  %v5437_v53 = vld [vmem:[%s7074_s3 + $0x38] sm:$0xff]  }
  0x4f   : > { %5283 = vmatpush3.bf16.msra.mxu0 %v5465_v18  ;;  %5235 = vmatpush3.bf16.msra.mxu1 %v5431_v10  ;;  %v1655_v5 = vor.u32 %v1654_v56, %v1650_v44  ;;  %v5932_v9 = vsel %vm1308_vm4, %v1827_v58, %v1828_v63  ;;  %v1831_v36 = vrot.slane %v5886_v23, 1  ;;  %v362_v10 = vadd.f32 %v5668_v16, %v323_v37  ;;  %v5441_v56 = vld [vmem:[%s7074_s3 + $0x70] sm:$0xff]  }
  0x50   : > { %5236 = vmatprep.subr.bf16.mxu1 %v5433_v30  ;;  %5284 = vmatprep.subr.bf16.mxu0 %v5468_v39  ;;  %v1798_v24 = vrot.slane %v1796_v2, 1  ;;  %v325_v13 = vmul.f32 %v4670_v38, %v5662_v12  ;;  %v475_v15 = vshrl.u32 %v419_v6, 16  ;;  %v478_v17 = vshll.u32 %v419_v6, 16  ;;  %v5982_v2 = vld [vmem:[%s5650_s17 + $0x50] sm:$0xff]  }
  0x51   : > { %v1660_v28 = vsel %vm1099_vm3, %v1655_v5, %v1659_v46  ;;  %v5435_v1 = vld [vmem:[#allocation2 + $0x58] ss:$0 sps:$4 sm:$0xff]   ;;  %v5943_v18 = vsel %vm1308_vm4, %v1830_v59, %v1831_v36  ;;  %v394_v48 = vmax.f32 %v362_v10, 0.0  ;;  %v395_v16 = vmax.f32 %v363_v11, 0.0 }
  0x52   : > { %2134 = vmatprep.mubr.bf16.mxu0 %v1660_v28  ;;  %v1799_v20 = vor.u32 %v1798_v24, %v1794_v60  ;;  %v326_v7 = vmul.f32 %v4671_v43, %v5662_v12  ;;  %v1669_v21 = vshll.u32 %v5435_v1, 16  ;;  %v477_v22 = vrot.slane %v475_v15, 7  ;;  %v5989_v11 = vld [vmem:[%s5650_s17 + $0x58] sm:$0xff]  }
  0x53   : > { %5285 = vmatpush3.bf16.msra.mxu0 %v5468_v39  ;;  %5237 = vmatpush3.bf16.msra.mxu1 %v5433_v30  ;;  %v1834_v23 = vrot.slane %v5435_v1, 1  ;;  %v364_v25 = vadd.f32 %v5950_v19, %v325_v13  ;;  %v420_v29 = vpack.c.bf16 %v395_v16, %v394_v48  ;;  %v4674_v12 = vunpack.c.l.bf16 %v5939_v14 }
  0x54   : > { %5086 = vmatprep.subr.bf16.mxu0 %v5476_v50  ;;  %4950 = vmatprep.subr.bf16.mxu1 %v5436_v54  ;;  %v1804_v27 = vsel %vm1099_vm3, %v1799_v20, %v1803_v4  ;;  %v365_v30 = vadd.f32 %v5950_v19, %v326_v7  ;;  %v5434_v31 = vld [vmem:[#allocation2 + $0x50] sm:$0xff]   ;;  %v1671_v32 = vrot.slane %v1669_v21, 1  ;;  %v607_v34 = vsel %vm5719_vm2, %v477_v22, 0  ;;  %v5973_v54 = vld [vmem:[%s7072_s1] ss:$0 sm:$0xff] }
  0x55   : > { %2135 = vmatmul.mubr.bf16.gmra.mxu0 %v5898_v33  ;;  %2230 = vmatprep.mubr.bf16.mxu1 %v1804_v27  ;;  %v480_v33 = vor.u32 %v478_v17, %v477_v22  ;;  %v396_v35 = vmax.f32 %v364_v25, 0.0  ;;  %v4268_v37 = vcombine.low %v607_v34, %v607_v34  ;;  %v482_v38 = vshrl.u32 %v420_v29, 16  ;;  %v5442_v7 = vld [vmem:[%s7074_s3 + $0x30] sm:$0xff]   ;;  %v5445_v25 = vld [vmem:[%s7074_s3 + $0x68] sm:$0xff]  }
  0x56   : > { %2231 = vmatmul.mubr.bf16.gmra.mxu1 %v5918_v52  ;;  %v485_v39 = vshll.u32 %v420_v29, 16  ;;  %v1662_v42 = vshrl.u32 %v5434_v31, 16  ;;  %v1664_v61 = vshll.u32 %v5434_v31, 16  ;;  %v1833_v44 = vrot.slane %v5434_v31, 1 }
  0x57   : > { %5238 = vmatprep.mubr.bf16.mxu1 %v5863_v0  ;;  %v591_v43 = vsel %vm5719_vm2, 0, %v480_v33  ;;  %865 = vst [vmem:[#allocation2 + $0x68] sm:$0xf] %v4268_v37  ;;  %v484_v47 = vrot.slane %v482_v38, 7  ;;  %v397_v50 = vmax.f32 %v365_v30, 0.0  ;;  %v4675_v0 = vunpack.c.h.bf16 %v5939_v14  ;;  %v5446_v33 = vld [vmem:[%s7074_s3 + $0x28] sm:$0xff]  }
  0x58   : > { %v4266_v45 = vcombine.low %v591_v43, %v591_v43  ;;  %v4267_v46 = vcombine.high %v591_v43, %v591_v43  ;;  %v1666_v51 = vrot.slane %v1664_v61, 1  ;;  %v5967_v49 = vsel %vm1308_vm4, %v1833_v44, %v1834_v23  ;;  %v5450_v38 = vld [vmem:[%s7074_s3 + $0x60] sm:$0xff]  }
  0x59   : > { %v327_v55 = vmul.f32 %v5973_v54, %v4674_v12  ;;  %v487_v57 = vor.u32 %v485_v39, %v484_v47  ;;  %v608_v58 = vsel %vm5719_vm2, %v484_v47, 0  ;;  %v421_v63 = vpack.c.bf16 %v397_v50, %v396_v35 }
  0x5a   : > { %863 = vst [vmem:[#allocation2 + $0x60] sm:$0xf] %v4266_v45  ;;  %864 = vst [vmem:[#allocation2 + $0x64] sm:$0xf] %v4267_v46  ;;  %v4678_v60 = vunpack.c.l.bf16 %v4792_v40  ;;  %v1667_v4 = vor.u32 %v1666_v51, %v1662_v42  ;;  %v4272_v59 = vcombine.low %v608_v58, %v608_v58  ;;  %v328_v5 = vmul.f32 %v5973_v54, %v4675_v0 }
  0x5b   : > { %v592_v6 = vsel %vm5719_vm2, 0, %v487_v57  ;;  %v489_v36 = vshrl.u32 %v421_v63, 16  ;;  %v492_v24 = vshll.u32 %v421_v63, 16  ;;  %v366_v10 = vadd.f32 %v5950_v19, %v327_v55  ;;  %v5451_v55 = vld [vmem:[%s7074_s3 + $0x20] sm:$0xff]  }
  0x5c   : > { %v1672_v13 = vsel %vm1099_vm3, %v1667_v4, %v1671_v32  ;;  %v4270_v14 = vcombine.low %v592_v6, %v592_v6  ;;  %v4271_v28 = vcombine.high %v592_v6, %v592_v6  ;;  %869 = vst [vmem:[#allocation2 + $0x78] sm:$0xf] %v4272_v59  ;;  %v367_v1 = vadd.f32 %v5950_v19, %v328_v5 }
  0x5d   : > { %2142 = vmatprep.mubr.bf16.mxu0 %v1672_v13  ;;  %v491_v15 = vrot.slane %v489_v36, 7  ;;  %v398_v17 = vmax.f32 %v366_v10, 0.0  ;;  %v4679_v20 = vunpack.c.h.bf16 %v4792_v40  ;;  %v329_v48 = vmul.f32 %v5973_v54, %v4678_v60  ;;  %v5455_v10 = vld [vmem:[%s7074_s3 + $0x58] sm:$0xff]  }
  0x5e   : > { %5239 = vmatmul.mubr.bf16.vlgmr.msra.gmra.mxu1 %v5891_v26  ;;  %2143 = vmatmul.mubr.bf16.gmra.mxu0 %v5434_v31  ;;  %v5440_v16 = vld [vmem:[#allocation2 + $0x68] ss:$0 sps:$4 sm:$0xff]   ;;  %867 = vst [vmem:[#allocation2 + $0x70] sm:$0xf] %v4270_v14  ;;  %868 = vst [vmem:[#allocation2 + $0x74] sm:$0xf] %v4271_v28  ;;  %v4682_v22 = vunpack.c.l.bf16 %v5982_v2  ;;  %v4683_v23 = vunpack.c.h.bf16 %v5982_v2  ;;  %v4686_v26 = vunpack.c.l.bf16 %v5989_v11  ;;  %v4687_v2 = vunpack.c.h.bf16 %v5989_v11 }
  0x5f   : > { %4951 = vmatpush3.bf16.msra.mxu1 %v5437_v53  ;;  %v399_v21 = vmax.f32 %v367_v1, 0.0  ;;  %5242 = vmatprep.mubr.bf16.mxu1 %v5932_v9  ;;  %v494_v27 = vor.u32 %v492_v24, %v491_v15  ;;  %v609_v29 = vsel %vm5719_vm2, %v491_v15, 0  ;;  %v330_v30 = vmul.f32 %v5973_v54, %v4679_v20 }
  0x60   : > { %4952 = vmatprep.subr.bf16.mxu1 %v5441_v56  ;;  %v368_v12 = vadd.f32 %v5950_v19, %v329_v48  ;;  %v1681_v32 = vshll.u32 %v5440_v16, 16  ;;  %v4276_v9 = vcombine.low %v609_v29, %v609_v29  ;;  %v1837_v35 = vrot.slane %v5440_v16, 1 }
  0x61   : > { %v5439_v31 = vld [vmem:[#allocation2 + $0x60] sm:$0xff]   ;;  %v422_v34 = vpack.c.bf16 %v399_v21, %v398_v17  ;;  %v593_v37 = vsel %vm5719_vm2, 0, %v494_v27  ;;  %v369_v39 = vadd.f32 %v5950_v19, %v330_v30  ;;  %v331_v63 = vmul.f32 %v5973_v54, %v4682_v22  ;;  %v5461_v30 = vld [vmem:[%s7074_s3 + $0x50] sm:$0xff]  }
  0x62   : > { %v400_v40 = vmax.f32 %v368_v12, 0.0  ;;  %v1674_v42 = vshrl.u32 %v5439_v31, 16  ;;  %v1676_v61 = vshll.u32 %v5439_v31, 16  ;;  %v1683_v43 = vrot.slane %v1681_v32, 1  ;;  %873 = vst [vmem:[#allocation2 + $0x88] sm:$0xf] %v4276_v9 }
  0x63   : > { %4953 = vmatpush3.bf16.msra.mxu1 %v5442_v7  ;;  %v1836_v44 = vrot.slane %v5439_v31, 1  ;;  %v5444_v45 = vld [vmem:[#allocation2 + $0x78] ss:$0 sps:$4 sm:$0xff]   ;;  %v4274_v46 = vcombine.low %v593_v37, %v593_v37  ;;  %v4275_v47 = vcombine.high %v593_v37, %v593_v37  ;;  %v496_v50 = vshrl.u32 %v422_v34, 16 }
  0x64   : > { %4954 = vmatprep.subr.bf16.mxu1 %v5445_v25  ;;  %v499_v51 = vshll.u32 %v422_v34, 16  ;;  %v1678_v53 = vrot.slane %v1676_v61, 1  ;;  %v401_v56 = vmax.f32 %v369_v39, 0.0  ;;  %v1693_v58 = vshll.u32 %v5444_v45, 16 }
  0x65   : > { %v1838_v0 = vsel %vm1308_vm4, %v1836_v44, %v1837_v35  ;;  %v6023_v57 = vld [vmem:[#allocation2 + $0x70] sm:$0xff]   ;;  %871 = vst [vmem:[#allocation2 + $0x80] sm:$0xf] %v4274_v46  ;;  %872 = vst [vmem:[#allocation2 + $0x84] sm:$0xf] %v4275_v47  ;;  %v332_v60 = vmul.f32 %v5973_v54, %v4683_v23  ;;  %v1840_v59 = vrot.slane %v5444_v45, 1  ;;  %v333_v13 = vmul.f32 %v5973_v54, %v4686_v26 }
  0x66   : > { %5243 = vmatmul.mubr.bf16.gmra.mxu1 %v5943_v18  ;;  %v1679_v4 = vor.u32 %v1678_v53, %v1674_v42  ;;  %v498_v5 = vrot.slane %v496_v50, 7  ;;  %v423_v6 = vpack.c.bf16 %v401_v56, %v400_v40  ;;  %v1686_v18 = vshrl.u32 %v6023_v57, 16  ;;  %v5458_v23 = vld [vmem:[%s7074_s3 + $0x18] sm:$0xff]  }
  0x67   : > { %5246 = vmatprep.mubr.bf16.mxu1 %v5967_v49  ;;  %4955 = vmatpush3.bf16.msra.mxu1 %v5446_v33  ;;  %v1688_v36 = vshll.u32 %v6023_v57, 16  ;;  %v1839_v24 = vrot.slane %v6023_v57, 1  ;;  %v1695_v17 = vrot.slane %v1693_v58, 1  ;;  %v370_v29 = vadd.f32 %v5950_v19, %v331_v63 }
  0x68   : > { %4956 = vmatprep.subr.bf16.mxu1 %v5450_v38  ;;  %v1684_v14 = vsel %vm1099_vm3, %v1679_v4, %v1683_v43  ;;  %v501_v49 = vor.u32 %v499_v51, %v498_v5  ;;  %v610_v28 = vsel %vm5719_vm2, %v498_v5, 0  ;;  %v503_v1 = vshrl.u32 %v423_v6, 16  ;;  %v5464_v38 = vld [vmem:[%s7074_s3 + $0x10] sm:$0xff]   ;;  %v5466_v43 = vld [vmem:[%s7074_s3 + $0x48] sm:$0xff]  }
  0x69   : > { %2150 = vmatprep.mubr.bf16.mxu0 %v1684_v14  ;;  %v1690_v15 = vrot.slane %v1688_v36, 1  ;;  %v5449_v20 = vld [vmem:[#allocation2 + $0x88] ss:$0 sps:$4 sm:$0xff]   ;;  %v4280_v48 = vcombine.low %v610_v28, %v610_v28  ;;  %v1841_v16 = vsel %vm1308_vm4, %v1839_v24, %v1840_v59  ;;  %v506_v22 = vshll.u32 %v423_v6, 16 }
  0x6a   : > { %2151 = vmatmul.mubr.bf16.gmra.mxu0 %v5439_v31  ;;  %v594_v7 = vsel %vm5719_vm2, 0, %v501_v49  ;;  %v505_v21 = vrot.slane %v503_v1, 7  ;;  %v1705_v25 = vshll.u32 %v5449_v20, 16  ;;  %v371_v9 = vadd.f32 %v5950_v19, %v332_v60 }
  0x6b   : > { %4957 = vmatpush3.bf16.msra.mxu1 %v5451_v55  ;;  %v1691_v26 = vor.u32 %v1690_v15, %v1686_v18  ;;  %v4278_v27 = vcombine.low %v594_v7, %v594_v7  ;;  %877 = vst [vmem:[#allocation2 + $0x98] sm:$0xf] %v4280_v48  ;;  %v4279_v31 = vcombine.high %v594_v7, %v594_v7  ;;  %v1843_v35 = vrot.slane %v5449_v20, 1  ;;  %v6090_v48 = vld [vmem:[%s7074_s3 + $0x238] sm:$0xff]  }
  0x6c   : > { %4958 = vmatprep.subr.bf16.mxu1 %v5455_v10  ;;  %v6049_v12 = vld [vmem:[#allocation2 + $0x80] sm:$0xff]   ;;  %v508_v32 = vor.u32 %v506_v22, %v505_v21  ;;  %v611_v33 = vsel %vm5719_vm2, %v505_v21, 0  ;;  %v402_v46 = vmax.f32 %v370_v29, 0.0  ;;  %v403_v47 = vmax.f32 %v371_v9, 0.0 }
  0x6d   : > { %v1696_v34 = vsel %vm1099_vm3, %v1691_v26, %v1695_v17  ;;  %875 = vst [vmem:[#allocation2 + $0x90] sm:$0xf] %v4278_v27  ;;  %v4284_v37 = vcombine.low %v611_v33, %v611_v33  ;;  %v1698_v39 = vshrl.u32 %v6049_v12, 16  ;;  %v1700_v40 = vshll.u32 %v6049_v12, 16  ;;  %876 = vst [vmem:[#allocation2 + $0x94] sm:$0xf] %v4279_v31 }
  0x6e   : > { %5247 = vmatmul.mubr.bf16.gmra.mxu1 %v1838_v0  ;;  %2158 = vmatprep.mubr.bf16.mxu0 %v1696_v34  ;;  %v1842_v42 = vrot.slane %v6049_v12, 1  ;;  %v595_v61 = vsel %vm5719_vm2, 0, %v508_v32  ;;  %v1707_v51 = vrot.slane %v1705_v25, 1  ;;  %v334_v53 = vmul.f32 %v5973_v54, %v4687_v2  ;;  %v5467_v54 = vld [vmem:[%s7074_s3 + $0x8] sm:$0xff]  }
  0x6f   : > { %5250 = vmatprep.mubr.bf16.mxu1 %v1841_v16  ;;  %v4282_v44 = vcombine.low %v595_v61, %v595_v61  ;;  %v4283_v45 = vcombine.high %v595_v61, %v595_v61  ;;  %881 = vst [vmem:[#allocation2 + $0xa8] sm:$0xf] %v4284_v37  ;;  %4959 = vmatpush3.bf16.msra.mxu1 %v5458_v23  ;;  %v1702_v50 = vrot.slane %v1700_v40, 1  ;;  %v1863_v11 = vrot.slane %v5866_v8, 1  ;;  %v5470_v8 = vld [vmem:[%s7074_s3] sm:$0xff]  }
  0x70   : > { %4960 = vmatprep.subr.bf16.mxu1 %v5461_v30  ;;  %v372_v0 = vadd.f32 %v5950_v19, %v333_v13  ;;  %v424_v55 = vpack.c.bf16 %v403_v47, %v402_v46  ;;  %v1844_v58 = vsel %vm1308_vm4, %v1842_v42, %v1843_v35  ;;  %v373_v60 = vadd.f32 %v5950_v19, %v334_v53  ;;  %v5469_v19 = vld [vmem:[%s7074_s3 + $0x40] sm:$0xff]  }
  0x71   : > { %879 = vst [vmem:[#allocation2 + $0xa0] sm:$0xf] %v4282_v44  ;;  %880 = vst [vmem:[#allocation2 + $0xa4] sm:$0xf] %v4283_v45  ;;  %v1703_v56 = vor.u32 %v1702_v50, %v1698_v39  ;;  %v1864_v10 = vrot.slane %v5858_v62, 1  ;;  %v1866_v13 = vrot.slane %v5918_v52, 1 }
  0x72   : > { %2159 = vmatmul.mubr.bf16.gmra.mxu0 %v6023_v57  ;;  %v5454_v63 = vld [vmem:[#allocation2 + $0x98] ss:$0 sps:$4 sm:$0xff]   ;;  %v510_v4 = vshrl.u32 %v424_v55, 16  ;;  %v513_v59 = vshll.u32 %v424_v55, 16  ;;  %v404_v5 = vmax.f32 %v372_v0, 0.0  ;;  %v405_v18 = vmax.f32 %v373_v60, 0.0 }
  0x73   : > { %4961 = vmatpush3.bf16.msra.mxu1 %v5464_v38  ;;  %v1708_v2 = vsel %vm1099_vm3, %v1703_v56, %v1707_v51  ;;  %v1717_v6 = vshll.u32 %v5454_v63, 16  ;;  %v1846_v57 = vrot.slane %v5454_v63, 1  ;;  %v1867_v28 = vrot.slane %v5907_v41, 1 }
  0x74   : > { %4962 = vmatprep.subr.bf16.mxu1 %v5466_v43  ;;  %2166 = vmatprep.mubr.bf16.mxu0 %v1708_v2  ;;  %v5453_v36 = vld [vmem:[#allocation2 + $0x90] sm:$0xff]   ;;  %v512_v24 = vrot.slane %v510_v4, 7  ;;  %v425_v16 = vpack.c.bf16 %v405_v18, %v404_v5  ;;  %v6095_v7 = vsel %vm1308_vm4, %v1863_v11, %v1864_v10  ;;  %v5573_v42 = vmov 0  }
  0x75   : > { %v1719_v14 = vrot.slane %v1717_v6, 1  ;;  %v1710_v1 = vshrl.u32 %v5453_v36, 16  ;;  %v1712_v15 = vshll.u32 %v5453_v36, 16  ;;  %v1845_v17 = vrot.slane %v5453_v36, 1  ;;  %430 = vst [vmem:[#allocation2] sm:$0xf] %v5573_v42 }
  0x76   : > { %5251 = vmatmul.mubr.bf16.gmra.mxu1 %v1844_v58  ;;  %v5457_v49 = vld [vmem:[#allocation2 + $0xa8] ss:$0 sps:$4 sm:$0xff]   ;;  %v515_v20 = vor.u32 %v513_v59, %v512_v24  ;;  %v6098_v41 = vsel %vm1308_vm4, %v1866_v13, %v1867_v28  ;;  %v612_v30 = vsel %vm5719_vm2, %v512_v24, 0  ;;  %v517_v38 = vshrl.u32 %v425_v16, 16  ;;  %431 = vst [vmem:[#allocation2 + $0x4] sm:$0xf] %v5573_v42 }
  0x77   : > { %4963 = vmatpush3.bf16.msra.mxu1 %v5467_v54  ;;  %v1849_v52 = vrot.slane %v5457_v49, 1  ;;  %v1714_v21 = vrot.slane %v1712_v15, 1  ;;  %v1847_v22 = vsel %vm1308_vm4, %v1845_v17, %v1846_v57  ;;  %v1729_v23 = vshll.u32 %v5457_v49, 16  ;;  %432 = vst [vmem:[#allocation2 + $0x8] sm:$0xf] %v5573_v42  ;;  %v5561_v2 = vld [vmem:[#allocation2 + $0xd0] sm:$0xff]  }
  0x78   : > { %v6092_v62 = vld [vmem:[#allocation2 + $0xa0] sm:$0xff]   ;;  %4964 = vmatprep.subr.bf16.mxu1 %v5469_v19  ;;  %v596_v26 = vsel %vm5719_vm2, 0, %v515_v20  ;;  %5254 = vmatprep.mubr.bf16.mxu1 %v1847_v22  ;;  %v4288_v37 = vcombine.low %v612_v30, %v612_v30  ;;  %v520_v39 = vshll.u32 %v425_v16, 16  ;;  %435 = vst [vmem:[#allocation2 + $0x110] sm:$0xf] %v5573_v42  ;;  %v519_v61 = vrot.slane %v517_v38, 7 }
  0x79   : > { %v1848_v25 = vrot.slane %v6092_v62, 1  ;;  %v1722_v27 = vshrl.u32 %v6092_v62, 16  ;;  %v1724_v29 = vshll.u32 %v6092_v62, 16  ;;  %v1715_v31 = vor.u32 %v1714_v21, %v1710_v1  ;;  %436 = vst [vmem:[#allocation2 + $0x114] sm:$0xf] %v5573_v42  ;;  %v5563_v20 = vld [vmem:[#allocation2 + $0xe0] sm:$0xff]  }
  0x7a   : > { %2167 = vmatmul.mubr.bf16.gmra.mxu0 %v6049_v12  ;;  %v1731_v32 = vrot.slane %v1729_v23, 1  ;;  %v4286_v33 = vcombine.low %v596_v26, %v596_v26  ;;  %v4287_v9 = vcombine.high %v596_v26, %v596_v26  ;;  %885 = vst [vmem:[#allocation2 + $0xb8] sm:$0xf] %v4288_v37  ;;  %437 = vst [vmem:[#allocation2 + $0x118] sm:$0xf] %v5573_v42  ;;  %v613_v45 = vsel %vm5719_vm2, %v519_v61, 0 }
  0x7b   : > { %4965 = vmatpush3.bf16.msra.mxu1 %v5470_v8  ;;  %v1850_v34 = vsel %vm1308_vm4, %v1848_v25, %v1849_v52  ;;  %v1726_v35 = vrot.slane %v1724_v29, 1  ;;  %v1720_v12 = vsel %vm1099_vm3, %v1715_v31, %v1719_v14  ;;  %v522_v44 = vor.u32 %v520_v39, %v519_v61  ;;  %v5562_v57 = vld [vmem:[#allocation2 + $0xd8] ss:$0 sps:$4 sm:$0xff]   ;;  %v5564_v52 = vld [vmem:[#allocation2 + $0xe8] ss:$0 sps:$4 sm:$0xff]   ;;  %v6128_v29 = vld [vmem:[#allocation2 + $0x10] sm:$0xff]  }
  0x7c   : > { %5318 = vmatprep.subr.bf16.mxu1 %v6090_v48  ;;  %883 = vst [vmem:[#allocation2 + $0xb0] sm:$0xf] %v4286_v33  ;;  %884 = vst [vmem:[#allocation2 + $0xb4] sm:$0xf] %v4287_v9  ;;  %2174 = vmatprep.mubr.bf16.mxu0 %v1720_v12  ;;  %v4292_v46 = vcombine.low %v613_v45, %v613_v45  ;;  %v1857_v6 = vrot.slane %v5561_v2, 1  ;;  %v1858_v18 = vrot.slane %v5562_v57, 1 }
  0x7d   : > { %v1727_v40 = vor.u32 %v1726_v35, %v1722_v27  ;;  %v597_v47 = vsel %vm5719_vm2, 0, %v522_v44  ;;  %v6120_v14 = vld [vmem:[#allocation2] sm:$0xff]   ;;  %v1861_v16 = vrot.slane %v5564_v52, 1  ;;  %v5475_v30 = vld [vmem:[#allocation2 + $0x18] ss:$0 sps:$4 sm:$0xff]   ;;  %v1312_v37 = vrot.slane %v6128_v29, 1 }
  0x7e   : > { %5255 = vmatmul.mubr.bf16.gmra.mxu1 %v1850_v34  ;;  %v4290_v51 = vcombine.low %v597_v47, %v597_v47  ;;  %v4291_v53 = vcombine.high %v597_v47, %v597_v47  ;;  %889 = vst [vmem:[#allocation2 + $0xc8] sm:$0xf] %v4292_v46  ;;  %v1859_v49 = vsel %vm1308_vm4, %v1857_v6, %v1858_v18  ;;  %v5472_v17 = vld [vmem:[#allocation2 + $0x8] ss:$0 sps:$4 sm:$0xff]   ;;  %v1103_v22 = vshll.u32 %v6120_v14, 16  ;;  %v6132_v34 = vld [vmem:[#allocation2 + $0x20] sm:$0xff]  }
  0x7f   : > { %v1732_v43 = vsel %vm1099_vm3, %v1727_v40, %v1731_v32  ;;  %v1309_v23 = vrot.slane %v6120_v14, 1  ;;  %v1310_v26 = vrot.slane %v5472_v17, 1  ;;  %v1101_v31 = vshrl.u32 %v6120_v14, 16  ;;  %v5479_v35 = vld [vmem:[#allocation2 + $0x28] ss:$0 sps:$4 sm:$0xff]   ;;  %v6141_v44 = vld [vmem:[#allocation2 + $0x30] sm:$0xff]  }
  0x80   : > { %887 = vst [vmem:[#allocation2 + $0xc0] sm:$0xf] %v4290_v51  ;;  %888 = vst [vmem:[#allocation2 + $0xc4] sm:$0xf] %v4291_v53  ;;  %v1105_v32 = vrot.slane %v1103_v22, 1  ;;  %v1108_v33 = vshll.u32 %v5472_v17, 16 }
  0x81   : > { %v5460_v0 = vld [vmem:[#allocation2 + $0xb8] ss:$0 sps:$4 sm:$0xff]   ;;  %v1311_v9 = vsel %vm1308_vm4, %v1309_v23, %v1310_v26  ;;  %v1313_v12 = vrot.slane %v5475_v30, 1  ;;  %v1115_v40 = vshll.u32 %v6128_v29, 16  ;;  %v1315_v42 = vrot.slane %v6132_v34, 1  ;;  %v5482_v46 = vld [vmem:[%s7074_s3 + $0x1f0] sm:$0xff]  }
  0x82   : > { %2175 = vmatmul.mubr.bf16.gmra.mxu0 %v5453_v36  ;;  %v1852_v63 = vrot.slane %v5460_v0, 1  ;;  %v1741_v60 = vshll.u32 %v5460_v0, 16  ;;  %v1106_v38 = vor.u32 %v1105_v32, %v1101_v31  ;;  %v1110_v39 = vrot.slane %v1108_v33, 1  ;;  %v6151_v0 = vld [vmem:[#allocation2 + $0x40] sm:$0xff]   ;;  %v6171_v2 = vld [vmem:[#allocation2 + $0x50] sm:$0xff]  }
  0x83   : > { %2182 = vmatprep.mubr.bf16.mxu0 %v1732_v43  ;;  %v5459_v50 = vld [vmem:[#allocation2 + $0xb0] sm:$0xff]   ;;  %v1316_v61 = vrot.slane %v5479_v35, 1  ;;  %v5477_v43 = vld [vmem:[%s7074_s3 + $0x1b8] sm:$0xff]   ;;  %v1314_v45 = vsel %vm1308_vm4, %v1312_v37, %v1313_v12  ;;  %v1117_v51 = vrot.slane %v1115_v40, 1  ;;  %v1120_v53 = vshll.u32 %v5475_v30, 16  ;;  %v5512_v37 = vld [vmem:[%s7074_s3 + $0x220] sm:$0xff]  }
  0x84   : > { %v1851_v55 = vrot.slane %v5459_v50, 1  ;;  %v1734_v56 = vshrl.u32 %v5459_v50, 16  ;;  %v1736_v58 = vshll.u32 %v5459_v50, 16  ;;  %v1743_v5 = vrot.slane %v1741_v60, 1  ;;  %v5483_v60 = vld [vmem:[%s7074_s3 + $0x1b0] sm:$0xff]  }
  0x85   : > { %v5463_v54 = vld [vmem:[#allocation2 + $0xc8] ss:$0 sps:$4 sm:$0xff]   ;;  %v1111_v47 = vsel %vm1099_vm3, %v1106_v38, %v1110_v39  ;;  %v1132_v57 = vshll.u32 %v5479_v35, 16  ;;  %v6174_v18 = vld [vmem:[#allocation2 + $0x58] ss:$0 sps:$4 sm:$0xff]   ;;  %v1324_v17 = vrot.slane %v6171_v2, 1 }
  0x86   : > { %v1738_v4 = vrot.slane %v1736_v58, 1  ;;  %v1853_v59 = vsel %vm1308_vm4, %v1851_v55, %v1852_v63  ;;  %v1855_v36 = vrot.slane %v5463_v54, 1  ;;  %v1753_v24 = vshll.u32 %v5463_v54, 16  ;;  %v6204_v22 = vld [vmem:[#allocation2 + $0x78] ss:$0 sps:$4 sm:$0xff]   ;;  %v5508_v12 = vld [vmem:[%s7074_s3 + $0x1d0] sm:$0xff]  }
  0x87   : > { %5258 = vmatprep.mubr.bf16.mxu1 %v1853_v59  ;;  %v5462_v19 = vld [vmem:[#allocation2 + $0xc0] sm:$0xff]   ;;  %v1317_v55 = vsel %vm1308_vm4, %v1315_v42, %v1316_v61  ;;  %v1318_v58 = vrot.slane %v6141_v44, 1  ;;  %v1137_v31 = vshrl.u32 %v6141_v44, 16  ;;  %v5503_v35 = vld [vmem:[%s7074_s3 + $0x198] sm:$0xff]   ;;  %v1331_v40 = vrot.slane %v6204_v22, 1 }
  0x88   : > { %v1739_v3 = vor.u32 %v1738_v4, %v1734_v56  ;;  %v1854_v10 = vrot.slane %v5462_v19, 1  ;;  %v1746_v13 = vshrl.u32 %v5462_v19, 16  ;;  %v1748_v8 = vshll.u32 %v5462_v19, 16  ;;  %v6154_v56 = vld [vmem:[#allocation2 + $0x48] ss:$0 sps:$4 sm:$0xff]  }
  0x89   : > { %v1755_v15 = vrot.slane %v1753_v24, 1  ;;  %v5489_v4 = vld [vmem:[%s7074_s3 + $0x1e8] sm:$0xff]   ;;  %v1322_v54 = vrot.slane %v6154_v56, 1  ;;  %v1125_v24 = vshrl.u32 %v6132_v34, 16  ;;  %v1151_v61 = vshll.u32 %v6151_v0, 16 }
  0x8a   : > { %2183 = vmatmul.mubr.bf16.gmra.mxu0 %v6092_v62  ;;  %v1744_v11 = vsel %vm1099_vm3, %v1739_v3, %v1743_v5  ;;  %v1856_v28 = vsel %vm1308_vm4, %v1854_v10, %v1855_v36  ;;  %v1750_v1 = vrot.slane %v1748_v8, 1  ;;  %v1860_v62 = vrot.slane %v5563_v20, 1 }
  0x8b   : > { %2190 = vmatprep.mubr.bf16.mxu0 %v1744_v11  ;;  %5259 = vmatmul.mubr.bf16.gmra.mxu1 %v1856_v28  ;;  %v1122_v5 = vrot.slane %v1120_v53, 1  ;;  %v1321_v3 = vrot.slane %v6151_v0, 1  ;;  %v5486_v11 = vld [vmem:[%s7074_s3 + $0x230] sm:$0xff]   ;;  %v5495_v28 = vld [vmem:[%s7074_s3 + $0x1e0] sm:$0xff]   ;;  %v1325_v20 = vrot.slane %v6174_v18, 1 }
  0x8c   : > { %5262 = vmatprep.mubr.bf16.mxu1 %v1859_v49  ;;  %v1751_v21 = vor.u32 %v1750_v1, %v1746_v13  ;;  %v1862_v27 = vsel %vm1308_vm4, %v1860_v62, %v1861_v16  ;;  %v6180_v13 = vld [vmem:[#allocation2 + $0x68] ss:$0 sps:$4 sm:$0xff]   ;;  %v1139_v62 = vshll.u32 %v6141_v44, 16  ;;  %v6245_v53 = vld [vmem:[#allocation2 + $0x98] ss:$0 sps:$4 sm:$0xff]  }
  0x8d   : > { %v1323_v8 = vsel %vm1308_vm4, %v1321_v3, %v1322_v54  ;;  %v5490_v49 = vld [vmem:[%s7074_s3 + $0x1a8] sm:$0xff]   ;;  %v1328_v16 = vrot.slane %v6180_v13, 1  ;;  %v1326_v23 = vsel %vm1308_vm4, %v1324_v17, %v1325_v20  ;;  %v5521_v3 = vld [vmem:[%s7074_s3 + $0x1c0] sm:$0xff]   ;;  %v1337_v54 = vrot.slane %v6245_v53, 1 }
  0x8e   : > { %v1756_v25 = vsel %vm1099_vm3, %v1751_v21, %v1755_v15  ;;  %v5499_v1 = vld [vmem:[%s7074_s3 + $0x228] sm:$0xff]   ;;  %v1134_v15 = vrot.slane %v1132_v57, 1  ;;  %v6202_v21 = vld [vmem:[#allocation2 + $0x70] sm:$0xff]   ;;  %v1141_v32 = vrot.slane %v1139_v62, 1  ;;  %v1161_v17 = vshrl.u32 %v6171_v2, 16 }
  0x8f   : > { %v1330_v39 = vrot.slane %v6202_v21, 1  ;;  %v1168_v62 = vshll.u32 %v6174_v18, 16 }
  0x90   : > { %v1142_v42 = vor.u32 %v1141_v32, %v1137_v31 }
  0x92   : > { %2191 = vmatmul.mubr.bf16.gmra.mxu0 %v5459_v50  ;;  %v1113_v50 = vshrl.u32 %v6128_v29, 16 }
  0x93   : > { %2198 = vmatprep.mubr.bf16.mxu0 %v1756_v25  ;;  %5263 = vmatmul.mubr.bf16.gmra.mxu1 %v1862_v27  ;;  %v6208_v25 = vld [vmem:[#allocation2 + $0x80] sm:$0xff]   ;;  %v5502_v27 = vld [vmem:[%s7074_s3 + $0x1d8] sm:$0xff]  }
  0x94   : > { %5266 = vmatprep.mubr.bf16.mxu1 %v6095_v7  ;;  %v6144_v7 = vld [vmem:[#allocation2 + $0x38] ss:$0 sps:$4 sm:$0xff]   ;;  %v1118_v59 = vor.u32 %v1117_v51, %v1113_v50  ;;  %v1332_v50 = vsel %vm1308_vm4, %v1330_v39, %v1331_v40  ;;  %v1149_v51 = vshrl.u32 %v6151_v0, 16 }
  0x95   : > { %v1319_v63 = vrot.slane %v6144_v7, 1  ;;  %v1144_v26 = vshll.u32 %v6144_v7, 16  ;;  %v5525_v7 = vld [vmem:[%s7074_s3 + $0x218] sm:$0xff]  }
  0x96   : > { %v1123_v36 = vsel %vm1099_vm3, %v1118_v59, %v1122_v5  ;;  %v6253_v59 = vld [vmem:[#allocation2 + $0xa8] ss:$0 sps:$4 sm:$0xff]  }
  0x97   : > { %v1320_v6 = vsel %vm1308_vm4, %v1318_v58, %v1319_v63  ;;  %v1146_v38 = vrot.slane %v1144_v26, 1  ;;  %v1153_v63 = vrot.slane %v1151_v61, 1  ;;  %v5516_v5 = vld [vmem:[%s7074_s3 + $0x188] sm:$0xff]   ;;  %v6312_v61 = vld [vmem:[#allocation2 + $0xd8] ss:$0 sps:$4 sm:$0xff]  }
  0x99   : > { %v1147_v58 = vsel %vm1099_vm3, %v1142_v42, %v1146_v38  ;;  %v1180_v42 = vshll.u32 %v6180_v13, 16  ;;  %v1349_v13 = vrot.slane %v6312_v61, 1 }
  0x9a   : > { %2199 = vmatmul.mubr.bf16.gmra.mxu0 %v5462_v19  ;;  %v6176_v19 = vld [vmem:[#allocation2 + $0x60] sm:$0xff]  }
  0x9b   : > { %5286 = vmatprep.mubr.bf16.mxu0 %v1311_v9  ;;  %5267 = vmatmul.mubr.bf16.gmra.mxu1 %v6098_v41  ;;  %v1127_v41 = vshll.u32 %v6132_v34, 16  ;;  %v1327_v52 = vrot.slane %v6176_v19, 1  ;;  %v6216_v9 = vld [vmem:[#allocation2 + $0x88] ss:$0 sps:$4 sm:$0xff]   ;;  %v1175_v32 = vshll.u32 %v6176_v19, 16  ;;  %v1173_v39 = vshrl.u32 %v6176_v19, 16 }
  0x9c   : > { %2576 = vmatprep.mubr.bf16.mxu1 %v1111_v47  ;;  %v6241_v47 = vld [vmem:[#allocation2 + $0xa0] sm:$0xff]  }
  0x9d   : > { %v1129_v10 = vrot.slane %v1127_v41, 1  ;;  %v1329_v33 = vsel %vm1308_vm4, %v1327_v52, %v1328_v16  ;;  %v5530_v41 = vld [vmem:[%s7074_s3 + $0x210] sm:$0xff]   ;;  %v1177_v40 = vrot.slane %v1175_v32, 1 }
  0xa2   : > { %5287 = vmatmul.mubr.bf16.vlgmr.msra.gmra.mxu0 %v1314_v45  ;;  %v1334_v45 = vrot.slane %v6216_v9, 1 }
  0xa3   : > { %5087 = vmatpush3.bf16.msra.mxu0 %v5477_v43  ;;  %5290 = vmatprep.mubr.bf16.mxu0 %v1317_v55  ;;  %v1333_v43 = vrot.slane %v6208_v25, 1  ;;  %v5515_v55 = vld [vmem:[%s7074_s3 + $0x1c8] sm:$0xff]  }
  0xa4   : > { %5088 = vmatprep.subr.bf16.mxu0 %v5482_v46  ;;  %2577 = vmatmul.mubr.bf16.vlgmr.msra.gmra.mxu1 %v6120_v14  ;;  %v1130_v14 = vor.u32 %v1129_v10, %v1125_v24  ;;  %v6239_v46 = vld [vmem:[#allocation2 + $0x90] sm:$0xff]   ;;  %v1340_v24 = vrot.slane %v6253_v59, 1  ;;  %v5522_v10 = vld [vmem:[%s7074_s3 + $0x180] sm:$0xff]  }
  0xa5   : > { %5319 = vmatpush3.bf16.msra.mxu1 %v6090_v48  ;;  %2584 = vmatprep.mubr.bf16.mxu1 %v1123_v36  ;;  %v5496_v48 = vld [vmem:[%s7074_s3 + $0x1a0] sm:$0xff]   ;;  %v1339_v36 = vrot.slane %v6241_v47, 1 }
  0xa6   : > { %5320 = vmatprep.subr.bf16.mxu1 %v5486_v11  ;;  %v1135_v30 = vsel %vm1099_vm3, %v1130_v14, %v1134_v15  ;;  %v6287_v14 = vld [vmem:[#allocation2 + $0xc0] sm:$0xff]  }
  0xa7   : > { %5089 = vmatpush3.bf16.msra.mxu0 %v5483_v60  ;;  %v1156_v60 = vshll.u32 %v6154_v56, 16  ;;  %v1336_v56 = vrot.slane %v6239_v46, 1  ;;  %v1341_v16 = vsel %vm1308_vm4, %v1339_v36, %v1340_v24 }
  0xa8   : > { %5090 = vmatprep.subr.bf16.mxu0 %v5489_v4  ;;  %v1335_v4 = vsel %vm1308_vm4, %v1333_v43, %v1334_v45 }
  0xa9   : > { %5321 = vmatpush3.bf16.msra.mxu1 %v5486_v11  ;;  %v1163_v11 = vshll.u32 %v6171_v2, 16  ;;  %v1158_v57 = vrot.slane %v1156_v60, 1  ;;  %v1338_v15 = vsel %vm1308_vm4, %v1336_v56, %v1337_v54 }
  0xaa   : > { %5291 = vmatmul.mubr.bf16.gmra.mxu0 %v1320_v6  ;;  %5322 = vmatprep.subr.bf16.mxu1 %v5499_v1  ;;  %v1154_v6 = vor.u32 %v1153_v63, %v1149_v51  ;;  %v1178_v51 = vor.u32 %v1177_v40, %v1173_v39  ;;  %v1211_v39 = vshll.u32 %v6239_v46, 16 }
  0xab   : > { %5294 = vmatprep.mubr.bf16.mxu0 %v1323_v8  ;;  %5091 = vmatpush3.bf16.msra.mxu0 %v5490_v49  ;;  %v6275_v8 = vld [vmem:[#allocation2 + $0xb8] ss:$0 sps:$4 sm:$0xff]   ;;  %v5535_v49 = vld [vmem:[%s7074_s3 + $0x208] sm:$0xff]   ;;  %v1165_v20 = vrot.slane %v1163_v11, 1 }
  0xac   : > { %5092 = vmatprep.subr.bf16.mxu0 %v5495_v28  ;;  %2585 = vmatmul.mubr.bf16.gmra.mxu1 %v6128_v29  ;;  %v5509_v29 = vld [vmem:[%s7074_s3 + $0x190] sm:$0xff]   ;;  %v6280_v28 = vld [vmem:[#allocation2 + $0x20] sm:$0xff]   ;;  %v1159_v52 = vsel %vm1099_vm3, %v1154_v6, %v1158_v57  ;;  %v1343_v31 = vrot.slane %v6275_v8, 1  ;;  %v6333_v11 = vld [vmem:[#allocation2 + $0xf8] ss:$0 sps:$4 sm:$0xff]  }
  0xad   : > { %2592 = vmatprep.mubr.bf16.mxu1 %v1135_v30  ;;  %5323 = vmatpush3.bf16.msra.mxu1 %v5499_v1  ;;  %v6282_v1 = vld [vmem:[#allocation2 + $0x28] ss:$0 sps:$4 sm:$0xff]   ;;  %v3060_v57 = vshrl.u32 %v6280_v28, 16 }
  0xae   : > { %5324 = vmatprep.subr.bf16.mxu1 %v5512_v37  ;;  %v3268_v26 = vrot.slane %v6282_v1, 1  ;;  %v3067_v24 = vshll.u32 %v6282_v1, 16 }
  0xaf   : > { %5093 = vmatpush3.bf16.msra.mxu0 %v5496_v48  ;;  %v6291_v48 = vld [vmem:[#allocation2 + $0xc8] ss:$0 sps:$4 sm:$0xff]  }
  0xb0   : > { %5094 = vmatprep.subr.bf16.mxu0 %v5502_v27  ;;  %v5540_v27 = vld [vmem:[%s7074_s3 + $0x200] sm:$0xff]  }
  0xb1   : > { %5325 = vmatpush3.bf16.msra.mxu1 %v5512_v37  ;;  %v1345_v37 = vrot.slane %v6287_v14, 1 }
  0xb2   : > { %5295 = vmatmul.mubr.bf16.gmra.mxu0 %v1326_v23  ;;  %5326 = vmatprep.subr.bf16.mxu1 %v5525_v7  ;;  %v3267_v23 = vrot.slane %v6280_v28, 1 }
  0xb3   : > { %5298 = vmatprep.mubr.bf16.mxu0 %v1329_v33  ;;  %5095 = vmatpush3.bf16.msra.mxu0 %v5503_v35  ;;  %v1166_v33 = vor.u32 %v1165_v20, %v1161_v17  ;;  %v1170_v35 = vrot.slane %v1168_v62, 1  ;;  %v1355_v17 = vrot.slane %v6333_v11, 1  ;;  %v1199_v20 = vshll.u32 %v6208_v25, 16 }
  0xb4   : > { %5096 = vmatprep.subr.bf16.mxu0 %v5508_v12  ;;  %2593 = vmatmul.mubr.bf16.gmra.mxu1 %v6132_v34  ;;  %v6270_v34 = vld [vmem:[#allocation2 + $0xb0] sm:$0xff]   ;;  %v6301_v30 = vsel %vm1308_vm4, %v3267_v23, %v3268_v26  ;;  %v1346_v12 = vrot.slane %v6291_v48, 1  ;;  %v1197_v23 = vshrl.u32 %v6208_v25, 16 }
  0xb5   : > { %2600 = vmatprep.mubr.bf16.mxu1 %v1147_v58  ;;  %5327 = vmatpush3.bf16.msra.mxu1 %v5525_v7  ;;  %v1342_v18 = vrot.slane %v6270_v34, 1  ;;  %v1171_v43 = vsel %vm1099_vm3, %v1166_v33, %v1170_v35  ;;  %v6318_v7 = vld [vmem:[#allocation2 + $0xe8] ss:$0 sps:$4 sm:$0xff]   ;;  %v1187_v58 = vshll.u32 %v6202_v21, 16 }
  0xb6   : > { %5328 = vmatprep.subr.bf16.mxu1 %v5530_v41  ;;  %v1347_v45 = vsel %vm1308_vm4, %v1345_v37, %v1346_v12  ;;  %v1352_v60 = vrot.slane %v6318_v7, 1  ;;  %v6354_v37 = vld [vmem:[#allocation2 + $0x40] sm:$0xff]  }
  0xb7   : > { %5097 = vmatpush3.bf16.msra.mxu0 %v5509_v29  ;;  %v1344_v38 = vsel %vm1308_vm4, %v1342_v18, %v1343_v31  ;;  %v6316_v29 = vld [vmem:[#allocation2 + $0xe0] sm:$0xff]   ;;  %v1189_v54 = vrot.slane %v1187_v58, 1  ;;  %v1204_v18 = vshll.u32 %v6216_v9, 16 }
  0xb8   : > { %5098 = vmatprep.subr.bf16.mxu0 %v5515_v55  ;;  %v1182_v55 = vrot.slane %v1180_v42, 1  ;;  %v1351_v63 = vrot.slane %v6316_v29, 1  ;;  %v6358_v42 = vld [vmem:[#allocation2 + $0x48] ss:$0 sps:$4 sm:$0xff]  }
  0xb9   : > { %5329 = vmatpush3.bf16.msra.mxu1 %v5530_v41 }
  0xba   : > { %5299 = vmatmul.mubr.bf16.gmra.mxu0 %v1332_v50  ;;  %5330 = vmatprep.subr.bf16.mxu1 %v5535_v49  ;;  %v1183_v41 = vsel %vm1099_vm3, %v1178_v51, %v1182_v55  ;;  %v1353_v6 = vsel %vm1308_vm4, %v1351_v63, %v1352_v60  ;;  %v1213_v51 = vrot.slane %v1211_v39, 1  ;;  %v3091_v63 = vshll.u32 %v6358_v42, 16  ;;  %v6367_v60 = vld [vmem:[#allocation2 + $0x50] sm:$0xff]  }
  0xbb   : > { %5302 = vmatprep.mubr.bf16.mxu0 %v1335_v4  ;;  %5099 = vmatpush3.bf16.msra.mxu0 %v5516_v5  ;;  %v3062_v4 = vshll.u32 %v6280_v28, 16  ;;  %v1192_v5 = vshll.u32 %v6204_v22, 16 }
  0xbc   : > { %5100 = vmatprep.subr.bf16.mxu0 %v5521_v3  ;;  %2601 = vmatmul.mubr.bf16.gmra.mxu1 %v6141_v44  ;;  %v6307_v44 = vld [vmem:[#allocation2 + $0xd0] sm:$0xff]   ;;  %v1185_v3 = vshrl.u32 %v6202_v21, 16 }
  0xbd   : > { %2608 = vmatprep.mubr.bf16.mxu1 %v1159_v52  ;;  %5331 = vmatpush3.bf16.msra.mxu1 %v5535_v49  ;;  %v1348_v50 = vrot.slane %v6307_v44, 1  ;;  %v3064_v36 = vrot.slane %v3062_v4, 1  ;;  %v1194_v22 = vrot.slane %v1192_v5, 1  ;;  %v3069_v52 = vrot.slane %v3067_v24, 1 }
  0xbe   : > { %5332 = vmatprep.subr.bf16.mxu1 %v5540_v27  ;;  %v3096_v24 = vshrl.u32 %v6367_v60, 16 }
  0xbf   : > { %5101 = vmatpush3.bf16.msra.mxu0 %v5522_v10  ;;  %v1350_v56 = vsel %vm1308_vm4, %v1348_v50, %v1349_v13  ;;  %v6338_v10 = vld [vmem:[#allocation2 + $0x30] sm:$0xff]   ;;  %v3065_v62 = vor.u32 %v3064_v36, %v3060_v57  ;;  %v1209_v50 = vshrl.u32 %v6239_v46, 16  ;;  %v3084_v13 = vshrl.u32 %v6354_v37, 16 }
  0xc0   : > { %v3074_v1 = vshll.u32 %v6338_v10, 16  ;;  %v3072_v32 = vshrl.u32 %v6338_v10, 16  ;;  %v1221_v57 = vshrl.u32 %v6241_v47, 16 }
  0xc1   : > { %5333 = vmatpush3.bf16.msra.mxu1 %v5540_v27  ;;  %v1201_v27 = vrot.slane %v1199_v20, 1  ;;  %v3070_v31 = vsel %vm1099_vm3, %v3065_v62, %v3069_v52  ;;  %v1214_v4 = vor.u32 %v1213_v51, %v1209_v50  ;;  %v1235_v62 = vshll.u32 %v6270_v34, 16  ;;  %v6400_v50 = vld [vmem:[#allocation2 + $0x78] ss:$0 sps:$4 sm:$0xff]  }
  0xc2   : > { %5303 = vmatmul.mubr.bf16.gmra.mxu0 %v1338_v15  ;;  %v1190_v15 = vor.u32 %v1189_v54, %v1185_v3  ;;  %v3076_v33 = vrot.slane %v3074_v1, 1  ;;  %v6372_v3 = vld [vmem:[#allocation2 + $0x58] ss:$0 sps:$4 sm:$0xff]   ;;  %v3098_v54 = vshll.u32 %v6367_v60, 16  ;;  %v6386_v1 = vld [vmem:[#allocation2 + $0x68] ss:$0 sps:$4 sm:$0xff]  }
  0xc3   : > { %5306 = vmatprep.mubr.bf16.mxu0 %v1341_v16  ;;  %v6344_v16 = vld [vmem:[#allocation2 + $0x38] ss:$0 sps:$4 sm:$0xff]   ;;  %v1202_v12 = vor.u32 %v1201_v27, %v1197_v23  ;;  %v1237_v27 = vrot.slane %v1235_v62, 1 }
  0xc4   : > { %2609 = vmatmul.mubr.bf16.gmra.mxu1 %v6151_v0  ;;  %v6328_v0 = vld [vmem:[#allocation2 + $0xf0] sm:$0xff]   ;;  %v3079_v35 = vshll.u32 %v6344_v16, 16  ;;  %v3077_v40 = vor.u32 %v3076_v33, %v3072_v32  ;;  %v3115_v33 = vshll.u32 %v6386_v1, 16 }
  0xc5   : > { %2616 = vmatprep.mubr.bf16.mxu1 %v1171_v43  ;;  %v1354_v49 = vrot.slane %v6328_v0, 1  ;;  %v3086_v43 = vshll.u32 %v6354_v37, 16 }
  0xc6   : > { %v3081_v9 = vrot.slane %v3079_v35, 1  ;;  %v6395_v35 = vld [vmem:[#allocation2 + $0x70] sm:$0xff]  }
  0xc7   : > { %v1356_v26 = vsel %vm1308_vm4, %v1354_v49, %v1355_v17  ;;  %v3088_v58 = vrot.slane %v3086_v43, 1  ;;  %v3103_v49 = vshll.u32 %v6372_v3, 16  ;;  %v3117_v43 = vrot.slane %v3115_v33, 1 }
  0xc8   : > { %v3082_v55 = vsel %vm1099_vm3, %v3077_v40, %v3081_v9  ;;  %v3122_v51 = vshll.u32 %v6395_v35, 16  ;;  %v1264_v33 = vshll.u32 %v6312_v61, 16 }
  0xc9   : > { %v3105_v52 = vrot.slane %v3103_v49, 1 }
  0xca   : > { %5307 = vmatmul.mubr.bf16.gmra.mxu0 %v1344_v38  ;;  %v1206_v38 = vrot.slane %v1204_v18, 1 }
  0xcb   : > { %5310 = vmatprep.mubr.bf16.mxu0 %v1347_v45 }
  0xcc   : > { %2617 = vmatmul.mubr.bf16.gmra.mxu1 %v6171_v2  ;;  %v1195_v2 = vsel %vm1099_vm3, %v1190_v15, %v1194_v22  ;;  %v1207_v45 = vsel %vm1099_vm3, %v1202_v12, %v1206_v38  ;;  %v3100_v22 = vrot.slane %v3098_v54, 1  ;;  %v6381_v15 = vld [vmem:[#allocation2 + $0x60] sm:$0xff]   ;;  %v3120_v54 = vshrl.u32 %v6395_v35, 16 }
  0xcd   : > { %2624 = vmatprep.mubr.bf16.mxu1 %v1183_v41  ;;  %v1223_v41 = vshll.u32 %v6241_v47, 16  ;;  %v3110_v23 = vshll.u32 %v6381_v15, 16 }
  0xcf   : > { %v1225_v36 = vrot.slane %v1223_v41, 1  ;;  %v3112_v32 = vrot.slane %v3110_v23, 1  ;;  %v6422_v23 = vld [vmem:[#allocation2 + $0x88] ss:$0 sps:$4 sm:$0xff]  }
  0xd1   : > { %v1226_v17 = vor.u32 %v1225_v36, %v1221_v57  ;;  %v3127_v57 = vshll.u32 %v6400_v50, 16  ;;  %v6413_v36 = vld [vmem:[#allocation2 + $0x80] sm:$0xff]  }
  0xd2   : > { %5311 = vmatmul.mubr.bf16.gmra.mxu0 %v1350_v56  ;;  %v3093_v56 = vrot.slane %v3091_v63, 1  ;;  %v1245_v63 = vshrl.u32 %v6287_v14, 16 }
  0xd3   : > { %5314 = vmatprep.mubr.bf16.mxu0 %v1353_v6 }
  0xd4   : > { %2625 = vmatmul.mubr.bf16.gmra.mxu1 %v6176_v19  ;;  %v1216_v19 = vshll.u32 %v6245_v53, 16  ;;  %v3089_v53 = vor.u32 %v3088_v58, %v3084_v13 }
  0xd5   : > { %2632 = vmatprep.mubr.bf16.mxu1 %v1195_v2 }
  0xd6   : > { %v1218_v5 = vrot.slane %v1216_v19, 1 }
  0xd8   : > { %v1219_v6 = vsel %vm1099_vm3, %v1214_v4, %v1218_v5  ;;  %v1252_v5 = vshll.u32 %v6291_v48, 16 }
  0xda   : > { %5315 = vmatmul.mubr.bf16.gmra.mxu0 %v1356_v26  ;;  %v1233_v26 = vshrl.u32 %v6270_v34, 16  ;;  %v1254_v49 = vrot.slane %v1252_v5, 1  ;;  %v6444_v5 = vld [vmem:[#allocation2 + $0x98] ss:$0 sps:$4 sm:$0xff]  }
  0xdb   : > { %3556 = vmatprep.mubr.bf16.mxu0 %v3070_v31  ;;  %v3108_v31 = vshrl.u32 %v6381_v15, 16 }
  0xdc   : > { %2633 = vmatmul.mubr.bf16.gmra.mxu1 %v6202_v21  ;;  %v1228_v21 = vshll.u32 %v6253_v59, 16  ;;  %v3101_v59 = vor.u32 %v3100_v22, %v3096_v24  ;;  %v1238_v38 = vor.u32 %v1237_v27, %v1233_v26 }
  0xdd   : > { %2640 = vmatprep.mubr.bf16.mxu1 %v1207_v45  ;;  %v3113_v9 = vor.u32 %v3112_v32, %v3108_v31  ;;  %v1257_v31 = vshrl.u32 %v6307_v44, 16 }
  0xde   : > { %v1230_v20 = vrot.slane %v1228_v21, 1  ;;  %v3106_v18 = vsel %vm1099_vm3, %v3101_v59, %v3105_v52  ;;  %v3129_v59 = vrot.slane %v3127_v57, 1 }
  0xe0   : > { %v1231_v2 = vsel %vm1099_vm3, %v1226_v17, %v1230_v20  ;;  %v1259_v17 = vshll.u32 %v6307_v44, 16 }
  0xe2   : > { %3557 = vmatmul.mubr.bf16.vlgmr.msra.gmra.mxu0 %v6280_v28  ;;  %v3094_v28 = vsel %vm1099_vm3, %v3089_v53, %v3093_v56  ;;  %v3118_v53 = vsel %vm1099_vm3, %v3113_v9, %v3117_v43  ;;  %v1261_v32 = vrot.slane %v1259_v17, 1  ;;  %v3139_v9 = vshll.u32 %v6422_v23, 16  ;;  %v6435_v43 = vld [vmem:[#allocation2 + $0x90] sm:$0xff]   ;;  %v6453_v17 = vld [vmem:[#allocation2 + $0xa0] sm:$0xff]  }
  0xe3   : > { %3564 = vmatprep.mubr.bf16.mxu0 %v3082_v55 }
  0xe4   : > { %2641 = vmatmul.mubr.bf16.gmra.mxu1 %v6208_v25  ;;  %v1240_v25 = vshll.u32 %v6275_v8, 16  ;;  %v1247_v8 = vshll.u32 %v6287_v14, 16  ;;  %v1262_v61 = vor.u32 %v1261_v32, %v1257_v31  ;;  %v3158_v31 = vshll.u32 %v6453_v17, 16 }
  0xe5   : > { %2648 = vmatprep.mubr.bf16.mxu1 %v1219_v6  ;;  %v3124_v6 = vrot.slane %v3122_v51, 1 }
  0xe6   : > { %v1242_v39 = vrot.slane %v1240_v25, 1  ;;  %v1249_v4 = vrot.slane %v1247_v8, 1  ;;  %v3132_v8 = vshrl.u32 %v6413_v36, 16 }
  0xe7   : > { %v3125_v62 = vor.u32 %v3124_v6, %v3120_v54  ;;  %v1276_v6 = vshll.u32 %v6318_v7, 16 }
  0xe8   : > { %v1243_v58 = vsel %vm1099_vm3, %v1238_v38, %v1242_v39  ;;  %v1250_v22 = vor.u32 %v1249_v4, %v1245_v63  ;;  %v3141_v4 = vrot.slane %v3139_v9, 1 }
  0xe9   : > { %v3130_v38 = vsel %vm1099_vm3, %v3125_v62, %v3129_v59  ;;  %v1278_v7 = vrot.slane %v1276_v6, 1 }
  0xea   : > { %3565 = vmatmul.mubr.bf16.gmra.mxu0 %v6338_v10 }
  0xeb   : > { %3572 = vmatprep.mubr.bf16.mxu0 %v3094_v28 }
  0xec   : > { %2649 = vmatmul.mubr.bf16.gmra.mxu1 %v6239_v46 }
  0xed   : > { %2656 = vmatprep.mubr.bf16.mxu1 %v1231_v2  ;;  %v3134_v2 = vshll.u32 %v6413_v36, 16 }
  0xf2   : > { %3573 = vmatmul.mubr.bf16.gmra.mxu0 %v6354_v37 }
  0xf3   : > { %3580 = vmatprep.mubr.bf16.mxu0 %v3106_v18  ;;  %v1255_v18 = vsel %vm1099_vm3, %v1250_v22, %v1254_v49  ;;  %v3151_v49 = vshll.u32 %v6444_v5, 16 }
  0xf4   : > { %2657 = vmatmul.mubr.bf16.gmra.mxu1 %v6241_v47 }
  0xf5   : > { %2664 = vmatprep.mubr.bf16.mxu1 %v1243_v58  ;;  %v1271_v58 = vshll.u32 %v6316_v29, 16 }
  0xf6   : > { %v4830_v12 = vpop.f32.mrf.mxu0  ;;  %v4902_v40 = vpop.f32.mrf.mxu1 }
  0xf7   : > { %v1273_v54 = vrot.slane %v1271_v58, 1  ;;  %v6473_v58 = vld [vmem:[#allocation2 + $0xb0] sm:$0xff]  }
  0xf8   : > { %v4831_v45 = vpop.f32.mrf.mxu0  ;;  %v4903_v46 = vpop.f32.mrf.mxu1 }
  0xf9   : > { %v6403_v19 = vadd.f32 %v4831_v45, %v4830_v12  ;;  %v6405_v55 = vadd.f32 %v4903_v46, %v4902_v40  ;;  %v3136_v40 = vrot.slane %v3134_v2, 1 }
  0xfa   : > { %v4833_v13 = vpop.f32.mrf.mxu0  ;;  %v4905_v41 = vpop.f32.mrf.mxu1  ;;  %3581 = vmatmul.mubr.bf16.gmra.mxu0 %v6367_v60 }
  0xfb   : > { %3588 = vmatprep.mubr.bf16.mxu0 %v3118_v53  ;;  %v3137_v63 = vor.u32 %v3136_v40, %v3132_v8  ;;  %v1288_v8 = vshll.u32 %v6333_v11, 16  ;;  %v3156_v40 = vshrl.u32 %v6453_v17, 16 }
  0xfc   : > { %v4834_v56 = vpop.f32.mrf.mxu0  ;;  %v4906_v28 = vpop.f32.mrf.mxu1  ;;  %2665 = vmatmul.mubr.bf16.gmra.mxu1 %v6270_v34  ;;  %v1269_v34 = vshrl.u32 %v6316_v29, 16 }
  0xfd   : > { %v6415_v21 = vadd.f32 %v4834_v56, %v4833_v13  ;;  %v6419_v24 = vadd.f32 %v4906_v28, %v4905_v41  ;;  %2672 = vmatprep.mubr.bf16.mxu1 %v1255_v18  ;;  %v1266_v13 = vrot.slane %v1264_v33, 1  ;;  %v3146_v41 = vshll.u32 %v6435_v43, 16  ;;  %v6460_v18 = vld [vmem:[#allocation2 + $0xa8] ss:$0 sps:$4 sm:$0xff]  }
  0xfe   : > { %v4836_v48 = vpop.f32.mrf.mxu0  ;;  %v4908_v20 = vpop.f32.mrf.mxu1  ;;  %v3142_v57 = vsel %vm1099_vm3, %v3137_v63, %v3141_v4  ;;  %v1274_v59 = vor.u32 %v1273_v54, %v1269_v34 }
  0xff   : > { %v1267_v56 = vsel %vm1099_vm3, %v1262_v61, %v1266_v13  ;;  %v3148_v22 = vrot.slane %v3146_v41, 1  ;;  %v3160_v61 = vrot.slane %v3158_v31, 1  ;;  %v3163_v13 = vshll.u32 %v6460_v18, 16  ;;  %v6488_v31 = vld [vmem:[#allocation2 + $0xc0] sm:$0xff]  }
 0x100   : > { %v4837_v52 = vpop.f32.mrf.mxu0  ;;  %v4909_v26 = vpop.f32.mrf.mxu1 }
 0x101   : > { %v6425_v47 = vadd.f32 %v4837_v52, %v4836_v48  ;;  %v6427_v27 = vadd.f32 %v4909_v26, %v4908_v20  ;;  %v3144_v48 = vshrl.u32 %v6435_v43, 16  ;;  %v1283_v52 = vshll.u32 %v6328_v0, 16 }
 0x102   : > { %v4839_v25 = vpop.f32.mrf.mxu0  ;;  %v4911_v12 = vpop.f32.mrf.mxu1  ;;  %3589 = vmatmul.mubr.bf16.gmra.mxu0 %v6381_v15  ;;  %v3161_v54 = vor.u32 %v3160_v61, %v3156_v40  ;;  %v3165_v6 = vrot.slane %v3163_v13, 1  ;;  %v6494_v40 = vld [vmem:[#allocation2 + $0xc8] ss:$0 sps:$4 sm:$0xff]  }
 0x103   : > { %3596 = vmatprep.mubr.bf16.mxu0 %v3130_v38  ;;  %v3149_v26 = vor.u32 %v3148_v22, %v3144_v48 }
 0x104   : > { %v4840_v39 = vpop.f32.mrf.mxu0  ;;  %v4912_v51 = vpop.f32.mrf.mxu1  ;;  %2673 = vmatmul.mubr.bf16.gmra.mxu1 %v6287_v14  ;;  %v1281_v14 = vshrl.u32 %v6328_v0, 16 }
 0x105   : > { %v6437_v45 = vadd.f32 %v4840_v39, %v4839_v25  ;;  %v6441_v46 = vadd.f32 %v4912_v51, %v4911_v12  ;;  %2680 = vmatprep.mubr.bf16.mxu1 %v1267_v56  ;;  %v3153_v25 = vrot.slane %v3151_v49, 1  ;;  %v1279_v12 = vsel %vm1099_vm3, %v1274_v59, %v1278_v7 }
 0x106   : > { %v1285_v39 = vrot.slane %v1283_v52, 1  ;;  %v3168_v59 = vshrl.u32 %v6473_v58, 16 }
 0x107   : > { %v3154_v51 = vsel %vm1099_vm3, %v3149_v26, %v3153_v25 }
 0x108   : > { %v1286_v11 = vor.u32 %v1285_v39, %v1281_v14 }
 0x109   : > { %v4842_v53 = vpop.f32.mrf.mxu0 }
 0x10a   : > { %3597 = vmatmul.mubr.bf16.gmra.mxu0 %v6395_v35 }
 0x10b   : > { %v4843_v28 = vpop.f32.mrf.mxu0  ;;  %3604 = vmatprep.mubr.bf16.mxu0 %v3142_v57  ;;  %v6479_v57 = vld [vmem:[#allocation2 + $0xb8] ss:$0 sps:$4 sm:$0xff]  }
 0x10c   : > { %v6455_v20 = vadd.f32 %v4843_v28, %v4842_v53  ;;  %2681 = vmatmul.mubr.bf16.gmra.mxu1 %v6307_v44  ;;  %v1290_v53 = vrot.slane %v1288_v8, 1  ;;  %v3170_v28 = vshll.u32 %v6473_v58, 16  ;;  %v3175_v25 = vshll.u32 %v6479_v57, 16 }
 0x10d   : > { %v4845_v62 = vpop.f32.mrf.mxu0  ;;  %2688 = vmatprep.mubr.bf16.mxu1 %v1279_v12 }
 0x10e   : > { %v4914_v32 = vpop.f32.mrf.mxu1  ;;  %v1291_v49 = vsel %vm1099_vm3, %v1286_v11, %v1290_v53  ;;  %v3172_v26 = vrot.slane %v3170_v28, 1  ;;  %v3177_v8 = vrot.slane %v3175_v25, 1 }
 0x10f   : > { %v4846_v2 = vpop.f32.mrf.mxu0 }
 0x110   : > { %v6463_v33 = vadd.f32 %v4846_v2, %v4845_v62  ;;  %v4915_v38 = vpop.f32.mrf.mxu1  ;;  %v3166_v2 = vsel %vm1099_vm3, %v3161_v54, %v3165_v6  ;;  %v3173_v39 = vor.u32 %v3172_v26, %v3168_v59  ;;  %v3187_v54 = vshll.u32 %v6494_v40, 16  ;;  %v6506_v6 = vld [vmem:[#allocation2 + $0xd0] sm:$0xff]  }
 0x111   : > { %v6469_v9 = vadd.f32 %v4915_v38, %v4914_v32  ;;  %v3273_v59 = vrot.slane %v6354_v37, 1 }
 0x112   : > { %v4917_v63 = vpop.f32.mrf.mxu1  ;;  %3605 = vmatmul.mubr.bf16.gmra.mxu0 %v6413_v36  ;;  %v3178_v53 = vsel %vm1099_vm3, %v3173_v39, %v3177_v8  ;;  %v3189_v25 = vrot.slane %v3187_v54, 1  ;;  %v3280_v54 = vrot.slane %v6386_v1, 1 }
 0x113   : > { %3612 = vmatprep.mubr.bf16.mxu0 %v3154_v51  ;;  %v3182_v51 = vshll.u32 %v6488_v31, 16 }
 0x114   : > { %v4918_v41 = vpop.f32.mrf.mxu1  ;;  %2689 = vmatmul.mubr.bf16.gmra.mxu1 %v6316_v29  ;;  %v3180_v29 = vshrl.u32 %v6488_v31, 16 }
 0x115   : > { %v4848_v4 = vpop.f32.mrf.mxu0  ;;  %v6477_v56 = vadd.f32 %v4918_v41, %v4917_v63  ;;  %2696 = vmatprep.mubr.bf16.mxu1 %v1291_v49  ;;  %v3270_v49 = vrot.slane %v6338_v10, 1 }
 0x116   : > { %v4920_v48 = vpop.f32.mrf.mxu1 }
 0x117   : > { %v4849_v34 = vpop.f32.mrf.mxu0 }
 0x118   : > { %v4850_v22 = vadd.f32 %v4849_v34, %v4848_v4  ;;  %v4921_v62 = vpop.f32.mrf.mxu1  ;;  %v3184_v34 = vrot.slane %v3182_v51, 1 }
 0x119   : > { %v4851_v44 = vpop.f32.mrf.mxu0  ;;  %v6484_v7 = vadd.f32 %v4921_v62, %v4920_v48 }
 0x11a   : > { %v4923_v32 = vpop.f32.mrf.mxu1  ;;  %3613 = vmatmul.mubr.bf16.gmra.mxu0 %v6435_v43  ;;  %v3185_v26 = vor.u32 %v3184_v34, %v3180_v29  ;;  %v3279_v34 = vrot.slane %v6381_v15, 1 }
 0x11b   : > { %v4852_v52 = vpop.f32.mrf.mxu0  ;;  %3620 = vmatprep.mubr.bf16.mxu0 %v3166_v2 }
 0x11c   : > { %v4853_v14 = vadd.f32 %v4852_v52, %v4851_v44  ;;  %v4924_v12 = vpop.f32.mrf.mxu1  ;;  %2697 = vmatmul.mubr.bf16.gmra.mxu1 %v6328_v0  ;;  %v3274_v52 = vrot.slane %v6358_v42, 1  ;;  %v3192_v42 = vshrl.u32 %v6506_v6, 16  ;;  %v3190_v8 = vsel %vm1099_vm3, %v3185_v26, %v3189_v25 }
 0x11d   : > { %v6492_v38 = vadd.f32 %v4924_v12, %v4923_v32  ;;  %5334 = vmatprep.mubr.bf16.mxu1 %v6301_v30 }
 0x11e   : > { %v5240_v61 = vpop.f32.mrf.mxu1  ;;  %v4854_v13 = vpop.f32.mrf.mxu0  ;;  %v3275_v37 = vsel %vm1308_vm4, %v3273_v59, %v3274_v52 }
 0x11f   : > { %v6498_v63 = vadd.f32 %v5240_v61, %v6425_v47 }
 0x120   : > { %v2273_v4 = vpop.f32.mrf.mxu1  ;;  %v4855_v41 = vpop.f32.mrf.mxu0 }
 0x121   : > { %v6502_v11 = vadd.f32 %v6403_v19, %v2273_v4  ;;  %v4856_v28 = vadd.f32 %v4855_v41, %v4854_v13  ;;  %v3271_v19 = vrot.slane %v6344_v16, 1  ;;  %v3194_v16 = vshll.u32 %v6506_v6, 16  ;;  %v6534_v13 = vld [vmem:[#allocation2 + $0xe0] sm:$0xff]  }
 0x122   : > { %v5241_v48 = vpop.f32.mrf.mxu1  ;;  %3621 = vmatmul.mubr.bf16.gmra.mxu0 %v6453_v17  ;;  %v4857_v47 = vpop.f32.mrf.mxu0  ;;  %v3276_v41 = vrot.slane %v6367_v60, 1  ;;  %v3204_v26 = vshrl.u32 %v6534_v13, 16 }
 0x123   : > { %v6511_v44 = vadd.f32 %v5241_v48, %v6437_v45  ;;  %3628 = vmatprep.mubr.bf16.mxu0 %v3178_v53  ;;  %v6521_v45 = vld [vmem:[#allocation2 + $0xd8] ss:$0 sps:$4 sm:$0xff]   ;;  %v3272_v10 = vsel %vm1308_vm4, %v3270_v49, %v3271_v19  ;;  %v3196_v51 = vrot.slane %v3194_v16, 1 }
 0x124   : > { %v2276_v62 = vpop.f32.mrf.mxu1  ;;  %v4858_v2 = vpop.f32.mrf.mxu0  ;;  %v3199_v61 = vshll.u32 %v6521_v45, 16  ;;  %5335 = vmatmul.mubr.bf16.vlgmr.msra.gmra.mxu1 %v3272_v10 }
 0x125   : > { %v6519_v0 = vadd.f32 %v6415_v21, %v2276_v62  ;;  %v4859_v32 = vadd.f32 %v4858_v2, %v4857_v47  ;;  %5338 = vmatprep.mubr.bf16.mxu1 %v3275_v37  ;;  %v3197_v19 = vor.u32 %v3196_v51, %v3192_v42  ;;  %v6546_v62 = vld [vmem:[#allocation2 + $0xe8] ss:$0 sps:$4 sm:$0xff]   ;;  %v3281_v2 = vsel %vm1308_vm4, %v3279_v34, %v3280_v54  ;;  %v6558_v37 = vld [vmem:[#allocation2 + $0xf0] sm:$0xff]  }
 0x126   : > { %v5244_v30 = vpop.f32.mrf.mxu1  ;;  %v3201_v49 = vrot.slane %v3199_v61, 1  ;;  %v3211_v10 = vshll.u32 %v6546_v62, 16  ;;  %v3282_v51 = vrot.slane %v6395_v35, 1  ;;  %v3283_v61 = vrot.slane %v6400_v50, 1 }
 0x127   : > { %v6524_v12 = vadd.f32 %v5244_v30, %v4850_v22  ;;  %v3218_v35 = vshll.u32 %v6558_v37, 16 }
 0x128   : > { %v2289_v39 = vpop.f32.mrf.mxu1  ;;  %v3202_v16 = vsel %vm1099_vm3, %v3197_v19, %v3201_v49  ;;  %v3213_v54 = vrot.slane %v3211_v10, 1  ;;  %v3289_v10 = vrot.slane %v6444_v5, 1 }
 0x129   : > { %v6530_v21 = vadd.f32 %v6455_v20, %v2289_v39  ;;  %v3277_v20 = vrot.slane %v6372_v3, 1 }
 0x12a   : > { %v5245_v4 = vpop.f32.mrf.mxu1  ;;  %v4860_v22 = vpop.f32.mrf.mxu0  ;;  %3629 = vmatmul.mubr.bf16.gmra.mxu0 %v6473_v58 }
 0x12b   : > { %v6537_v29 = vadd.f32 %v5245_v4, %v4853_v14  ;;  %3636 = vmatprep.mubr.bf16.mxu0 %v3190_v8  ;;  %v3206_v14 = vshll.u32 %v6534_v13, 16  ;;  %v3278_v3 = vsel %vm1308_vm4, %v3276_v41, %v3277_v20  ;;  %v3286_v41 = vrot.slane %v6422_v23, 1 }
 0x12c   : > { %v2292_v53 = vpop.f32.mrf.mxu1  ;;  %v4861_v48 = vpop.f32.mrf.mxu0  ;;  %5339 = vmatmul.mubr.bf16.gmra.mxu1 %v3278_v3  ;;  %v3220_v3 = vrot.slane %v3218_v35, 1 }
 0x12d   : > { %v6544_v47 = vadd.f32 %v6463_v33, %v2292_v53  ;;  %v4862_v59 = vadd.f32 %v4861_v48, %v4860_v22  ;;  %v3208_v30 = vrot.slane %v3206_v14, 1  ;;  %5342 = vmatprep.mubr.bf16.mxu1 %v3281_v2  ;;  %v3285_v22 = vrot.slane %v6413_v36, 1  ;;  %v6569_v48 = vld [vmem:[#allocation2 + $0xf8] ss:$0 sps:$4 sm:$0xff]  }
 0x12e   : > { %v5248_v60 = vpop.f32.mrf.mxu1  ;;  %v4863_v52 = vpop.f32.mrf.mxu0  ;;  %v3284_v14 = vsel %vm1308_vm4, %v3282_v51, %v3283_v61  ;;  %v3216_v36 = vshrl.u32 %v6558_v37, 16  ;;  %v3223_v2 = vshll.u32 %v6569_v48, 16 }
 0x12f   : > { %v6551_v15 = vadd.f32 %v5248_v60, %v4862_v59  ;;  %v3209_v34 = vor.u32 %v3208_v30, %v3204_v26  ;;  %v3287_v59 = vsel %vm1308_vm4, %v3285_v22, %v3286_v41  ;;  %v3288_v30 = vrot.slane %v6435_v43, 1  ;;  %v6588_v41 = vld [vmem:[#allocation2 + $0x108] ss:$0 sps:$4 sm:$0xff]  }
 0x130   : > { %v2305_v1 = vpop.f32.mrf.mxu1  ;;  %v4864_v33 = vpop.f32.mrf.mxu0  ;;  %v3225_v22 = vrot.slane %v3223_v2, 1  ;;  %v3295_v2 = vrot.slane %v6479_v57, 1 }
 0x131   : > { %v6554_v25 = vadd.f32 %v4856_v28, %v2305_v1  ;;  %v4865_v39 = vadd.f32 %v4864_v33, %v4863_v52  ;;  %v6579_v1 = vld [vmem:[#allocation2 + $0x100] sm:$0xff]   ;;  %v3290_v5 = vsel %vm1308_vm4, %v3288_v30, %v3289_v10 }
 0x132   : > { %v5249_v42 = vpop.f32.mrf.mxu1  ;;  %v4866_v8 = vpop.f32.mrf.mxu0  ;;  %3637 = vmatmul.mubr.bf16.gmra.mxu0 %v6488_v31 }
 0x133   : > { %v6563_v28 = vadd.f32 %v5249_v42, %v4865_v39  ;;  %3644 = vmatprep.mubr.bf16.mxu0 %v3202_v16  ;;  %v3291_v42 = vrot.slane %v6453_v17, 1 }
 0x134   : > { %v2308_v4 = vpop.f32.mrf.mxu1  ;;  %v4867_v20 = vpop.f32.mrf.mxu0  ;;  %5343 = vmatmul.mubr.bf16.gmra.mxu1 %v3284_v14 }
 0x135   : > { %v6567_v53 = vadd.f32 %v4859_v32, %v2308_v4  ;;  %v4868_v19 = vadd.f32 %v4867_v20, %v4866_v8  ;;  %v3214_v32 = vsel %vm1099_vm3, %v3209_v34, %v3213_v54  ;;  %5346 = vmatprep.mubr.bf16.mxu1 %v3287_v59  ;;  %v3292_v8 = vrot.slane %v6460_v18, 1 }
 0x136   : > { %v5252_v49 = vpop.f32.mrf.mxu1  ;;  %v4869_v50 = vpop.f32.mrf.mxu0  ;;  %v3221_v4 = vor.u32 %v3220_v3, %v3216_v36  ;;  %v3230_v20 = vshll.u32 %v6579_v1, 16  ;;  %v3235_v59 = vshll.u32 %v6588_v41, 16 }
 0x137   : > { %v3293_v17 = vsel %vm1308_vm4, %v3291_v42, %v3292_v8  ;;  %v6607_v42 = vld [vmem:[#allocation2 + $0x118] ss:$0 sps:$4 sm:$0xff]  }
 0x138   : > { %v2321_v60 = vpop.f32.mrf.mxu1  ;;  %v4870_v23 = vpop.f32.mrf.mxu0  ;;  %v3226_v18 = vsel %vm1099_vm3, %v3221_v4, %v3225_v22  ;;  %v3232_v14 = vrot.slane %v3230_v20, 1 }
 0x139   : > { %v6575_v52 = vadd.f32 %v4868_v19, %v2321_v60  ;;  %v4871_v26 = vadd.f32 %v4870_v23, %v4869_v50  ;;  %v3228_v50 = vshrl.u32 %v6579_v1, 16  ;;  %v6598_v60 = vld [vmem:[#allocation2 + $0x110] sm:$0xff]  }
 0x13a   : > { %v5253_v33 = vpop.f32.mrf.mxu1  ;;  %v4872_v16 = vpop.f32.mrf.mxu0  ;;  %3645 = vmatmul.mubr.bf16.gmra.mxu0 %v6506_v6  ;;  %v3242_v8 = vshll.u32 %v6598_v60, 16 }
 0x13b   : > { %3652 = vmatprep.mubr.bf16.mxu0 %v3214_v32  ;;  %v3233_v10 = vor.u32 %v3232_v14, %v3228_v50  ;;  %v3300_v50 = vrot.slane %v6506_v6, 1  ;;  %v3301_v14 = vrot.slane %v6521_v45, 1 }
 0x13c   : > { %v2324_v39 = vpop.f32.mrf.mxu1  ;;  %v4873_v51 = vpop.f32.mrf.mxu0  ;;  %5347 = vmatmul.mubr.bf16.gmra.mxu1 %v3290_v5 }
 0x13d   : > { %v6586_v61 = vadd.f32 %v4871_v26, %v2324_v39  ;;  %v4874_v34 = vadd.f32 %v4873_v51, %v4872_v16  ;;  %5350 = vmatprep.mubr.bf16.mxu1 %v3293_v17  ;;  %v3297_v26 = vrot.slane %v6488_v31, 1  ;;  %v3298_v16 = vrot.slane %v6494_v40, 1 }
 0x13e   : > { %v4875_v54 = vpop.f32.mrf.mxu0  ;;  %v5256_v43 = vpop.f32.mrf.mxu1  ;;  %v3237_v39 = vrot.slane %v3235_v59, 1  ;;  %v3240_v40 = vshrl.u32 %v6598_v60, 16 }
 0x13f   : > { %v6592_v35 = vadd.f32 %v5252_v49, %v4874_v34  ;;  %v3294_v49 = vrot.slane %v6473_v58, 1  ;;  %v3299_v57 = vsel %vm1308_vm4, %v3297_v26, %v3298_v16  ;;  %v3244_v34 = vrot.slane %v3242_v8, 1 }
 0x140   : > { %v4876_v19 = vpop.f32.mrf.mxu0  ;;  %v2337_v32 = vpop.f32.mrf.mxu1  ;;  %v3238_v31 = vsel %vm1099_vm3, %v3233_v10, %v3237_v39  ;;  %v3302_v16 = vsel %vm1308_vm4, %v3300_v50, %v3301_v14  ;;  %v3312_v14 = vrot.slane %v6598_v60, 1 }
 0x141   : > { %v4877_v36 = vadd.f32 %v4876_v19, %v4875_v54  ;;  %v3247_v54 = vshll.u32 %v6607_v42, 16 }
 0x142   : > { %v4878_v23 = vpop.f32.mrf.mxu0  ;;  %3653 = vmatmul.mubr.bf16.gmra.mxu0 %v6534_v13  ;;  %v5257_v4 = vpop.f32.mrf.mxu1 }
 0x143   : > { %v6602_v3 = vadd.f32 %v5253_v33, %v4877_v36  ;;  %3660 = vmatprep.mubr.bf16.mxu0 %v3226_v18  ;;  %v3296_v33 = vsel %vm1308_vm4, %v3294_v49, %v3295_v2  ;;  %v3303_v36 = vrot.slane %v6534_v13, 1  ;;  %v3245_v49 = vor.u32 %v3244_v34, %v3240_v40 }
 0x144   : > { %v4879_v30 = vpop.f32.mrf.mxu0  ;;  %5351 = vmatmul.mubr.bf16.gmra.mxu1 %v3296_v33  ;;  %v2340_v17 = vpop.f32.mrf.mxu1 }
 0x145   : > { %v4880_v51 = vadd.f32 %v4879_v30, %v4878_v23  ;;  %5354 = vmatprep.mubr.bf16.mxu1 %v3299_v57  ;;  %v3304_v23 = vrot.slane %v6546_v62, 1  ;;  %v3306_v62 = vrot.slane %v6558_v37, 1  ;;  %v3309_v57 = vrot.slane %v6579_v1, 1 }
 0x146   : > { %v4881_v58 = vpop.f32.mrf.mxu0 }
 0x147   : > { %v6611_v22 = vadd.f32 %v4880_v51, %v2337_v32  ;;  %v3249_v32 = vrot.slane %v3247_v54, 1  ;;  %v3305_v39 = vsel %vm1308_vm4, %v3303_v36, %v3304_v23 }
 0x148   : > { %v4882_v20 = vpop.f32.mrf.mxu0 }
 0x149   : > { %v4883_v5 = vadd.f32 %v4882_v20, %v4881_v58  ;;  %v3250_v6 = vsel %vm1099_vm3, %v3245_v49, %v3249_v32  ;;  %v3307_v58 = vrot.slane %v6569_v48, 1  ;;  %v3310_v20 = vrot.slane %v6588_v41, 1 }
 0x14a   : > { %v4884_v19 = vpop.f32.mrf.mxu0  ;;  %3661 = vmatmul.mubr.bf16.gmra.mxu0 %v6558_v37 }
 0x14b   : > { %v6618_v18 = vadd.f32 %v4883_v5, %v2340_v17  ;;  %3668 = vmatprep.mubr.bf16.mxu0 %v3238_v31  ;;  %v5260_v8 = vpop.f32.mrf.mxu1  ;;  %v3308_v54 = vsel %vm1308_vm4, %v3306_v62, %v3307_v58  ;;  %v3311_v37 = vsel %vm1308_vm4, %v3309_v57, %v3310_v20 }
 0x14c   : > { %v4885_v59 = vpop.f32.mrf.mxu0  ;;  %5355 = vmatmul.mubr.bf16.gmra.mxu1 %v3302_v16 }
 0x14d   : > { %v4886_v2 = vadd.f32 %v4885_v59, %v4884_v19  ;;  %5358 = vmatprep.mubr.bf16.mxu1 %v3305_v39  ;;  %v3313_v59 = vrot.slane %v6607_v42, 1 }
 0x14e   : > { %v4887_v26 = vpop.f32.mrf.mxu0 }
 0x14f   : > { %v6625_v30 = vadd.f32 %v5256_v43, %v4886_v2  ;;  %v2353_v43 = vpop.f32.mrf.mxu1 }
 0x150   : > { %v4888_v10 = vpop.f32.mrf.mxu0 }
 0x151   : > { %v4889_v45 = vadd.f32 %v4888_v10, %v4887_v26  ;;  %v5261_v40 = vpop.f32.mrf.mxu1 }
 0x152   : > { %v4890_v51 = vpop.f32.mrf.mxu0  ;;  %3669 = vmatmul.mubr.bf16.gmra.mxu0 %v6579_v1 }
 0x153   : > { %v6630_v13 = vadd.f32 %v5257_v4, %v4889_v45  ;;  %3676 = vmatprep.mubr.bf16.mxu0 %v3250_v6  ;;  %v2356_v4 = vpop.f32.mrf.mxu1 }
 0x154   : > { %v4891_v33 = vpop.f32.mrf.mxu0  ;;  %5359 = vmatmul.mubr.bf16.gmra.mxu1 %v3308_v54 }
 0x155   : > { %v4892_v31 = vadd.f32 %v4891_v33, %v4890_v51  ;;  %v5264_v48 = vpop.f32.mrf.mxu1  ;;  %5362 = vmatprep.mubr.bf16.mxu1 %v3311_v37 }
 0x156   : > { %v4893_v34 = vpop.f32.mrf.mxu0  ;;  %v6642_v1 = vadd.f32 %v5264_v48, %v6427_v27  ;;  %v3314_v27 = vsel %vm1308_vm4, %v3312_v14, %v3313_v59 }
 0x157   : > { %v6637_v5 = vadd.f32 %v4892_v31, %v2353_v43  ;;  %v2369_v36 = vpop.f32.mrf.mxu1 }
 0x158   : > { %v4894_v17 = vpop.f32.mrf.mxu0  ;;  %v6649_v49 = vadd.f32 %v6405_v55, %v2369_v36 }
 0x159   : > { %v4895_v19 = vadd.f32 %v4894_v17, %v4893_v34  ;;  %v5265_v2 = vpop.f32.mrf.mxu1 }
 0x15a   : > { %v4896_v50 = vpop.f32.mrf.mxu0  ;;  %3677 = vmatmul.mubr.bf16.gmra.mxu0 %v6598_v60  ;;  %v6652_v16 = vadd.f32 %v5265_v2, %v6441_v46 }
 0x15b   : > { %v6644_v41 = vadd.f32 %v4895_v19, %v2356_v4  ;;  %v2372_v39 = vpop.f32.mrf.mxu1 }
 0x15c   : > { %v4897_v23 = vpop.f32.mrf.mxu0  ;;  %v6658_v60 = vadd.f32 %v6419_v24, %v2372_v39  ;;  %5363 = vmatmul.mubr.bf16.gmra.mxu1 %v3314_v27 }
 0x15d   : > { %v4898_v32 = vadd.f32 %v4897_v23, %v4896_v50  ;;  %v5268_v45 = vpop.f32.mrf.mxu1 }
 0x15e   : > { %v4899_v26 = vpop.f32.mrf.mxu0  ;;  %v6661_v51 = vadd.f32 %v5268_v45, %v6484_v7 }
 0x15f   : > { %v6655_v10 = vadd.f32 %v5260_v8, %v4898_v32  ;;  %v2385_v46 = vpop.f32.mrf.mxu1 }
 0x160   : > { %v4900_v6 = vpop.f32.mrf.mxu0  ;;  %v6666_v43 = vadd.f32 %v6469_v9, %v2385_v46 }
 0x161   : > { %v4901_v42 = vadd.f32 %v4900_v6, %v4899_v26  ;;  %v5269_v8 = vpop.f32.mrf.mxu1 }
 0x162   : > { %v5288_v55 = vpop.f32.mrf.mxu0  ;;  %v6669_v57 = vadd.f32 %v5269_v8, %v6492_v38 }
 0x163   : > { %v6663_v62 = vadd.f32 %v5261_v40, %v4901_v42  ;;  %v2388_v24 = vpop.f32.mrf.mxu1 }
 0x164   : > { %v2739_v58 = vpop.f32.mrf.mxu0  ;;  %7079 = vst [vmem:[#allocation3_spill] sm:$0xff] %v6669_v57  ;;  %v6672_v31 = vadd.f32 %v6477_v56, %v2388_v24 }
 0x165   : > { %v4966_v34 = vpop.f32.mrf.mxu1 }
 0x166   : > { %v5289_v33 = vpop.f32.mrf.mxu0 }
 0x167   : > { %v4967_v54 = vpop.f32.mrf.mxu1 }
 0x168   : > { %v2742_v20 = vpop.f32.mrf.mxu0  ;;  %v4968_v4 = vadd.f32 %v4967_v54, %v4966_v34 }
 0x169   : > { %v4969_v17 = vpop.f32.mrf.mxu1 }
 0x16a   : > { %v5292_v7 = vpop.f32.mrf.mxu0  ;;  %v2579_v9 = vadd.f32 %v4968_v4, %v6502_v11 }
 0x16b   : > { %v4970_v19 = vpop.f32.mrf.mxu1 }
 0x16c   : > { %v2755_v40 = vpop.f32.mrf.mxu0  ;;  %v6675_v50 = vadd.f32 %v2739_v58, %v2579_v9  ;;  %v4971_v38 = vadd.f32 %v4970_v19, %v4969_v17 }
 0x16d   : > { %v4972_v14 = vpop.f32.mrf.mxu1 }
 0x16e   : > { %v5293_v37 = vpop.f32.mrf.mxu0  ;;  %v2582_v56 = vadd.f32 %v4971_v38, %v6519_v0 }
 0x16f   : > { %v4973_v36 = vpop.f32.mrf.mxu1 }
 0x170   : > { %v2758_v48 = vpop.f32.mrf.mxu0  ;;  %v6680_v32 = vadd.f32 %v2742_v20, %v2582_v56  ;;  %v4974_v2 = vadd.f32 %v4973_v36, %v4972_v14 }
 0x171   : > { %v4975_v26 = vpop.f32.mrf.mxu1 }
 0x172   : > { %v6677_v59 = vpop.f32.mrf.mxu0  ;;  %v2587_v11 = vadd.f32 %v4974_v2, %v6498_v63 }
 0x173   : > { %v4976_v39 = vpop.f32.mrf.mxu1 }
 0x174   : > { %v2771_v23 = vpop.f32.mrf.mxu0  ;;  %v4977_v42 = vadd.f32 %v4976_v39, %v4975_v26  ;;  %v6685_v45 = vadd.f32 %v5288_v55, %v2587_v11 }
 0x175   : > { %v4978_v46 = vpop.f32.mrf.mxu1 }
 0x176   : > { %v6682_v27 = vpop.f32.mrf.mxu0  ;;  %v2590_v0 = vadd.f32 %v4977_v42, %v6511_v44 }
 0x177   : > { %v4979_v8 = vpop.f32.mrf.mxu1 }
 0x178   : > { %v2774_v6 = vpop.f32.mrf.mxu0  ;;  %v4980_v20 = vadd.f32 %v4979_v8, %v4978_v46  ;;  %v6692_v34 = vadd.f32 %v5289_v33, %v2590_v0 }
 0x179   : > { %v4981_v54 = vpop.f32.mrf.mxu1 }
 0x17a   : > { %v6687_v58 = vpop.f32.mrf.mxu0  ;;  %v2595_v63 = vadd.f32 %v4980_v20, %v6530_v21 }
 0x17b   : > { %v4982_v17 = vpop.f32.mrf.mxu1 }
 0x17c   : > { %v6690_v24 = vpop.f32.mrf.mxu0  ;;  %v4983_v55 = vadd.f32 %v4982_v17, %v4981_v54  ;;  %v6699_v19 = vadd.f32 %v2755_v40, %v2595_v63 }
 0x17d   : > { %v4984_v38 = vpop.f32.mrf.mxu1 }
 0x17e   : > { %v6694_v4 = vpop.f32.mrf.mxu0  ;;  %v2598_v44 = vadd.f32 %v4983_v55, %v6544_v47 }
 0x17f   : > { %v4985_v56 = vpop.f32.mrf.mxu1 }
 0x180   : > { %v6697_v9 = vpop.f32.mrf.mxu0  ;;  %v4986_v33 = vadd.f32 %v4985_v56, %v4984_v38  ;;  %v6706_v2 = vadd.f32 %v2758_v48, %v2598_v44 }
 0x181   : > { %v4987_v26 = vpop.f32.mrf.mxu1 }
 0x182   : > { %v6701_v14 = vpop.f32.mrf.mxu0  ;;  %v2603_v21 = vadd.f32 %v4986_v33, %v6524_v12 }
 0x183   : > { %v4988_v39 = vpop.f32.mrf.mxu1 }
 0x184   : > { %v6704_v36 = vpop.f32.mrf.mxu0  ;;  %v4989_v40 = vadd.f32 %v4988_v39, %v4987_v26  ;;  %v6713_v46 = vadd.f32 %v5292_v7, %v2603_v21 }
 0x185   : > { %v4990_v0 = vpop.f32.mrf.mxu1 }
 0x186   : > { %v6708_v11 = vpop.f32.mrf.mxu0  ;;  %v2606_v47 = vadd.f32 %v4989_v40, %v6537_v29 }
 0x187   : > { %v4991_v20 = vpop.f32.mrf.mxu1 }
 0x188   : > { %v6711_v42 = vpop.f32.mrf.mxu0  ;;  %v4992_v48 = vadd.f32 %v4991_v20, %v4990_v0  ;;  %v6720_v63 = vadd.f32 %v5293_v37, %v2606_v47 }
 0x189   : > { %v4993_v17 = vpop.f32.mrf.mxu1 }
 0x18a   : > { %v6715_v8 = vpop.f32.mrf.mxu0  ;;  %v2611_v12 = vadd.f32 %v4992_v48, %v6554_v25 }
 0x18b   : > { %v4994_v38 = vpop.f32.mrf.mxu1 }
 0x18c   : > { %v6718_v54 = vpop.f32.mrf.mxu0  ;;  %v4995_v7 = vadd.f32 %v4994_v38, %v4993_v17  ;;  %v6727_v56 = vadd.f32 %v2771_v23, %v2611_v12 }
 0x18d   : > { %v4996_v33 = vpop.f32.mrf.mxu1 }
 0x18e   : > { %v6722_v55 = vpop.f32.mrf.mxu0  ;;  %v2614_v29 = vadd.f32 %v4995_v7, %v6567_v53 }
 0x18f   : > { %v4997_v21 = vpop.f32.mrf.mxu1 }
 0x190   : > { %v6725_v44 = vpop.f32.mrf.mxu0  ;;  %v4998_v37 = vadd.f32 %v4997_v21, %v4996_v33  ;;  %v6734_v40 = vadd.f32 %v2774_v6, %v2614_v29 }
 0x191   : > { %v4999_v0 = vpop.f32.mrf.mxu1 }
 0x192   : > { %v6729_v26 = vpop.f32.mrf.mxu0  ;;  %v2619_v25 = vadd.f32 %v4998_v37, %v6551_v15 }
 0x193   : > { %7080 = vst [vmem:[#allocation4_spill] sm:$0xff] %v6729_v26  ;;  %v5000_v20 = vpop.f32.mrf.mxu1 }
 0x194   : > { %v6732_v39 = vpop.f32.mrf.mxu0  ;;  %v5001_v23 = vadd.f32 %v5000_v20, %v4999_v0  ;;  %v6742_v17 = vadd.f32 %v6677_v59, %v2619_v25 }
 0x195   : > { %v5002_v12 = vpop.f32.mrf.mxu1 }
 0x196   : > { %v6736_v47 = vpop.f32.mrf.mxu0  ;;  %v2622_v38 = vadd.f32 %v5001_v23, %v6563_v28 }
 0x197   : > { %7081 = vst [vmem:[#allocation5_spill] sm:$0xff] %v6736_v47  ;;  %v5003_v7 = vpop.f32.mrf.mxu1 }
 0x198   : > { %v6739_v48 = vpop.f32.mrf.mxu0  ;;  %v5004_v33 = vadd.f32 %v5003_v7, %v5002_v12  ;;  %v6750_v29 = vadd.f32 %v6682_v27, %v2622_v38 }
 0x199   : > { %v5005_v15 = vpop.f32.mrf.mxu1 }
 0x19a   : > { %v6744_v53 = vpop.f32.mrf.mxu0  ;;  %v2627_v37 = vadd.f32 %v5004_v33, %v6575_v52 }
 0x19b   : > { %7082 = vst [vmem:[#allocation6_spill] sm:$0xff] %v6744_v53  ;;  %v5006_v0 = vpop.f32.mrf.mxu1 }
 0x19c   : > { %v6747_v6 = vpop.f32.mrf.mxu0  ;;  %v5007_v25 = vadd.f32 %v5006_v0, %v5005_v15  ;;  %v6758_v20 = vadd.f32 %v6690_v24, %v2627_v37 }
 0x19d   : > { %7083 = vst [vmem:[#allocation7_spill] sm:$0xff] %v6747_v6  ;;  %v5008_v28 = vpop.f32.mrf.mxu1 }
 0x19e   : > { %v6752_v21 = vpop.f32.mrf.mxu0  ;;  %v2630_v53 = vadd.f32 %v5007_v25, %v6586_v61 }
 0x19f   : > { %7084 = vst [vmem:[#allocation8_spill] sm:$0xff] %v6752_v21  ;;  %v5009_v12 = vpop.f32.mrf.mxu1 }
 0x1a0   : > { %v6755_v59 = vpop.f32.mrf.mxu0  ;;  %v5010_v27 = vadd.f32 %v5009_v12, %v5008_v28  ;;  %v6764_v21 = vadd.f32 %v6697_v9, %v2630_v53 }
 0x1a1   : > { %7085 = vst [vmem:[#allocation9_spill] sm:$0xff] %v6755_v59  ;;  %v5011_v52 = vpop.f32.mrf.mxu1 }
 0x1a2   : > { %v5102_v23 = vpop.f32.mrf.mxu0  ;;  %v2635_v59 = vadd.f32 %v5010_v27, %v6592_v35 }
 0x1a3   : > { %v5012_v15 = vpop.f32.mrf.mxu1 }
 0x1a4   : > { %v5103_v7 = vpop.f32.mrf.mxu0  ;;  %v5013_v24 = vadd.f32 %v5012_v15, %v5011_v52  ;;  %v6770_v6 = vadd.f32 %v6687_v58, %v2635_v59 }
 0x1a5   : > { %v6761_v38 = vadd.f32 %v5103_v7, %v5102_v23  ;;  %v5014_v61 = vpop.f32.mrf.mxu1 }
 0x1a6   : > { %v5105_v33 = vpop.f32.mrf.mxu0  ;;  %v2638_v28 = vadd.f32 %v5013_v24, %v6602_v3 }
 0x1a7   : > { %v5015_v23 = vpop.f32.mrf.mxu1 }
 0x1a8   : > { %v5106_v0 = vpop.f32.mrf.mxu0  ;;  %v5016_v53 = vadd.f32 %v5015_v23, %v5014_v61  ;;  %v6778_v12 = vadd.f32 %v6694_v4, %v2638_v28 }
 0x1a9   : > { %v6767_v37 = vadd.f32 %v5106_v0, %v5105_v33  ;;  %v5017_v35 = vpop.f32.mrf.mxu1 }
 0x1aa   : > { %v6772_v25 = vpop.f32.mrf.mxu0  ;;  %v2643_v27 = vadd.f32 %v5016_v53, %v6611_v22 }
 0x1ab   : > { %v5018_v52 = vpop.f32.mrf.mxu1 }
 0x1ac   : > { %v6775_v9 = vpop.f32.mrf.mxu0  ;;  %v5019_v59 = vadd.f32 %v5018_v52, %v5017_v35  ;;  %v6786_v33 = vadd.f32 %v6704_v36, %v2643_v27 }
 0x1ad   : > { %v5020_v3 = vpop.f32.mrf.mxu1 }
 0x1ae   : > { %v6780_v7 = vpop.f32.mrf.mxu0  ;;  %7086 = vst [vmem:[#allocation10_spill] sm:$0xff] %v6786_v33  ;;  %v2646_v0 = vadd.f32 %v5019_v59, %v6618_v18 }
 0x1af   : > { %v5021_v24 = vpop.f32.mrf.mxu1 }
 0x1b0   : > { %v6783_v58 = vpop.f32.mrf.mxu0  ;;  %v5022_v61 = vadd.f32 %v5021_v24, %v5020_v3  ;;  %v6794_v28 = vadd.f32 %v6711_v42, %v2646_v0 }
 0x1b1   : > { %v5023_v22 = vpop.f32.mrf.mxu1 }
 0x1b2   : > { %v6788_v15 = vpop.f32.mrf.mxu0  ;;  %7087 = vst [vmem:[#allocation11_spill] sm:$0xff] %v6794_v28  ;;  %v2651_v53 = vadd.f32 %v5022_v61, %v6625_v30 }
 0x1b3   : > { %v5024_v35 = vpop.f32.mrf.mxu1 }
 0x1b4   : > { %v6791_v4 = vpop.f32.mrf.mxu0  ;;  %v5025_v27 = vadd.f32 %v5024_v35, %v5023_v22  ;;  %v6802_v52 = vadd.f32 %v6701_v14, %v2651_v53 }
 0x1b5   : > { %v5026_v18 = vpop.f32.mrf.mxu1 }
 0x1b6   : > { %v6796_v23 = vpop.f32.mrf.mxu0  ;;  %7088 = vst [vmem:[#allocation12_spill] sm:$0xff] %v6802_v52  ;;  %v2654_v3 = vadd.f32 %v5025_v27, %v6630_v13 }
 0x1b7   : > { %v5027_v24 = vpop.f32.mrf.mxu1 }
 0x1b8   : > { %v6799_v36 = vpop.f32.mrf.mxu0  ;;  %v5028_v0 = vadd.f32 %v5027_v24, %v5026_v18  ;;  %v6810_v57 = vadd.f32 %v6708_v11, %v2654_v3 }
 0x1b9   : > { %v5029_v30 = vpop.f32.mrf.mxu1 }
 0x1ba   : > { %v6804_v59 = vpop.f32.mrf.mxu0  ;;  %7089 = vst [vmem:[#allocation13_spill] sm:$0xff] %v6810_v57  ;;  %v2659_v22 = vadd.f32 %v5028_v0, %v6637_v5 }
 0x1bb   : > { %v5030_v35 = vpop.f32.mrf.mxu1 }
 0x1bc   : > { %v6807_v42 = vpop.f32.mrf.mxu0  ;;  %v5031_v53 = vadd.f32 %v5030_v35, %v5029_v30  ;;  %v6818_v47 = vadd.f32 %v6718_v54, %v2659_v22 }
 0x1bd   : > { %v5032_v13 = vpop.f32.mrf.mxu1 }
 0x1be   : > { %v6812_v61 = vpop.f32.mrf.mxu0  ;;  %7090 = vst [vmem:[#allocation14_spill] sm:$0xff] %v6818_v47  ;;  %v2662_v18 = vadd.f32 %v5031_v53, %v6644_v41 }
 0x1bf   : > { %v5033_v24 = vpop.f32.mrf.mxu1 }
 0x1c0   : > { %v6815_v14 = vpop.f32.mrf.mxu0  ;;  %v5034_v3 = vadd.f32 %v5033_v24, %v5032_v13  ;;  %v6826_v26 = vadd.f32 %v6725_v44, %v2662_v18 }
 0x1c1   : > { %v5035_v5 = vpop.f32.mrf.mxu1 }
 0x1c2   : > { %v6820_v27 = vpop.f32.mrf.mxu0  ;;  %7091 = vst [vmem:[#allocation15_spill] sm:$0xff] %v6826_v26  ;;  %v2667_v30 = vadd.f32 %v5034_v3, %v6655_v10 }
 0x1c3   : > { %v5036_v35 = vpop.f32.mrf.mxu1 }
 0x1c4   : > { %v6823_v11 = vpop.f32.mrf.mxu0  ;;  %v5037_v22 = vadd.f32 %v5036_v35, %v5035_v5  ;;  %v6834_v47 = vadd.f32 %v6715_v8, %v2667_v30 }
 0x1c5   : > { %v5038_v41 = vpop.f32.mrf.mxu1 }
 0x1c6   : > { %v6828_v0 = vpop.f32.mrf.mxu0  ;;  %7092 = vst [vmem:[#allocation16_spill] sm:$0xff] %v6834_v47  ;;  %v2670_v13 = vadd.f32 %v5037_v22, %v6663_v62 }
 0x1c7   : > { %v5039_v24 = vpop.f32.mrf.mxu1 }
 0x1c8   : > { %v6831_v54 = vpop.f32.mrf.mxu0  ;;  %v5040_v18 = vadd.f32 %v5039_v24, %v5038_v41  ;;  %v6842_v26 = vadd.f32 %v6722_v55, %v2670_v13 }
 0x1c9   : > { %v5041_v10 = vpop.f32.mrf.mxu1 }
 0x1ca   : > { %v6836_v53 = vpop.f32.mrf.mxu0  ;;  %7093 = vst [vmem:[#allocation17_spill] sm:$0xff] %v6842_v26  ;;  %v2675_v5 = vadd.f32 %v5040_v18, %v6649_v49 }
 0x1cb   : > { %v5042_v35 = vpop.f32.mrf.mxu1 }
 0x1cc   : > { %v6839_v44 = vpop.f32.mrf.mxu0  ;;  %v5043_v30 = vadd.f32 %v5042_v35, %v5041_v10  ;;  %v6850_v47 = vadd.f32 %v6732_v39, %v2675_v5 }
 0x1cd   : > { %v5044_v62 = vpop.f32.mrf.mxu1 }
 0x1ce   : > { %v6844_v3 = vpop.f32.mrf.mxu0  ;;  %7094 = vst [vmem:[#allocation18_spill] sm:$0xff] %v6850_v47  ;;  %v2678_v41 = vadd.f32 %v5043_v30, %v6658_v60 }
 0x1cf   : > { %v5045_v24 = vpop.f32.mrf.mxu1 }
 0x1d0   : > { %v6847_v8 = vpop.f32.mrf.mxu0  ;;  %v5046_v13 = vadd.f32 %v5045_v24, %v5044_v62  ;;  %v6858_v26 = vadd.f32 %v6739_v48, %v2678_v41 }
 0x1d1   : > { %v5047_v49 = vpop.f32.mrf.mxu1 }
 0x1d2   : > { %v6852_v22 = vpop.f32.mrf.mxu0  ;;  %7095 = vst [vmem:[#allocation19_spill] sm:$0xff] %v6858_v26  ;;  %v6863_v10 = vadd.f32 %v5046_v13, %v6642_v1 }
 0x1d3   : > { %v5048_v39 = vpop.f32.mrf.mxu1 }
 0x1d4   : > { %v6855_v55 = vpop.f32.mrf.mxu0  ;;  %7096 = vst [vmem:[#allocation20_spill] sm:$0xff] %v6863_v10  ;;  %v5049_v35 = vadd.f32 %v5048_v39, %v5047_v49 }
 0x1d5   : > { %v5050_v47 = vpop.f32.mrf.mxu1 }
 0x1d6   : > { %v6860_v18 = vpop.f32.mrf.mxu0  ;;  %v6870_v60 = vadd.f32 %v5049_v35, %v6652_v16 }
 0x1d7   : > { %v5051_v30 = vpop.f32.mrf.mxu1 }
 0x1d8   : > { %v6865_v5 = vpop.f32.mrf.mxu0  ;;  %7097 = vst [vmem:[#allocation21_spill] sm:$0xff] %v6870_v60  ;;  %v5052_v48 = vadd.f32 %v5051_v30, %v5050_v47 }
 0x1d9   : > { %v5053_v41 = vpop.f32.mrf.mxu1 }
 0x1da   : > { %v6867_v28 = vpop.f32.mrf.mxu0  ;;  %v6877_v1 = vadd.f32 %v5052_v48, %v6666_v43 }
 0x1db   : > { %v5054_v13 = vpop.f32.mrf.mxu1 }
 0x1dc   : > { %v6872_v62 = vpop.f32.mrf.mxu0  ;;  %7098 = vst [vmem:[#allocation22_spill] sm:$0xff] %v6877_v1  ;;  %v5055_v49 = vadd.f32 %v5054_v13, %v5053_v41 }
 0x1dd   : > { %v5056_v39 = vpop.f32.mrf.mxu1 }
 0x1de   : > { %v6874_v24 = vpop.f32.mrf.mxu0  ;;  %v6884_v16 = vadd.f32 %v5055_v49, %v6672_v31  ;;  %v5110_v31 = vadd.f32 %v6775_v9, %v6772_v25 }
 0x1df   : > { %v5057_v35 = vpop.f32.mrf.mxu1 }
 0x1e0   : > { %v6879_v26 = vpop.f32.mrf.mxu0  ;;  %7099 = vst [vmem:[#allocation23_spill] sm:$0xff] %v6884_v16  ;;  %v5058_v47 = vadd.f32 %v5057_v35, %v5056_v39  ;;  %v5113_v35 = vadd.f32 %v6783_v58, %v6780_v7  ;;  %v5122_v7 = vadd.f32 %v6807_v42, %v6804_v59 }
 0x1e1   : > { %v6888_v30 = vpop.f32.mrf.mxu1 }
 0x1e2   : > { %v6881_v10 = vpop.f32.mrf.mxu0  ;;  %7100 = vst [vmem:[#allocation24_spill] sm:$0xff] %v6888_v30  ;;  %v6893_v43 = vadd.f32 %v5058_v47, %v6661_v51 }
 0x1e3   : > { %v6895_v48 = vpop.f32.mrf.mxu1 }
 0x1e4   : > { %v6886_v60 = vpop.f32.mrf.mxu0  ;;  %7101 = vst [vmem:[#allocation25_spill] sm:$0xff] %v6893_v43  ;;  %7102 = vst [vmem:[#allocation26_spill] sm:$0xff] %v6895_v48 }
 0x1e5   : > { %v5336_v13 = vpop.f32.mrf.mxu1 }
 0x1e6   : > { %v6890_v57 = vpop.f32.mrf.mxu0  ;;  %v3728_v16 = vadd.f32 %v5336_v13, %v5110_v31 }
 0x1e7   : > { %v3719_v49 = vpop.f32.mrf.mxu1 }
 0x1e8   : > { %v6897_v41 = vpop.f32.mrf.mxu0  ;;  %v3720_v51 = vadd.f32 %v6761_v38, %v3719_v49  ;;  %v3848_v25 = vadd.f32 %v3728_v16, %v6685_v45  ;;  %v5119_v49 = vadd.f32 %v6799_v36, %v6796_v23 }
 0x1e9   : > { %7103 = vst [vmem:[#allocation27_spill] sm:$0xff] %v6897_v41  ;;  %v5337_v47 = vpop.f32.mrf.mxu1 }
 0x1ea   : > { %v6899_v1 = vpop.f32.mrf.mxu0  ;;  %v3846_v48 = vadd.f32 %v3720_v51, %v6675_v50  ;;  %v3731_v30 = vadd.f32 %v5337_v47, %v5113_v35 }
 0x1eb   : > { %v3722_v52 = vpop.f32.mrf.mxu1 }
 0x1ec   : > { %v6903_v39 = vpop.f32.mrf.mxu0  ;;  %v3849_v9 = vadd.f32 %v3731_v30, %v6692_v34  ;;  %v3723_v41 = vadd.f32 %v6767_v37, %v3722_v52  ;;  %v5116_v34 = vadd.f32 %v6791_v4, %v6788_v15  ;;  %v5125_v37 = vadd.f32 %v6815_v14, %v6812_v61 }
 0x1ed   : > { %v5340_v50 = vpop.f32.mrf.mxu1  ;;  %v4075_v16 = vmul.f32 %v3846_v48, %v3846_v48  ;;  %v4077_v15 = vmul.f32 %v3848_v25, %v3848_v25 }
 0x1ee   : > { %v6908_v43 = vpop.f32.mrf.mxu0  ;;  %v4712_v58 = vpack.c.bf16 %v3849_v9, %v3848_v25  ;;  %v3847_v45 = vadd.f32 %v3723_v41, %v6680_v32  ;;  %v3744_v52 = vadd.f32 %v5340_v50, %v5122_v7  ;;  %v4078_v51 = vmul.f32 %v3849_v9, %v3849_v9 }
 0x1ef   : > { %v3735_v59 = vpop.f32.mrf.mxu1 }
 0x1f0   : > { %v6911_v33 = vpop.f32.mrf.mxu0  ;;  %4799 = vst [vmem:[%s6923_s8 + $0x8] sm:$0xff] %v4712_v58   ;;  %v4707_v30 = vpack.c.bf16 %v3847_v45, %v3846_v48  ;;  %v4038_v13 = vadd.f32 %v3847_v45, %v3846_v48  ;;  %v4076_v31 = vmul.f32 %v3847_v45, %v3847_v45  ;;  %v3736_v32 = vadd.f32 %v5116_v34, %v3735_v59 }
 0x1f1   : > { %v5341_v41 = vpop.f32.mrf.mxu1  ;;  %v3852_v47 = vadd.f32 %v3744_v52, %v6713_v46  ;;  %v5128_v34 = vadd.f32 %v6823_v11, %v6820_v27 }
 0x1f2   : > { %v6925_v38 = vpop.f32.mrf.mxu0  ;;  %4708 = vst [vmem:[%s6923_s8] sm:$0xff] %v4707_v30   ;;  %v4039_v4 = vadd.f32 %v4038_v13, %v3848_v25  ;;  %v4107_v61 = vadd.f32 %v4076_v31, %v4075_v16  ;;  %v3747_v14 = vadd.f32 %v5341_v41, %v5125_v37  ;;  %v3850_v7 = vadd.f32 %v3736_v32, %v6699_v19 }
 0x1f3   : > { %v3738_v50 = vpop.f32.mrf.mxu1  ;;  %v5134_v25 = vadd.f32 %v6839_v44, %v6836_v53 }
 0x1f4   : > { %v6932_v42 = vpop.f32.mrf.mxu0  ;;  %v4108_v58 = vadd.f32 %v4107_v61, %v4077_v15  ;;  %v4040_v45 = vadd.f32 %v4039_v4, %v3849_v9  ;;  %v3853_v23 = vadd.f32 %v3747_v14, %v6720_v63  ;;  %v3739_v36 = vadd.f32 %v5119_v49, %v3738_v50 }
 0x1f5   : > { %v5344_v37 = vpop.f32.mrf.mxu1  ;;  %v4079_v19 = vmul.f32 %v3850_v7, %v3850_v7  ;;  %v5137_v63 = vadd.f32 %v6847_v8, %v6844_v3  ;;  %v4081_v4 = vmul.f32 %v3852_v47, %v3852_v47 }
 0x1f6   : > { %v6937_v35 = vpop.f32.mrf.mxu0  ;;  %v4041_v46 = vadd.f32 %v4040_v45, %v3850_v7  ;;  %v4109_v52 = vadd.f32 %v4108_v58, %v4078_v51  ;;  %v4722_v16 = vpack.c.bf16 %v3853_v23, %v3852_v47  ;;  %v3851_v30 = vadd.f32 %v3739_v36, %v6706_v2 }
 0x1f7   : > { %v3751_v9 = vpop.f32.mrf.mxu1  ;;  %v3760_v11 = vadd.f32 %v5344_v37, %v5134_v25  ;;  %v5131_v2 = vadd.f32 %v6831_v54, %v6828_v0  ;;  %v4082_v45 = vmul.f32 %v3853_v23, %v3853_v23 }
 0x1f8   : > { %v6942_v48 = vpop.f32.mrf.mxu0  ;;  %v4110_v27 = vadd.f32 %v4109_v52, %v4079_v19  ;;  %4801 = vst [vmem:[%s6923_s8 + $0x18] sm:$0xff] %v4722_v16   ;;  %v3752_v53 = vadd.f32 %v5128_v34, %v3751_v9  ;;  %v4717_v44 = vpack.c.bf16 %v3851_v30, %v3850_v7  ;;  %v4042_v31 = vadd.f32 %v4041_v46, %v3851_v30 }
 0x1f9   : > { %v4080_v49 = vmul.f32 %v3851_v30, %v3851_v30  ;;  %v5345_v32 = vpop.f32.mrf.mxu1  ;;  %v3856_v7 = vadd.f32 %v3760_v11, %v6742_v17  ;;  %v5149_v17 = vadd.f32 %v6879_v26, %v6874_v24  ;;  %v5143_v26 = vadd.f32 %v6865_v5, %v6860_v18 }
 0x1fa   : > { %v6949_v59 = vpop.f32.mrf.mxu0  ;;  %v3763_v15 = vadd.f32 %v5345_v32, %v5137_v63  ;;  %4800 = vst [vmem:[%s6923_s8 + $0x10] sm:$0xff] %v4717_v44   ;;  %v4043_v61 = vadd.f32 %v4042_v31, %v3852_v47  ;;  %v3854_v3 = vadd.f32 %v3752_v53, %v6727_v56  ;;  %v5140_v47 = vadd.f32 %v6855_v55, %v6852_v22 }
 0x1fb   : > { %v4111_v14 = vadd.f32 %v4110_v27, %v4080_v49  ;;  %v3754_v8 = vpop.f32.mrf.mxu1  ;;  %v5146_v56 = vadd.f32 %v6872_v62, %v6867_v28  ;;  %v4085_v24 = vmul.f32 %v3856_v7, %v3856_v7 }
 0x1fc   : > { %v6952_v13 = vpop.f32.mrf.mxu0  ;;  %v3857_v50 = vadd.f32 %v3763_v15, %v6750_v29  ;;  %v3755_v58 = vadd.f32 %v5131_v2, %v3754_v8  ;;  %v4044_v34 = vadd.f32 %v4043_v61, %v3853_v23  ;;  %v4083_v46 = vmul.f32 %v3854_v3, %v3854_v3 }
 0x1fd   : > { %v4112_v36 = vadd.f32 %v4111_v14, %v4081_v4  ;;  %v5348_v0 = vpop.f32.mrf.mxu1  ;;  %v5152_v14 = vadd.f32 %v6886_v60, %v6881_v10 }
 0x1fe   : > { %v6957_v41 = vpop.f32.mrf.mxu0  ;;  %v4732_v25 = vpack.c.bf16 %v3857_v50, %v3856_v7  ;;  %v3855_v37 = vadd.f32 %v3755_v58, %v6734_v40  ;;  %v4045_v29 = vadd.f32 %v4044_v34, %v3854_v3  ;;  %v3776_v22 = vadd.f32 %v5348_v0, %v5146_v56 }
 0x1ff   : > { %v4113_v19 = vadd.f32 %v4112_v36, %v4082_v45  ;;  %v3767_v23 = vpop.f32.mrf.mxu1  ;;  %v4086_v15 = vmul.f32 %v3857_v50, %v3857_v50 }
 0x200   : > { %v6963_v51 = vpop.f32.mrf.mxu0  ;;  %4803 = vst [vmem:[%s6923_s8 + $0x28] sm:$0xff] %v4732_v25   ;;  %v4727_v16 = vpack.c.bf16 %v3855_v37, %v3854_v3  ;;  %v4084_v30 = vmul.f32 %v3855_v37, %v3855_v37  ;;  %v3768_v55 = vadd.f32 %v5140_v47, %v3767_v23  ;;  %v4046_v28 = vadd.f32 %v4045_v29, %v3855_v37  ;;  %v7106_v23 = vld [vmem:[#allocation12_spill] sm:$0xff] }
 0x201   : > { %v4114_v9 = vadd.f32 %v4113_v19, %v4083_v46  ;;  %v5349_v62 = vpop.f32.mrf.mxu1  ;;  %v3860_v49 = vadd.f32 %v3776_v22, %v6770_v6  ;;  %v5161_v6 = vadd.f32 %v6911_v33, %v6908_v43 }
 0x202   : > { %v6967_v54 = vpop.f32.mrf.mxu0  ;;  %4802 = vst [vmem:[%s6923_s8 + $0x20] sm:$0xff] %v4727_v16   ;;  %v3779_v40 = vadd.f32 %v5349_v62, %v5149_v17  ;;  %v4047_v27 = vadd.f32 %v4046_v28, %v3856_v7  ;;  %v3858_v53 = vadd.f32 %v3768_v55, %v6758_v20  ;;  %v5158_v20 = vadd.f32 %v6903_v39, %v6899_v1  ;;  %v7105_v17 = vld [vmem:[#allocation10_spill] sm:$0xff] }
 0x203   : > { %v4115_v11 = vadd.f32 %v4114_v9, %v4084_v30  ;;  %v3770_v44 = vpop.f32.mrf.mxu1  ;;  %v4089_v43 = vmul.f32 %v3860_v49, %v3860_v49  ;;  %v7107_v30 = vld [vmem:[#allocation13_spill] sm:$0xff] }
 0x204   : > { %v6976_v52 = vpop.f32.mrf.mxu0  ;;  %v3861_v32 = vadd.f32 %v3779_v40, %v6778_v12  ;;  %v3771_v2 = vadd.f32 %v5143_v26, %v3770_v44  ;;  %v4048_v61 = vadd.f32 %v4047_v27, %v3857_v50  ;;  %v4087_v7 = vmul.f32 %v3858_v53, %v3858_v53 }
 0x205   : > { %v4116_v4 = vadd.f32 %v4115_v11, %v4085_v24  ;;  %v5352_v18 = vpop.f32.mrf.mxu1  ;;  %v5164_v40 = vadd.f32 %v6932_v42, %v6925_v38  ;;  %v5170_v24 = vadd.f32 %v6952_v13, %v6949_v59  ;;  %v7108_v11 = vld [vmem:[#allocation11_spill] sm:$0xff]  ;;  %v5173_v44 = vadd.f32 %v6963_v51, %v6957_v41 }
 0x206   : > { %v6979_v63 = vpop.f32.mrf.mxu0  ;;  %v4742_v3 = vpack.c.bf16 %v3861_v32, %v3860_v49  ;;  %v3859_v8 = vadd.f32 %v3771_v2, %v6764_v21  ;;  %v4049_v12 = vadd.f32 %v4048_v61, %v3858_v53  ;;  %v3792_v10 = vadd.f32 %v5352_v18, %v5158_v20  ;;  %v7104_v21 = vld [vmem:[#allocation27_spill] sm:$0xff] }
 0x207   : > { %v4117_v58 = vadd.f32 %v4116_v4, %v4086_v15  ;;  %v3783_v50 = vpop.f32.mrf.mxu1  ;;  %v5155_v56 = vadd.f32 %v7104_v21, %v6890_v57  ;;  %v4090_v9 = vmul.f32 %v3861_v32, %v3861_v32  ;;  %v5167_v41 = vadd.f32 %v6942_v48, %v6937_v35 }
 0x208   : > { %v6985_v31 = vpop.f32.mrf.mxu0  ;;  %4805 = vst [vmem:[%s6923_s8 + $0x38] sm:$0xff] %v4742_v3   ;;  %v4737_v36 = vpack.c.bf16 %v3859_v8, %v3858_v53  ;;  %v4088_v34 = vmul.f32 %v3859_v8, %v3859_v8  ;;  %v3784_v60 = vadd.f32 %v5152_v14, %v3783_v50  ;;  %v4050_v1 = vadd.f32 %v4049_v12, %v3859_v8  ;;  %v7109_v12 = vld [vmem:[#allocation14_spill] sm:$0xff] }
 0x209   : > { %v4118_v0 = vadd.f32 %v4117_v58, %v4087_v7  ;;  %v5353_v39 = vpop.f32.mrf.mxu1  ;;  %v3864_v16 = vadd.f32 %v3792_v10, %v7106_v23  ;;  %v7111_v10 = vld [vmem:[#allocation17_spill] sm:$0xff] }
 0x20a   : > { %v6989_v5 = vpop.f32.mrf.mxu0  ;;  %4804 = vst [vmem:[%s6923_s8 + $0x30] sm:$0xff] %v4737_v36   ;;  %v3795_v33 = vadd.f32 %v5353_v39, %v5161_v6  ;;  %v4051_v25 = vadd.f32 %v4050_v1, %v3860_v49  ;;  %v3862_v29 = vadd.f32 %v3784_v60, %v7105_v17  ;;  %v7110_v36 = vld [vmem:[#allocation16_spill] sm:$0xff] }
 0x20b   : > { %v4119_v37 = vadd.f32 %v4118_v0, %v4088_v34  ;;  %v3786_v46 = vpop.f32.mrf.mxu1  ;;  %v4093_v3 = vmul.f32 %v3864_v16, %v3864_v16 }
 0x20c   : > { %v6998_v45 = vpop.f32.mrf.mxu0  ;;  %v3865_v22 = vadd.f32 %v3795_v33, %v7107_v30  ;;  %v3787_v55 = vadd.f32 %v5155_v56, %v3786_v46  ;;  %v4052_v62 = vadd.f32 %v4051_v25, %v3861_v32  ;;  %v4091_v2 = vmul.f32 %v3862_v29, %v3862_v29  ;;  %v7112_v25 = vld [vmem:[#allocation15_spill] sm:$0xff] }
 0x20d   : > { %v4120_v28 = vadd.f32 %v4119_v37, %v4089_v43  ;;  %v5356_v26 = vpop.f32.mrf.mxu1  ;;  %v5176_v56 = vadd.f32 %v6976_v52, %v6967_v54  ;;  %v5182_v33 = vadd.f32 %v6998_v45, %v6989_v5  ;;  %v7114_v54 = vld [vmem:[#allocation26_spill] sm:$0xff] }
 0x20e   : > { %v5183_v47 = vpop.f32.mrf.mxu0  ;;  %v4752_v27 = vpack.c.bf16 %v3865_v22, %v3864_v16  ;;  %v3863_v53 = vadd.f32 %v3787_v55, %v7108_v11  ;;  %v4053_v49 = vadd.f32 %v4052_v62, %v3862_v29  ;;  %v3808_v38 = vadd.f32 %v5356_v26, %v5170_v24  ;;  %v7113_v62 = vld [vmem:[#allocation24_spill] sm:$0xff]  ;;  %v7117_v11 = vld [vmem:[#allocation21_spill] sm:$0xff] }
 0x20f   : > { %v4121_v15 = vadd.f32 %v4120_v28, %v4090_v9  ;;  %v3799_v32 = vpop.f32.mrf.mxu1  ;;  %v4094_v1 = vmul.f32 %v3865_v22, %v3865_v22  ;;  %v5061_v52 = vadd.f32 %v7114_v54, %v7113_v62  ;;  %v5179_v24 = vadd.f32 %v6985_v31, %v6979_v63  ;;  %v7120_v31 = vld [vmem:[#allocation3_spill] sm:$0xff] }
 0x210   : > { %v5184_v19 = vpop.f32.mrf.mxu0  ;;  %4807 = vst [vmem:[%s6923_s8 + $0x48] sm:$0xff] %v4752_v27   ;;  %v4747_v61 = vpack.c.bf16 %v3863_v53, %v3862_v29  ;;  %v4092_v18 = vmul.f32 %v3863_v53, %v3863_v53  ;;  %v3800_v42 = vadd.f32 %v5164_v40, %v3799_v32  ;;  %v4054_v59 = vadd.f32 %v4053_v49, %v3863_v53  ;;  %v7115_v27 = vld [vmem:[#allocation20_spill] sm:$0xff]  ;;  %v7118_v53 = vld [vmem:[#allocation5_spill] sm:$0xff] }
 0x211   : > { %v4122_v14 = vadd.f32 %v4121_v15, %v4091_v2  ;;  %v5357_v13 = vpop.f32.mrf.mxu1  ;;  %v3868_v34 = vadd.f32 %v3808_v38, %v7110_v36  ;;  %v5185_v23 = vadd.f32 %v5184_v19, %v5183_v47  ;;  %v7116_v47 = vld [vmem:[#allocation4_spill] sm:$0xff] }
 0x212   : > { %v7007_v57 = vpop.f32.mrf.mxu0  ;;  %4806 = vst [vmem:[%s6923_s8 + $0x40] sm:$0xff] %v4747_v61   ;;  %v3811_v51 = vadd.f32 %v5357_v13, %v5173_v44  ;;  %v4055_v8 = vadd.f32 %v4054_v59, %v3864_v16  ;;  %v3866_v7 = vadd.f32 %v3800_v42, %v7109_v12  ;;  %v2844_v19 = vadd.f32 %v7116_v47, %v7115_v27  ;;  %v7119_v61 = vld [vmem:[#allocation18_spill] sm:$0xff] }
 0x213   : > { %v4123_v6 = vadd.f32 %v4122_v14, %v4092_v18  ;;  %v3802_v58 = vpop.f32.mrf.mxu1  ;;  %v2847_v44 = vadd.f32 %v7118_v53, %v7117_v11  ;;  %v4097_v2 = vmul.f32 %v3868_v34, %v3868_v34 }
 0x214   : > { %v7016_v4 = vpop.f32.mrf.mxu0  ;;  %v3869_v60 = vadd.f32 %v3811_v51, %v7111_v10  ;;  %v3803_v0 = vadd.f32 %v5167_v41, %v3802_v58  ;;  %v4056_v21 = vadd.f32 %v4055_v8, %v3865_v22  ;;  %v4095_v29 = vmul.f32 %v3866_v7, %v3866_v7  ;;  %v7121_v58 = vld [vmem:[#allocation19_spill] sm:$0xff] }
 0x215   : > { %v4124_v39 = vadd.f32 %v4123_v6, %v4093_v3  ;;  %v5360_v35 = vpop.f32.mrf.mxu1  ;;  %v2702_v41 = vadd.f32 %v5061_v52, %v7120_v31  ;;  %v5188_v12 = vadd.f32 %v7016_v4, %v7007_v57  ;;  %v7124_v4 = vld [vmem:[#allocation25_spill] sm:$0xff] }
 0x216   : > { %v7019_v20 = vpop.f32.mrf.mxu0  ;;  %v4762_v43 = vpack.c.bf16 %v3869_v60, %v3868_v34  ;;  %v3867_v37 = vadd.f32 %v3803_v0, %v7112_v25  ;;  %v4057_v17 = vadd.f32 %v4056_v21, %v3866_v7  ;;  %v3824_v9 = vadd.f32 %v5360_v35, %v5182_v33  ;;  %v7123_v25 = vld [vmem:[#allocation7_spill] sm:$0xff] }
 0x217   : > { %v4125_v46 = vadd.f32 %v4124_v39, %v4094_v1  ;;  %v3815_v16 = vpop.f32.mrf.mxu1  ;;  %v4098_v51 = vmul.f32 %v3869_v60, %v3869_v60 }
 0x218   : > { %v7025_v50 = vpop.f32.mrf.mxu0  ;;  %4809 = vst [vmem:[%s6923_s8 + $0x58] sm:$0xff] %v4762_v43   ;;  %v4757_v22 = vpack.c.bf16 %v3867_v37, %v3866_v7  ;;  %v4096_v55 = vmul.f32 %v3867_v37, %v3867_v37  ;;  %v3816_v28 = vadd.f32 %v5176_v56, %v3815_v16  ;;  %v4058_v5 = vadd.f32 %v4057_v17, %v3867_v37  ;;  %v7122_v43 = vld [vmem:[#allocation22_spill] sm:$0xff] }
 0x219   : > { %v4126_v26 = vadd.f32 %v4125_v46, %v4095_v29  ;;  %v5361_v45 = vpop.f32.mrf.mxu1  ;;  %v3872_v14 = vadd.f32 %v3824_v9, %v2844_v19  ;;  %v2852_v37 = vadd.f32 %v7123_v25, %v7122_v43  ;;  %v7125_v17 = vld [vmem:[#allocation6_spill] sm:$0xff]  ;;  %v7126_v46 = vld [vmem:[#allocation8_spill] sm:$0xff]  ;;  %v5191_v16 = vadd.f32 %v7025_v50, %v7019_v20 }
 0x21a   : > { %v5192_v48 = vpop.f32.mrf.mxu0  ;;  %4808 = vst [vmem:[%s6923_s8 + $0x50] sm:$0xff] %v4757_v22   ;;  %v3827_v49 = vadd.f32 %v5361_v45, %v5185_v23  ;;  %v4059_v15 = vadd.f32 %v4058_v5, %v3868_v34  ;;  %v3870_v18 = vadd.f32 %v3816_v28, %v7119_v61  ;;  %v2860_v29 = vadd.f32 %v7125_v17, %v7124_v4  ;;  %v7128_v5 = vld [vmem:[#allocation9_spill] sm:$0xff] }
 0x21b   : > { %v4127_v32 = vadd.f32 %v4126_v26, %v4096_v55  ;;  %v3818_v38 = vpop.f32.mrf.mxu1  ;;  %v2863_v23 = vadd.f32 %v7126_v46, %v2702_v41  ;;  %v4101_v22 = vmul.f32 %v3872_v14, %v3872_v14  ;;  %v7127_v26 = vld [vmem:[#allocation23_spill] sm:$0xff] }
 0x21c   : > { %v5193_v30 = vpop.f32.mrf.mxu0  ;;  %v3873_v59 = vadd.f32 %v3827_v49, %v2847_v44  ;;  %v3819_v13 = vadd.f32 %v5179_v24, %v3818_v38  ;;  %v4060_v8 = vadd.f32 %v4059_v15, %v3869_v60  ;;  %v4099_v0 = vmul.f32 %v3870_v18, %v3870_v18 }
 0x21d   : > { %v5194_v63 = vadd.f32 %v5193_v30, %v5192_v48  ;;  %v4128_v3 = vadd.f32 %v4127_v32, %v4097_v2  ;;  %v5364_v6 = vpop.f32.mrf.mxu1  ;;  %v2855_v45 = vadd.f32 %v7128_v5, %v7127_v26 }
 0x21e   : > { %v5195_v40 = vpop.f32.mrf.mxu0  ;;  %v4772_v7 = vpack.c.bf16 %v3873_v59, %v3872_v14  ;;  %v3871_v36 = vadd.f32 %v3819_v13, %v7121_v58  ;;  %v4061_v10 = vadd.f32 %v4060_v8, %v3870_v18  ;;  %v4102_v24 = vmul.f32 %v3873_v59, %v3873_v59 }
 0x21f   : > { %v4129_v1 = vadd.f32 %v4128_v3, %v4098_v51  ;;  %v3831_v39 = vpop.f32.mrf.mxu1  ;;  %v3840_v48 = vadd.f32 %v5364_v6, %v5194_v63 }
 0x220   : > { %v5196_v42 = vpop.f32.mrf.mxu0  ;;  %4811 = vst [vmem:[%s6923_s8 + $0x68] sm:$0xff] %v4772_v7   ;;  %v4767_v21 = vpack.c.bf16 %v3871_v36, %v3870_v18  ;;  %v4100_v35 = vmul.f32 %v3871_v36, %v3871_v36  ;;  %v3832_v56 = vadd.f32 %v5188_v12, %v3831_v39  ;;  %v4062_v60 = vadd.f32 %v4061_v10, %v3871_v36 }
 0x221   : > { %v5197_v34 = vadd.f32 %v5196_v42, %v5195_v40  ;;  %v4130_v33 = vadd.f32 %v4129_v1, %v4099_v0  ;;  %v5365_v57 = vpop.f32.mrf.mxu1  ;;  %v3876_v54 = vadd.f32 %v3840_v48, %v2860_v29 }
 0x222   : > { %4810 = vst [vmem:[%s6923_s8 + $0x60] sm:$0xff] %v4767_v21   ;;  %v4063_v55 = vadd.f32 %v4062_v60, %v3872_v14  ;;  %v3874_v28 = vadd.f32 %v3832_v56, %v2852_v37 }
 0x223   : > { %v3843_v30 = vadd.f32 %v5365_v57, %v5197_v34  ;;  %v4131_v9 = vadd.f32 %v4130_v33, %v4100_v35  ;;  %v3834_v62 = vpop.f32.mrf.mxu1  ;;  %v4105_v32 = vmul.f32 %v3876_v54, %v3876_v54 }
 0x224   : > { %v3835_v40 = vadd.f32 %v5191_v16, %v3834_v62  ;;  %v4064_v47 = vadd.f32 %v4063_v55, %v3873_v59  ;;  %v4103_v11 = vmul.f32 %v3874_v28, %v3874_v28 }
 0x225   : > { %v3877_v52 = vadd.f32 %v3843_v30, %v2863_v23  ;;  %v4132_v27 = vadd.f32 %v4131_v9, %v4101_v22 }
 0x226   : > { %v3875_v20 = vadd.f32 %v3835_v40, %v2855_v45  ;;  %v4065_v50 = vadd.f32 %v4064_v47, %v3874_v28 }
 0x227   : > { %v4782_v19 = vpack.c.bf16 %v3877_v52, %v3876_v54  ;;  %v4133_v53 = vadd.f32 %v4132_v27, %v4102_v24  ;;  %v4106_v38 = vmul.f32 %v3877_v52, %v3877_v52 }
 0x228   : > { %v4777_v44 = vpack.c.bf16 %v3875_v20, %v3874_v28  ;;  %v4104_v49 = vmul.f32 %v3875_v20, %v3875_v20  ;;  %v4066_v15 = vadd.f32 %v4065_v50, %v3875_v20 }
 0x229   : > { %4813 = vst [vmem:[%s6923_s8 + $0x78] sm:$0xff] %v4782_v19   ;;  %v4134_v2 = vadd.f32 %v4133_v53, %v4103_v11 }
 0x22a   : > { %4812 = vst [vmem:[%s6923_s8 + $0x70] sm:$0xff] %v4777_v44   ;;  %v4067_v61 = vadd.f32 %v4066_v15, %v3876_v54 }
 0x22b   : > { %v4135_v18 = vadd.f32 %v4134_v2, %v4104_v49 }
 0x22c   : > { %v4068_v42 = vadd.f32 %v4067_v61, %v3877_v52 }
 0x22d   : > { %v4136_v14 = vadd.f32 %v4135_v18, %v4105_v32 }
 0x22e   : > { %v4069_v59 = vrot.slane %v4068_v42, 4 }
 0x22f   : > { %v4137_v13 = vadd.f32 %v4136_v14, %v4106_v38 }
 0x230   : > { %v4070_v63 = vadd.f32 %v4069_v59, %v4068_v42 }
 0x231   : > { %v4138_v31 = vrot.slane %v4137_v13, 4 }
 0x232   : > { %v4071_v41 = vrot.slane %v4070_v63, 2 }
 0x233   : > { %v4139_v51 = vadd.f32 %v4138_v31, %v4137_v13 }
 0x234   : > { %v4072_v3 = vadd.f32 %v4071_v41, %v4070_v63 }
 0x235   : > { %v4140_v8 = vrot.slane %v4139_v51, 2 }
 0x236   : > { %v4073_v6 = vrot.slane %v4072_v3, 1 }
 0x237   : > { %v4141_v12 = vadd.f32 %v4140_v8, %v4139_v51 }
 0x238   : > { %v4074_v58 = vadd.f32 %v4073_v6, %v4072_v3 }
 0x239   : > { %v4142_v7 = vrot.slane %v4141_v12, 1 }
 0x23b   : > { %v4143_v36 = vadd.f32 %v4142_v7, %v4141_v12 }
 0x23d   : > { %v4145_v34 = vsel %vm583_vm0, %v4074_v58, %v4143_v36 }
 0x23e   : > { %4146 = vst [vmem:[%s238_s11] sm:$0x3] %v4145_v34 }
 0x23f PF: > { %s16_s18 = sadd.s32 1, %s5571_s18  }
 0x240   : > { %p13_p5 = scmp.ge.s32.totalorder %s16_s18, 4  }
 0x242   :  { %15 = sbr.rel (!%p13_p5) target bundleno = 1 (0x1), region = 83 }

</bundles_post_ra>
